<compile_context>
chip_gen: v5e
topology: v5e:2x2
jax: 0.10.0
libtpu: 0.0.40
codegen_flags: <defaults>
</compile_context>

<pallas_src>
import functools

import jax
import jax.numpy as jnp
from jax.experimental import pallas as pl
from jax.experimental.pallas import tpu as pltpu


def _round_up(x, m):
    return ((x + m - 1) // m) * m


def _leaky_relu(x, slope=0.2):
    return jnp.where(x > 0, x, slope * x)


def generator_kernel(z_ref,
                     w1_ref, b1_ref,
                     w2_ref, b2_ref,
                     w3_ref, b3_ref,
                     w4_ref, b4_ref,
                     o_ref):
    """4-layer MLP forward for one batch tile: bf16 MXU matmuls, f32 epilogues."""
    bf16 = jnp.bfloat16
    # z arrives in bf16 already; weights are bf16; accumulate in f32.
    h = jnp.dot(z_ref[...], w1_ref[...],
                preferred_element_type=jnp.float32) + b1_ref[...]
    h = _leaky_relu(h)
    h = jnp.dot(h.astype(bf16), w2_ref[...],
                preferred_element_type=jnp.float32) + b2_ref[...]
    h = _leaky_relu(h)
    h = jnp.dot(h.astype(bf16), w3_ref[...],
                preferred_element_type=jnp.float32) + b3_ref[...]
    h = _leaky_relu(h)
    h = jnp.dot(h.astype(bf16), w4_ref[...],
                preferred_element_type=jnp.float32) + b4_ref[...]
    o_ref[...] = jnp.tanh(h).astype(o_ref.dtype)


# ----------------------------- tiling heuristics -----------------------------

_VMEM_BUDGET = 40 * 1024 * 1024  # headroom under v7x's 64 MiB physical VMEM


def _estimate_vmem(tile_b, latent_dim, image_p):
    """Rough resident-set model for one grid step (bytes)."""
    w_bytes = (latent_dim * 256 + 256 * 512 + 512 * 1024 + 1024 * image_p) * 2
    b_bytes = (256 + 512 + 1024 + image_p) * 4
    z_bytes = 2 * tile_b * latent_dim * 2       # double-buffered bf16 input tile
    out_bytes = 2 * tile_b * image_p * 4        # double-buffered f32 output tile
    act_bytes = tile_b * (256 + 512 + 1024) * 4  # live f32 intermediates (rough)
    return w_bytes + b_bytes + z_bytes + out_bytes + act_bytes


def _pick_tile_b(batch, latent_dim, image_p):
    if batch >= 1024:
        # >= 2 grid steps: the batch axis can shard across v7x's two TCs once
        # per-TC compute amortizes the duplicated weight DMA.
        tile_b = 512
    elif batch <= 16:
        tile_b = 16
    else:
        # Single grid step, padded to a 128-row multiple: full bf16 vreg
        # sublane packing and clean MXU passes, no per-step pipeline overhead.
        tile_b = _round_up(batch, 128)
    # Shrink (halve) if the working set would not fit v7x's VMEM comfortably.
    while tile_b > 16 and _estimate_vmem(tile_b, latent_dim, image_p) > _VMEM_BUDGET:
        tile_b = max(16, tile_b // 2)
    return tile_b


# --------------------------------- pallas_call --------------------------------

@functools.partial(jax.jit, static_argnames=("tile_b", "single_buffer_weights"))
def _generator_forward(z, w1, b1, w2, b2, w3, b3, w4, b4, *,
                       tile_b, single_buffer_weights):
    B, latent_dim = z.shape
    image_p = w4.shape[1]
    assert B % tile_b == 0
    grid_steps = B // tile_b

    z = z.astype(jnp.bfloat16)  # halve per-step z DMA; kernel consumes bf16

    if single_buffer_weights:
        def const_spec(shape):
            # Constant index_map -> the block never changes; one buffer is enough.
            return pl.BlockSpec(shape, lambda i: (0, 0),
                                pipeline_mode=pl.Buffered(1))
    else:
        def const_spec(shape):
            return pl.BlockSpec(shape, lambda i: (0, 0))

    # Only let megacore shard the batch axis when there are actually multiple
    # large steps (B >= 1024); otherwise sharding just duplicates weight DMA.
    semantics = ("parallel",) if (grid_steps > 1 and B >= 1024) else ("arbitrary",)

    return pl.pallas_call(
        generator_kernel,
        out_shape=jax.ShapeDtypeStruct((B, image_p), jnp.float32),
        grid_spec=pltpu.PrefetchScalarGridSpec(
            num_scalar_prefetch=0,
            grid=(grid_steps,),
            in_specs=[
                pl.BlockSpec((tile_b, latent_dim), lambda i: (i, 0)),
                const_spec(w1.shape), const_spec(b1.shape),
                const_spec(w2.shape), const_spec(b2.shape),
                const_spec(w3.shape), const_spec(b3.shape),
                const_spec(w4.shape), const_spec(b4.shape),
            ],
            out_specs=pl.BlockSpec((tile_b, image_p), lambda i: (i, 0)),
        ),
        compiler_params=pltpu.CompilerParams(
            dimension_semantics=semantics,
            vmem_limit_bytes=48 * 1024 * 1024),
    )(z, w1, b1, w2, b2, w3, b3, w4, b4)


# ----------------------------------- wrapper ----------------------------------

def pack_params(params):
    """One-time conversion of f32 params for the kernel.

    Weights -> bf16 (persist in HBM as bf16: no per-call convert traffic).
    Last layer (w4, b4) padded to a 128-multiple output width for lane-dense
    stores; the pad columns are zero and get sliced off after the kernel.
    """
    (w1, b1), (w2, b2), (w3, b3), (w4, b4) = params
    image_dim = w4.shape[1]
    image_p = _round_up(image_dim, 128)
    if image_p != image_dim:
        w4 = jnp.pad(w4, ((0, 0), (0, image_p - image_dim)))
        b4 = jnp.pad(b4, ((0, 0), (0, image_p - image_dim)))
    ws = tuple(w.astype(jnp.bfloat16) for w in (w1, w2, w3, w4))
    bs = tuple(b.astype(jnp.float32) for b in (b1, b2, b3, b4))
    return ws, bs, image_dim


def generator_forward(z, packed, tile_b=None):
    (w1, w2, w3, w4), (b1, b2, b3, b4), image_dim = packed
    B, latent_dim = z.shape
    image_p = w4.shape[1]
    if tile_b is None:
        tile_b = _pick_tile_b(B, latent_dim, image_p)
    padded_b = pl.cdiv(B, tile_b) * tile_b
    if padded_b != B:
        z = jnp.pad(z, ((0, padded_b - B), (0, 0)))
    out = _generator_forward(z, w1, b1, w2, b2, w3, b3, w4, b4,
                             tile_b=tile_b,
                             single_buffer_weights=hasattr(pl, "Buffered"))
    return out[:B, :image_dim]


# ------------------------------- init & reference ------------------------------

def init_params(key, latent_dim, image_dim):
    """PyTorch nn.Linear-style init (uniform +-1/sqrt(fan_in)).

    Weights stored (in_features, out_features); biases as (1, out_features).
    """
    dims = [latent_dim, 256, 512, 1024, image_dim]
    params = []
    for fan_in, fan_out in zip(dims[:-1], dims[1:]):
        key, kw, kb = jax.random.split(key, 3)
        bound = 1.0 / (fan_in ** 0.5)
        w = jax.random.uniform(kw, (fan_in, fan_out), jnp.float32, -bound, bound)
        b = jax.random.uniform(kb, (1, fan_out), jnp.float32, -bound, bound)
        params.append((w, b))
    return params


def reference_forward(z, params, matmul_dtype=jnp.float32):
    h = z.astype(jnp.float32)
    for i, (w, b) in enumerate(params):
        h = jnp.dot(h.astype(matmul_dtype), w.astype(matmul_dtype),
                    preferred_element_type=jnp.float32) + b
        if i < len(params) - 1:
            h = jnp.where(h > 0, h, 0.2 * h)
        else:
            h = jnp.tanh(h)
    return h


if __name__ == "__main__":
    latent_dim = 32
    image_dim = 784   # MNIST-like 28x28; exercises the pad-to-896 lane-dense path
    batch = 16        # small batch -> single grid step, tile_b = 16

    key = jax.random.PRNGKey(0)
    kz, kp = jax.random.split(key)
    z = jax.random.normal(kz, (batch, latent_dim), dtype=jnp.float32)
    params = init_params(kp, latent_dim, image_dim)
    packed = pack_params(params)

    out = generator_forward(z, packed)
    out = jax.block_until_ready(out)

    assert out.shape == (batch, image_dim)
    assert out.dtype == jnp.float32
    assert bool(jnp.all(jnp.isfinite(out)))

    # Tight check vs. a reference using the same bf16-matmul / f32-accumulate recipe.
    ref_bf16 = reference_forward(z, params, matmul_dtype=jnp.bfloat16)
    assert jnp.allclose(out, ref_bf16, atol=5e-3, rtol=5e-3)

    # Loose check vs. exact f32 PyTorch semantics (bf16 matmuls shift results at
    # the ~1e-2 relative level -- documented numerics contract of this kernel).
    ref_f32 = reference_forward(z, params)
    assert jnp.allclose(out, ref_f32, atol=5e-2, rtol=5e-2)

    print("KERNEL_OK")
</pallas_src>

<mosaic_0001>
module attributes {stable_mosaic.version = 11 : i64} {
  func.func @generator_kernel(%arg0: i32, %arg1: memref<16x32xbf16, #tpu.memory_space<vmem>>, %arg2: memref<32x256xbf16, #tpu.memory_space<vmem>>, %arg3: memref<1x256xf32, #tpu.memory_space<vmem>>, %arg4: memref<256x512xbf16, #tpu.memory_space<vmem>>, %arg5: memref<1x512xf32, #tpu.memory_space<vmem>>, %arg6: memref<512x1024xbf16, #tpu.memory_space<vmem>>, %arg7: memref<1x1024xf32, #tpu.memory_space<vmem>>, %arg8: memref<1024x896xbf16, #tpu.memory_space<vmem>>, %arg9: memref<1x896xf32, #tpu.memory_space<vmem>>, %arg10: memref<16x896xf32, #tpu.memory_space<vmem>>) attributes {dimension_semantics = [#tpu.dimension_semantics<arbitrary>], iteration_bounds = array<i64: 1>, scalar_prefetch = 0 : i64, scratch_operands = 0 : i64, tpu.core_type = #tpu.core_type<tc>, window_params = [{transform_indices = @transform_0, window_bounds = array<i64: 16, 32>}, {pipeline_mode = #tpu.pipeline_mode<synchronous>, transform_indices = @transform_1, window_bounds = array<i64: 32, 256>}, {pipeline_mode = #tpu.pipeline_mode<synchronous>, transform_indices = @transform_2, window_bounds = array<i64: 1, 256>}, {pipeline_mode = #tpu.pipeline_mode<synchronous>, transform_indices = @transform_3, window_bounds = array<i64: 256, 512>}, {pipeline_mode = #tpu.pipeline_mode<synchronous>, transform_indices = @transform_4, window_bounds = array<i64: 1, 512>}, {pipeline_mode = #tpu.pipeline_mode<synchronous>, transform_indices = @transform_5, window_bounds = array<i64: 512, 1024>}, {pipeline_mode = #tpu.pipeline_mode<synchronous>, transform_indices = @transform_6, window_bounds = array<i64: 1, 1024>}, {pipeline_mode = #tpu.pipeline_mode<synchronous>, transform_indices = @transform_7, window_bounds = array<i64: 1024, 896>}, {pipeline_mode = #tpu.pipeline_mode<synchronous>, transform_indices = @transform_8, window_bounds = array<i64: 1, 896>}, {transform_indices = @transform_9, window_bounds = array<i64: 16, 896>}]} {
    %c0 = arith.constant 0 : index
    %c0_0 = arith.constant 0 : index
    %0 = vector.load %arg1[%c0, %c0_0] : memref<16x32xbf16, #tpu.memory_space<vmem>>, vector<16x32xbf16>
    %c0_1 = arith.constant 0 : index
    %c0_2 = arith.constant 0 : index
    %1 = vector.load %arg2[%c0_1, %c0_2] : memref<32x256xbf16, #tpu.memory_space<vmem>>, vector<32x256xbf16>
    %cst = arith.constant dense<0.000000e+00> : vector<16x256xf32>
    %2 = tpu.matmul %0, %1, %cst {dimension_numbers = #tpu.dot_dimension_numbers<[1], [0], [0], [1], [0, 0, 1, 1], [], []>} : vector<16x32xbf16>, vector<32x256xbf16>, vector<16x256xf32> -> vector<16x256xf32>
    %c0_3 = arith.constant 0 : index
    %c0_4 = arith.constant 0 : index
    %3 = vector.load %arg3[%c0_3, %c0_4] : memref<1x256xf32, #tpu.memory_space<vmem>>, vector<1x256xf32>
    %4 = vector.broadcast %3 : vector<1x256xf32> to vector<16x256xf32>
    %5 = arith.addf %2, %4 : vector<16x256xf32>
    %cst_5 = arith.constant 0.000000e+00 : f32
    %6 = vector.broadcast %cst_5 : f32 to vector<16x256xf32>
    %7 = arith.cmpf ogt, %5, %6 : vector<16x256xf32>
    %cst_6 = arith.constant 2.000000e-01 : f32
    %8 = vector.broadcast %cst_6 : f32 to vector<16x256xf32>
    %9 = arith.mulf %8, %5 : vector<16x256xf32>
    %10 = arith.select %7, %5, %9 : vector<16x256xi1>, vector<16x256xf32>
    %11 = arith.truncf %10 : vector<16x256xf32> to vector<16x256xbf16>
    %c0_7 = arith.constant 0 : index
    %c0_8 = arith.constant 0 : index
    %12 = vector.load %arg4[%c0_7, %c0_8] : memref<256x512xbf16, #tpu.memory_space<vmem>>, vector<256x512xbf16>
    %cst_9 = arith.constant dense<0.000000e+00> : vector<16x512xf32>
    %13 = tpu.matmul %11, %12, %cst_9 {dimension_numbers = #tpu.dot_dimension_numbers<[1], [0], [0], [1], [0, 0, 1, 1], [], []>} : vector<16x256xbf16>, vector<256x512xbf16>, vector<16x512xf32> -> vector<16x512xf32>
    %c0_10 = arith.constant 0 : index
    %c0_11 = arith.constant 0 : index
    %14 = vector.load %arg5[%c0_10, %c0_11] : memref<1x512xf32, #tpu.memory_space<vmem>>, vector<1x512xf32>
    %15 = vector.broadcast %14 : vector<1x512xf32> to vector<16x512xf32>
    %16 = arith.addf %13, %15 : vector<16x512xf32>
    %cst_12 = arith.constant 0.000000e+00 : f32
    %17 = vector.broadcast %cst_12 : f32 to vector<16x512xf32>
    %18 = arith.cmpf ogt, %16, %17 : vector<16x512xf32>
    %cst_13 = arith.constant 2.000000e-01 : f32
    %19 = vector.broadcast %cst_13 : f32 to vector<16x512xf32>
    %20 = arith.mulf %19, %16 : vector<16x512xf32>
    %21 = arith.select %18, %16, %20 : vector<16x512xi1>, vector<16x512xf32>
    %22 = arith.truncf %21 : vector<16x512xf32> to vector<16x512xbf16>
    %c0_14 = arith.constant 0 : index
    %c0_15 = arith.constant 0 : index
    %23 = vector.load %arg6[%c0_14, %c0_15] : memref<512x1024xbf16, #tpu.memory_space<vmem>>, vector<512x1024xbf16>
    %cst_16 = arith.constant dense<0.000000e+00> : vector<16x1024xf32>
    %24 = tpu.matmul %22, %23, %cst_16 {dimension_numbers = #tpu.dot_dimension_numbers<[1], [0], [0], [1], [0, 0, 1, 1], [], []>} : vector<16x512xbf16>, vector<512x1024xbf16>, vector<16x1024xf32> -> vector<16x1024xf32>
    %c0_17 = arith.constant 0 : index
    %c0_18 = arith.constant 0 : index
    %25 = vector.load %arg7[%c0_17, %c0_18] : memref<1x1024xf32, #tpu.memory_space<vmem>>, vector<1x1024xf32>
    %26 = vector.broadcast %25 : vector<1x1024xf32> to vector<16x1024xf32>
    %27 = arith.addf %24, %26 : vector<16x1024xf32>
    %cst_19 = arith.constant 0.000000e+00 : f32
    %28 = vector.broadcast %cst_19 : f32 to vector<16x1024xf32>
    %29 = arith.cmpf ogt, %27, %28 : vector<16x1024xf32>
    %cst_20 = arith.constant 2.000000e-01 : f32
    %30 = vector.broadcast %cst_20 : f32 to vector<16x1024xf32>
    %31 = arith.mulf %30, %27 : vector<16x1024xf32>
    %32 = arith.select %29, %27, %31 : vector<16x1024xi1>, vector<16x1024xf32>
    %33 = arith.truncf %32 : vector<16x1024xf32> to vector<16x1024xbf16>
    %c0_21 = arith.constant 0 : index
    %c0_22 = arith.constant 0 : index
    %34 = vector.load %arg8[%c0_21, %c0_22] : memref<1024x896xbf16, #tpu.memory_space<vmem>>, vector<1024x896xbf16>
    %cst_23 = arith.constant dense<0.000000e+00> : vector<16x896xf32>
    %35 = tpu.matmul %33, %34, %cst_23 {dimension_numbers = #tpu.dot_dimension_numbers<[1], [0], [0], [1], [0, 0, 1, 1], [], []>} : vector<16x1024xbf16>, vector<1024x896xbf16>, vector<16x896xf32> -> vector<16x896xf32>
    %c0_24 = arith.constant 0 : index
    %c0_25 = arith.constant 0 : index
    %36 = vector.load %arg9[%c0_24, %c0_25] : memref<1x896xf32, #tpu.memory_space<vmem>>, vector<1x896xf32>
    %37 = vector.broadcast %36 : vector<1x896xf32> to vector<16x896xf32>
    %38 = arith.addf %35, %37 : vector<16x896xf32>
    %39 = math.tanh %38 : vector<16x896xf32>
    %c0_26 = arith.constant 0 : index
    %c0_27 = arith.constant 0 : index
    %40 = vector.load %arg10[%c0_26, %c0_27] : memref<16x896xf32, #tpu.memory_space<vmem>>, vector<16x896xf32>
    tpu.vector_store %arg10[%c0_26, %c0_27], %39 {strides = array<i32>} : memref<16x896xf32, #tpu.memory_space<vmem>>, vector<16x896xf32>,
    return
  }
  func.func @transform_0(%arg0: i32) -> (i32, i32) {
    %c0_i32 = arith.constant 0 : i32
    %c0_i32_0 = arith.constant 0 : i32
    return %arg0, %c0_i32 : i32, i32
  }
  func.func @transform_1(%arg0: i32) -> (i32, i32) {
    %c0_i32 = arith.constant 0 : i32
    %c0_i32_0 = arith.constant 0 : i32
    %c0_i32_1 = arith.constant 0 : i32
    return %c0_i32, %c0_i32_0 : i32, i32
  }
  func.func @transform_2(%arg0: i32) -> (i32, i32) {
    %c0_i32 = arith.constant 0 : i32
    %c0_i32_0 = arith.constant 0 : i32
    %c0_i32_1 = arith.constant 0 : i32
    return %c0_i32, %c0_i32_0 : i32, i32
  }
  func.func @transform_3(%arg0: i32) -> (i32, i32) {
    %c0_i32 = arith.constant 0 : i32
    %c0_i32_0 = arith.constant 0 : i32
    %c0_i32_1 = arith.constant 0 : i32
    return %c0_i32, %c0_i32_0 : i32, i32
  }
  func.func @transform_4(%arg0: i32) -> (i32, i32) {
    %c0_i32 = arith.constant 0 : i32
    %c0_i32_0 = arith.constant 0 : i32
    %c0_i32_1 = arith.constant 0 : i32
    return %c0_i32, %c0_i32_0 : i32, i32
  }
  func.func @transform_5(%arg0: i32) -> (i32, i32) {
    %c0_i32 = arith.constant 0 : i32
    %c0_i32_0 = arith.constant 0 : i32
    %c0_i32_1 = arith.constant 0 : i32
    return %c0_i32, %c0_i32_0 : i32, i32
  }
  func.func @transform_6(%arg0: i32) -> (i32, i32) {
    %c0_i32 = arith.constant 0 : i32
    %c0_i32_0 = arith.constant 0 : i32
    %c0_i32_1 = arith.constant 0 : i32
    return %c0_i32, %c0_i32_0 : i32, i32
  }
  func.func @transform_7(%arg0: i32) -> (i32, i32) {
    %c0_i32 = arith.constant 0 : i32
    %c0_i32_0 = arith.constant 0 : i32
    %c0_i32_1 = arith.constant 0 : i32
    return %c0_i32, %c0_i32_0 : i32, i32
  }
  func.func @transform_8(%arg0: i32) -> (i32, i32) {
    %c0_i32 = arith.constant 0 : i32
    %c0_i32_0 = arith.constant 0 : i32
    %c0_i32_1 = arith.constant 0 : i32
    return %c0_i32, %c0_i32_0 : i32, i32
  }
  func.func @transform_9(%arg0: i32) -> (i32, i32) {
    %c0_i32 = arith.constant 0 : i32
    %c0_i32_0 = arith.constant 0 : i32
    return %arg0, %c0_i32 : i32, i32
  }
}

</mosaic_0001>

<bundles_post_ra>
// kernel: _generator_forward.1
= control target key start
LH: loop header
LB: loop body
LE: loop exit
PB: predicated region body
PF: predicated region fallthrough
CT: control target
= control target key end

     0   :  { %14 = vsyncpa [#allocation3], 0  ;;  %s11025_s0 = inlined_call_operand.vmem [shape: bf16[16,32], index: 0, kind: input, shape index: {}]   ;;  %s11026_s1 = inlined_call_operand.hbm [shape: bf16[32,256], index: 1, kind: input, shape index: {}]   ;;  %s11027_s2 = inlined_call_operand.hbm [shape: f32[1,256], index: 2, kind: input, shape index: {}]   ;;  %s11028_s3 = inlined_call_operand.hbm [shape: bf16[256,512], index: 3, kind: input, shape index: {}]   ;;  %s11029_s4 = inlined_call_operand.hbm [shape: f32[1,512], index: 4, kind: input, shape index: {}]   ;;  %s11030_s5 = inlined_call_operand.hbm [shape: bf16[512,1024], index: 5, kind: input, shape index: {}]   ;;  %s11031_s6 = inlined_call_operand.hbm [shape: f32[1,1024], index: 6, kind: input, shape index: {}]   ;;  %s11032_s7 = inlined_call_operand.hbm [shape: bf16[1024,896], index: 7, kind: input, shape index: {}]   ;;  %s11033_s8 = inlined_call_operand.hbm [shape: f32[1,896], index: 8, kind: input, shape index: {}]   ;;  %s11034_s9 = inlined_call_operand.hbm [shape: f32[16,896], index: 9, kind: output, shape index: {}]  }
   0x1   :  { %15 = vsyncpa [#allocation6], 0 }
   0x2   :  { %16 = vsyncpa [#allocation9], 0 }
   0x3   :  { %17 = vsyncpa [#allocation12], 0 }
   0x4   :  { %18 = vsyncpa [#allocation15], 0  ;;  %s40_s11 = sshll.u32 %s11027_s2, 4  ;;  %s41_s11 = int_to_ptr.hbm [resolvable:$true] %s40_s11 }
   0x5   :  { %19 = vsyncpa [#allocation4], 0  ;;  %s10637_s12 = smov [#allocation5]   ;;  %s64_s16 = sshll.u32 %s11029_s4, 4  ;;  %s65_s16 = int_to_ptr.hbm [resolvable:$true] %s64_s16 }
   0x6   :  { %s42_s13 = sshll.u32 %s10637_s12, 4  ;;  %s10638_s17 = smov [#allocation8]   ;;  %s43_s13 = int_to_ptr.vmem [resolvable:$true] %s42_s13 }
   0x7   :  { %45 = dma.hbm_to_vmem [thread:$0]  %s41_s11, 32, %s43_s13, [#allocation6]  }
   0x8   :  { %s66_s18 = sshll.u32 %s10638_s17, 4  ;;  %s88_s21 = sshll.u32 %s11031_s6, 4  ;;  %s67_s18 = int_to_ptr.vmem [resolvable:$true] %s66_s18  ;;  %s89_s21 = int_to_ptr.hbm [resolvable:$true] %s88_s21 }
   0x9   :  { %69 = dma.hbm_to_vmem [thread:$0]  %s65_s16, 64, %s67_s18, [#allocation9]  }
   0xa   :  { %s26_s23 = sshll.u32 %s11026_s1, 4  ;;  %s10639_s24 = smov [#allocation11]   ;;  %s27_s23 = int_to_ptr.hbm [resolvable:$true] %s26_s23 }
   0xb   :  { %s90_s25 = sshll.u32 %s10639_s24, 4  ;;  %s10640_s4 = smov [#allocation2]   ;;  %s91_s25 = int_to_ptr.vmem [resolvable:$true] %s90_s25 }
   0xc   :  { %93 = dma.hbm_to_vmem [thread:$0]  %s89_s21, 128, %s91_s25, [#allocation12]  }
   0xd   :  { %s28_s26 = sshll.u32 %s10640_s4, 4  ;;  %s10641_s27 = smov 128   ;;  %s29_s26 = int_to_ptr.vmem [resolvable:$true] %s28_s26 }
   0xe   :  { %s10642_s28 = smov 8   ;;  %s50_s30 = sshll.u32 %s11028_s3, 4  ;;  %s51_s30 = int_to_ptr.hbm [resolvable:$true] %s50_s30 }
   0xf   :  { %34 = dma.hbm_to_vmem [thread:$0]  %s27_s23, 512, %s29_s26, [#allocation3], %s10641_s27, %s10641_s27, %s10642_s28  }
  0x10   :  { %s10643_s10 = smov [#allocation7]   ;;  %s74_s13 = sshll.u32 %s11030_s5, 4  ;;  %s75_s13 = int_to_ptr.hbm [resolvable:$true] %s74_s13 }
  0x11   :  { %s52_s11 = sshll.u32 %s10643_s10, 4  ;;  %s10644_s14 = smov 256   ;;  %s53_s11 = int_to_ptr.vmem [resolvable:$true] %s52_s11 }
  0x12   :  { %s10645_s15 = smov 16   ;;  %s10646_s16 = smov [#allocation10]  }
  0x13   :  { %58 = dma.hbm_to_vmem [thread:$0]  %s51_s30, 8192, %s53_s11, [#allocation6], %s10644_s14, %s10644_s14, %s10645_s15  }
  0x14   :  { %s76_s17 = sshll.u32 %s10646_s16, 4  ;;  %s10647_s18 = smov 512   ;;  %s77_s17 = int_to_ptr.vmem [resolvable:$true] %s76_s17 }
  0x15   :  { %s10648_s19 = smov 32   ;;  %s98_s21 = sshll.u32 %s11032_s7, 4  ;;  %s99_s21 = int_to_ptr.hbm [resolvable:$true] %s98_s21 }
  0x16   :  { %82 = dma.hbm_to_vmem [thread:$0]  %s75_s13, 32768, %s77_s17, [#allocation9], %s10647_s18, %s10647_s18, %s10648_s19  }
  0x17   :  { %s10649_s2 = smov [#allocation13]   ;;  %s112_s24 = sshll.u32 %s11033_s8, 4  ;;  %s113_s24 = int_to_ptr.hbm [resolvable:$true] %s112_s24 }
  0x18   :  { %s100_s22 = sshll.u32 %s10649_s2, 4  ;;  %s10650_s25 = smov 448   ;;  %s101_s22 = int_to_ptr.vmem [resolvable:$true] %s100_s22 }
  0x19   :  { %s10651_s4 = smov 28   ;;  %s10652_s26 = smov [#allocation14]  }
  0x1a   :  { %106 = dma.hbm_to_vmem [thread:$0]  %s99_s21, 57344, %s101_s22, [#allocation12], %s10650_s25, %s10650_s25, %s10651_s4  }
  0x1b   :  { %s114_s27 = sshll.u32 %s10652_s26, 4  ;;  %s115_s27 = int_to_ptr.vmem [resolvable:$true] %s114_s27 }
  0x1c   :  { %117 = dma.hbm_to_vmem [thread:$0]  %s113_s24, 112, %s115_s27, [#allocation15]  }
  0x1d   :  { %10625 = dma.done.wait [#allocation3], 512  }
  0x1e   :  { %10626 = vsyncadd [#allocation3], 4294966784 }
  0x1f   :  { %10627 = dma.done.wait [#allocation6], 8224  }
  0x20   :  { %10628 = vsyncadd [#allocation6], 4294959072 }
  0x21   :  { %10629 = dma.done.wait [#allocation9], 32832  }
  0x22   :  { %10630 = vsyncadd [#allocation9], 4294934464 }
  0x23   :  { %10631 = dma.done.wait [#allocation12], 57472  }
  0x24   :  { %10632 = vsyncadd [#allocation12], 4294909824 }
  0x25   :  { %10633 = dma.done.wait [#allocation15], 112  }
  0x26   :  { %10634 = vsyncadd [#allocation15], 4294967184  ;;  %v6507_v0 = vld [vmem:[#allocation2 + $0x10] sm:$0xf]  ;;  %v9591_v1 = vld [vmem:[#allocation2 + $0x14] sm:$0xf0] }
  0x27   :  { %v9590_v2 = vld [vmem:[#allocation2 + $0x14] sm:$0xf]  ;;  %v6508_v3 = vor.u32 %v9591_v1, %v6507_v0  ;;  %v6509_v4 = vld [vmem:[#allocation2 + $0x18] sm:$0xf0]  ;;  %v6499_v5 = vld [vmem:[#allocation2] sm:$0xf] }
  0x28   :  { %v9589_v6 = vld [vmem:[#allocation2 + $0x4] sm:$0xf0]  ;;  %v6512_v7 = vor.u32 %v9590_v2, %v6509_v4  ;;  %v9588_v8 = vld [vmem:[#allocation2 + $0x4] sm:$0xf]  ;;  %v6501_v9 = vld [vmem:[#allocation2 + $0x8] sm:$0xf0] }
  0x29   :  { %vm188_vm0 = vcmask 261120   ;;  %198 = vmatpush.bf16.msra.mxu0 %v6508_v3  ;;  %v6500_v10 = vor.u32 %v9589_v6, %v6499_v5  ;;  %v6629_v11 = vld [vmem:[#allocation7 + $0xe0] sm:$0xf]  ;;  %v9622_v12 = vld [vmem:[#allocation7 + $0xec] sm:$0xf0]  ;;  %v6504_v14 = vor.u32 %v9588_v8, %v6501_v9  ;;  %s6476_s30 = sshll.u32 %s11034_s9, 4  ;;  %s6477_s30 = int_to_ptr.hbm [resolvable:$true] %s6476_s30 }
  0x2a   :  { %v6757_v13 = vld [vmem:[#allocation7 + $0x1e0] sm:$0xf]  ;;  %212 = vmatpush.bf16.msra.mxu1 %v6512_v7  ;;  %v6630_v16 = vor.u32 %v9622_v12, %v6629_v11  ;;  %v9654_v17 = vld [vmem:[#allocation7 + $0x1ec] sm:$0xf0]  ;;  %v9620_v18 = vld [vmem:[#allocation7 + $0xe4] sm:$0xf] }
  0x2b   :  { %v9587_v15 = vld [vmem:[%s11025_s0] sm:$0xff]  ;;  %v6631_v19 = vld [vmem:[#allocation7 + $0xf0] sm:$0xf0]  ;;  %v6758_v20 = vor.u32 %v9654_v17, %v6757_v13  ;;  %v9618_v26 = vld [vmem:[#allocation7 + $0xcc] sm:$0xf0]  ;;  %s10653_s0 = smov [#allocation16]  }
  0x2c   :  { %v6634_v21 = vor.u32 %v9620_v18, %v6631_v19  ;;  %v9652_v22 = vld [vmem:[#allocation7 + $0x1e4] sm:$0xf]  ;;  %v6759_v23 = vld [vmem:[#allocation7 + $0x1f0] sm:$0xf0]  ;;  %v6613_v24 = vld [vmem:[#allocation7 + $0xc0] sm:$0xf]  ;;  %628 = vmatpush.bf16.msra.mxu2 %v6630_v16 }
  0x2d   :  { %v6762_v25 = vor.u32 %v9652_v22, %v6759_v23  ;;  %v6741_v27 = vld [vmem:[#allocation7 + $0x1c0] sm:$0xf]  ;;  %v9650_v28 = vld [vmem:[#allocation7 + $0x1cc] sm:$0xf0]  ;;  %199 = vmatpush.bf16.msra.mxu0 %v6500_v10  ;;  %642 = vmatpush.bf16.msra.mxu3 %v6758_v20  ;;  %v6614_v29 = vor.u32 %v9618_v26, %v6613_v24  ;;  %v9616_v31 = vld [vmem:[#allocation7 + $0xc4] sm:$0xf] }
  0x2e   :  { %v6742_v30 = vor.u32 %v9650_v28, %v6741_v27  ;;  %v6615_v32 = vld [vmem:[#allocation7 + $0xd0] sm:$0xf0]  ;;  %v9648_v33 = vld [vmem:[#allocation7 + $0x1c4] sm:$0xf]  ;;  %213 = vmatpush.bf16.msra.mxu1 %v6504_v14  ;;  %v6597_v36 = vld [vmem:[#allocation7 + $0xa0] sm:$0xf] }
  0x2f   :  { %v6618_v34 = vor.u32 %v9616_v31, %v6615_v32  ;;  %v6743_v35 = vld [vmem:[#allocation7 + $0x1d0] sm:$0xf0]  ;;  %v9614_v37 = vld [vmem:[#allocation7 + $0xac] sm:$0xf0]  ;;  %v6725_v39 = vld [vmem:[#allocation7 + $0x1a0] sm:$0xf] }
  0x30   :  { %v6746_v38 = vor.u32 %v9648_v33, %v6743_v35  ;;  %v9646_v40 = vld [vmem:[#allocation7 + $0x1ac] sm:$0xf0]  ;;  %v9612_v41 = vld [vmem:[#allocation7 + $0xa4] sm:$0xf]  ;;  %6513 = vmatmul.msk.bf16.vlgmr.msra.gmra.mxu0 %vm188_vm0, %v9587_v15  ;;  %629 = vmatpush.bf16.msra.mxu2 %v6614_v29  ;;  %v6598_v42 = vor.u32 %v9614_v37, %v6597_v36  ;;  %v6599_v43 = vld [vmem:[#allocation7 + $0xb0] sm:$0xf0] }
  0x31   :  { %656 = vmatpush.bf16.msrb.mxu0 %v6634_v21  ;;  %v9644_v44 = vld [vmem:[#allocation7 + $0x1a4] sm:$0xf]  ;;  %v6727_v45 = vld [vmem:[#allocation7 + $0x1b0] sm:$0xf0]  ;;  %6514 = vmatmul.msk.bf16.vlgmr.msra.gmra.mxu1 %vm188_vm0, %v9587_v15  ;;  %v6726_v46 = vor.u32 %v9646_v40, %v6725_v39  ;;  %v6581_v47 = vld [vmem:[#allocation7 + $0x80] sm:$0xf]  ;;  %v6602_v49 = vor.u32 %v9612_v41, %v6599_v43 }
  0x32   :  { %670 = vmatpush.bf16.msrb.mxu1 %v6762_v25  ;;  %643 = vmatpush.bf16.msra.mxu3 %v6742_v30  ;;  %v9610_v48 = vld [vmem:[#allocation7 + $0x8c] sm:$0xf0]  ;;  %v6709_v50 = vld [vmem:[#allocation7 + $0x180] sm:$0xf]  ;;  %v6730_v52 = vor.u32 %v9644_v44, %v6727_v45  ;;  %v9608_v53 = vld [vmem:[#allocation7 + $0x84] sm:$0xf] }
  0x33   :  { %v9642_v51 = vld [vmem:[#allocation7 + $0x18c] sm:$0xf0]  ;;  %v6583_v54 = vld [vmem:[#allocation7 + $0x90] sm:$0xf0]  ;;  %v6582_v55 = vor.u32 %v9610_v48, %v6581_v47  ;;  %v9640_v56 = vld [vmem:[#allocation7 + $0x184] sm:$0xf] }
  0x34   :  { %630 = vmatpush.bf16.msra.mxu2 %v6598_v42  ;;  %v6711_v57 = vld [vmem:[#allocation7 + $0x190] sm:$0xf0]  ;;  %v6710_v58 = vor.u32 %v9642_v51, %v6709_v50  ;;  %v6565_v59 = vld [vmem:[#allocation7 + $0x60] sm:$0xf]  ;;  %v9606_v60 = vld [vmem:[#allocation7 + $0x6c] sm:$0xf0]  ;;  %v6586_v61 = vor.u32 %v9608_v53, %v6583_v54 }
  0x35   :  { %657 = vmatpush.bf16.msrb.mxu0 %v6618_v34  ;;  %v6693_v62 = vld [vmem:[#allocation7 + $0x160] sm:$0xf]  ;;  %v9638_v63 = vld [vmem:[#allocation7 + $0x16c] sm:$0xf0]  ;;  %v6714_v0 = vor.u32 %v9640_v56, %v6711_v57  ;;  %v9604_v1 = vld [vmem:[#allocation7 + $0x64] sm:$0xf]  ;;  %v6566_v3 = vor.u32 %v9606_v60, %v6565_v59 }
  0x36   :  { %671 = vmatpush.bf16.msrb.mxu1 %v6746_v38  ;;  %644 = vmatpush.bf16.msra.mxu3 %v6726_v46  ;;  %v6567_v2 = vld [vmem:[#allocation7 + $0x70] sm:$0xf0]  ;;  %v9636_v4 = vld [vmem:[#allocation7 + $0x164] sm:$0xf]  ;;  %v6694_v6 = vor.u32 %v9638_v63, %v6693_v62  ;;  %v6549_v7 = vld [vmem:[#allocation7 + $0x40] sm:$0xf] }
  0x37   :  { %v6695_v5 = vld [vmem:[#allocation7 + $0x170] sm:$0xf0]  ;;  %v9602_v8 = vld [vmem:[#allocation7 + $0x4c] sm:$0xf0]  ;;  %v6570_v9 = vor.u32 %v9604_v1, %v6567_v2  ;;  %v6677_v10 = vld [vmem:[#allocation7 + $0x140] sm:$0xf] }
  0x38   :  { %631 = vmatpush.bf16.msra.mxu2 %v6582_v55  ;;  %v9634_v11 = vld [vmem:[#allocation7 + $0x14c] sm:$0xf0]  ;;  %v6698_v12 = vor.u32 %v9636_v4, %v6695_v5  ;;  %v9600_v13 = vld [vmem:[#allocation7 + $0x44] sm:$0xf]  ;;  %v6551_v14 = vld [vmem:[#allocation7 + $0x50] sm:$0xf0]  ;;  %v6550_v15 = vor.u32 %v9602_v8, %v6549_v7 }
  0x39   :  { %658 = vmatpush.bf16.msrb.mxu0 %v6602_v49  ;;  %v9632_v16 = vld [vmem:[#allocation7 + $0x144] sm:$0xf]  ;;  %v6679_v17 = vld [vmem:[#allocation7 + $0x150] sm:$0xf0]  ;;  %v6678_v18 = vor.u32 %v9634_v11, %v6677_v10  ;;  %v6533_v19 = vld [vmem:[#allocation7 + $0x20] sm:$0xf]  ;;  %v6554_v21 = vor.u32 %v9600_v13, %v6551_v14 }
  0x3a   :  { %672 = vmatpush.bf16.msrb.mxu1 %v6730_v52  ;;  %645 = vmatpush.bf16.msra.mxu3 %v6710_v58  ;;  %v9598_v20 = vld [vmem:[#allocation7 + $0x2c] sm:$0xf0]  ;;  %v6661_v22 = vld [vmem:[#allocation7 + $0x120] sm:$0xf]  ;;  %v6682_v24 = vor.u32 %v9632_v16, %v6679_v17  ;;  %v9596_v25 = vld [vmem:[#allocation7 + $0x24] sm:$0xf] }
  0x3b   :  { %v9630_v23 = vld [vmem:[#allocation7 + $0x12c] sm:$0xf0]  ;;  %v6535_v26 = vld [vmem:[#allocation7 + $0x30] sm:$0xf0]  ;;  %v6534_v27 = vor.u32 %v9598_v20, %v6533_v19  ;;  %v9628_v28 = vld [vmem:[#allocation7 + $0x124] sm:$0xf] }
  0x3c   :  { %632 = vmatpush.bf16.msra.mxu2 %v6566_v3  ;;  %v6663_v29 = vld [vmem:[#allocation7 + $0x130] sm:$0xf0]  ;;  %v6662_v30 = vor.u32 %v9630_v23, %v6661_v22  ;;  %v6538_v31 = vor.u32 %v9596_v25, %v6535_v26  ;;  %v6517_v33 = vld [vmem:[#allocation7] sm:$0xf]  ;;  %v9594_v34 = vld [vmem:[#allocation7 + $0xc] sm:$0xf0] }
  0x3d   :  { %659 = vmatpush.bf16.msrb.mxu0 %v6586_v61  ;;  %v6666_v32 = vor.u32 %v9628_v28, %v6663_v29  ;;  %v6645_v35 = vld [vmem:[#allocation7 + $0x100] sm:$0xf]  ;;  %v6518_v36 = vor.u32 %v9594_v34, %v6517_v33  ;;  %v9626_v37 = vld [vmem:[#allocation7 + $0x10c] sm:$0xf0]  ;;  %v9592_v38 = vld [vmem:[#allocation7 + $0x4] sm:$0xf] }
  0x3e   :  { %673 = vmatpush.bf16.msrb.mxu1 %v6714_v0  ;;  %646 = vmatpush.bf16.msra.mxu3 %v6694_v6  ;;  %v6519_v39 = vld [vmem:[#allocation7 + $0x10] sm:$0xf0]  ;;  %v6646_v40 = vor.u32 %v9626_v37, %v6645_v35  ;;  %v9624_v42 = vld [vmem:[#allocation7 + $0x104] sm:$0xf]  ;;  %v6637_v45 = vld [vmem:[#allocation7 + $0xe8] sm:$0xf] }
  0x3f   :  { %v6522_v41 = vor.u32 %v9592_v38, %v6519_v39  ;;  %v6647_v43 = vld [vmem:[#allocation7 + $0x110] sm:$0xf0]  ;;  %v9623_v46 = vld [vmem:[#allocation7 + $0xf4] sm:$0xf0]  ;;  %v6765_v47 = vld [vmem:[#allocation7 + $0x1e8] sm:$0xf] }
  0x40   :  { %633 = vmatpush.bf16.msra.mxu2 %v6550_v15  ;;  %v6650_v44 = vor.u32 %v9624_v42, %v6647_v43  ;;  %v6638_v48 = vor.u32 %v9623_v46, %v6637_v45  ;;  %v9655_v49 = vld [vmem:[#allocation7 + $0x1f4] sm:$0xf0]  ;;  %v9621_v50 = vld [vmem:[#allocation7 + $0xec] sm:$0xf]  ;;  %v6639_v51 = vld [vmem:[#allocation7 + $0xf8] sm:$0xf0] }
  0x41   :  { %660 = vmatpush.bf16.msrb.mxu0 %v6570_v9  ;;  %v6766_v52 = vor.u32 %v9655_v49, %v6765_v47  ;;  %v6642_v53 = vor.u32 %v9621_v50, %v6639_v51  ;;  %v9653_v54 = vld [vmem:[#allocation7 + $0x1ec] sm:$0xf]  ;;  %v6767_v55 = vld [vmem:[#allocation7 + $0x1f8] sm:$0xf0]  ;;  %v6621_v56 = vld [vmem:[#allocation7 + $0xc8] sm:$0xf] }
  0x42   :  { %674 = vmatpush.bf16.msrb.mxu1 %v6698_v12  ;;  %647 = vmatpush.bf16.msra.mxu3 %v6678_v18  ;;  %v6770_v57 = vor.u32 %v9653_v54, %v6767_v55  ;;  %v9619_v58 = vld [vmem:[#allocation7 + $0xd4] sm:$0xf0]  ;;  %v6749_v59 = vld [vmem:[#allocation7 + $0x1c8] sm:$0xf]  ;;  %v9617_v63 = vld [vmem:[#allocation7 + $0xcc] sm:$0xf] }
  0x43   :  { %v9651_v60 = vld [vmem:[#allocation7 + $0x1d4] sm:$0xf0]  ;;  %v6622_v61 = vor.u32 %v9619_v58, %v6621_v56  ;;  %v6623_v0 = vld [vmem:[#allocation7 + $0xd8] sm:$0xf0]  ;;  %v9649_v1 = vld [vmem:[#allocation7 + $0x1cc] sm:$0xf] }
  0x44   :  { %634 = vmatpush.bf16.msra.mxu2 %v6534_v27  ;;  %v6750_v62 = vor.u32 %v9651_v60, %v6749_v59  ;;  %v6626_v2 = vor.u32 %v9617_v63, %v6623_v0  ;;  %v6751_v3 = vld [vmem:[#allocation7 + $0x1d8] sm:$0xf0]  ;;  %v6605_v5 = vld [vmem:[#allocation7 + $0xa8] sm:$0xf]  ;;  %v9615_v6 = vld [vmem:[#allocation7 + $0xb4] sm:$0xf0] }
  0x45   :  { %661 = vmatpush.bf16.msrb.mxu0 %v6554_v21  ;;  %v6754_v4 = vor.u32 %v9649_v1, %v6751_v3  ;;  %v6733_v7 = vld [vmem:[#allocation7 + $0x1a8] sm:$0xf]  ;;  %v6606_v8 = vor.u32 %v9615_v6, %v6605_v5  ;;  %v9647_v9 = vld [vmem:[#allocation7 + $0x1b4] sm:$0xf0]  ;;  %v9613_v10 = vld [vmem:[#allocation7 + $0xac] sm:$0xf] }
  0x46   :  { %675 = vmatpush.bf16.msrb.mxu1 %v6682_v24  ;;  %648 = vmatpush.bf16.msra.mxu3 %v6662_v30  ;;  %v6607_v11 = vld [vmem:[#allocation7 + $0xb8] sm:$0xf0]  ;;  %v6734_v12 = vor.u32 %v9647_v9, %v6733_v7  ;;  %v9645_v14 = vld [vmem:[#allocation7 + $0x1ac] sm:$0xf]  ;;  %v6589_v17 = vld [vmem:[#allocation7 + $0x88] sm:$0xf] }
  0x47   :  { %v6610_v13 = vor.u32 %v9613_v10, %v6607_v11  ;;  %v6735_v15 = vld [vmem:[#allocation7 + $0x1b8] sm:$0xf0]  ;;  %v9611_v18 = vld [vmem:[#allocation7 + $0x94] sm:$0xf0]  ;;  %v6717_v19 = vld [vmem:[#allocation7 + $0x188] sm:$0xf] }
  0x48   :  { %635 = vmatpush.bf16.msra.mxu2 %v6518_v36  ;;  %v6738_v16 = vor.u32 %v9645_v14, %v6735_v15  ;;  %v6590_v20 = vor.u32 %v9611_v18, %v6589_v17  ;;  %v9643_v21 = vld [vmem:[#allocation7 + $0x194] sm:$0xf0]  ;;  %v9609_v22 = vld [vmem:[#allocation7 + $0x8c] sm:$0xf]  ;;  %v6591_v23 = vld [vmem:[#allocation7 + $0x98] sm:$0xf0] }
  0x49   :  { %662 = vmatpush.bf16.msrb.mxu0 %v6538_v31  ;;  %v6718_v24 = vor.u32 %v9643_v21, %v6717_v19  ;;  %v6594_v25 = vor.u32 %v9609_v22, %v6591_v23  ;;  %v9641_v26 = vld [vmem:[#allocation7 + $0x18c] sm:$0xf]  ;;  %v6719_v27 = vld [vmem:[#allocation7 + $0x198] sm:$0xf0]  ;;  %v6573_v29 = vld [vmem:[#allocation7 + $0x68] sm:$0xf] }
  0x4a   :  { %676 = vmatpush.bf16.msrb.mxu1 %v6666_v32  ;;  %649 = vmatpush.bf16.msra.mxu3 %v6646_v40  ;;  %v6722_v28 = vor.u32 %v9641_v26, %v6719_v27  ;;  %v9607_v30 = vld [vmem:[#allocation7 + $0x74] sm:$0xf0]  ;;  %v6701_v31 = vld [vmem:[#allocation7 + $0x168] sm:$0xf]  ;;  %v9605_v34 = vld [vmem:[#allocation7 + $0x6c] sm:$0xf] }
  0x4b   :  { %v6574_v32 = vor.u32 %v9607_v30, %v6573_v29  ;;  %v9639_v33 = vld [vmem:[#allocation7 + $0x174] sm:$0xf0]  ;;  %v6575_v35 = vld [vmem:[#allocation7 + $0x78] sm:$0xf0]  ;;  %v9637_v38 = vld [vmem:[#allocation7 + $0x16c] sm:$0xf] }
  0x4c   :  { %684 = vmatpush.bf16.msrb.mxu2 %v6638_v48  ;;  %v6702_v36 = vor.u32 %v9639_v33, %v6701_v31  ;;  %v6578_v37 = vor.u32 %v9605_v34, %v6575_v35  ;;  %v6703_v39 = vld [vmem:[#allocation7 + $0x178] sm:$0xf0]  ;;  %v6557_v40 = vld [vmem:[#allocation7 + $0x48] sm:$0xf]  ;;  %v9603_v42 = vld [vmem:[#allocation7 + $0x54] sm:$0xf0] }
  0x4d   :  { %663 = vmatpush.bf16.msrb.mxu0 %v6522_v41  ;;  %v6706_v41 = vor.u32 %v9637_v38, %v6703_v39  ;;  %v6685_v43 = vld [vmem:[#allocation7 + $0x148] sm:$0xf]  ;;  %v9601_v45 = vld [vmem:[#allocation7 + $0x4c] sm:$0xf]  ;;  %v6559_v46 = vld [vmem:[#allocation7 + $0x58] sm:$0xf0]  ;;  %v6558_v48 = vor.u32 %v9603_v42, %v6557_v40 }
  0x4e   :  { %677 = vmatpush.bf16.msrb.mxu1 %v6650_v44  ;;  %698 = vmatpush.bf16.msrb.mxu3 %v6766_v52  ;;  %v9635_v44 = vld [vmem:[#allocation7 + $0x154] sm:$0xf0]  ;;  %v9633_v47 = vld [vmem:[#allocation7 + $0x14c] sm:$0xf]  ;;  %v6687_v49 = vld [vmem:[#allocation7 + $0x158] sm:$0xf0]  ;;  %v6562_v51 = vor.u32 %v9601_v45, %v6559_v46 }
  0x4f   :  { %v6686_v50 = vor.u32 %v9635_v44, %v6685_v43  ;;  %v6541_v52 = vld [vmem:[#allocation7 + $0x28] sm:$0xf]  ;;  %v6690_v55 = vor.u32 %v9633_v47, %v6687_v49  ;;  %v9631_v56 = vld [vmem:[#allocation7 + $0x134] sm:$0xf0]  ;;  %v6543_v58 = vld [vmem:[#allocation7 + $0x38] sm:$0xf0] }
  0x50   :  { %685 = vmatpush.bf16.msrb.mxu2 %v6622_v61  ;;  %v6669_v54 = vld [vmem:[#allocation7 + $0x128] sm:$0xf]  ;;  %v9629_v59 = vld [vmem:[#allocation7 + $0x12c] sm:$0xf]  ;;  %v6671_v60 = vld [vmem:[#allocation7 + $0x138] sm:$0xf0] }
  0x51   :  { %712 = vmatpush.bf16.msra.mxu0 %v6642_v53  ;;  %v9599_v53 = vld [vmem:[#allocation7 + $0x34] sm:$0xf0]  ;;  %v6525_v0 = vld [vmem:[#allocation7 + $0x8] sm:$0xf]  ;;  %v6674_v3 = vor.u32 %v9629_v59, %v6671_v60  ;;  %v9593_v5 = vld [vmem:[#allocation7 + $0xc] sm:$0xf] }
  0x52   :  { %726 = vmatpush.bf16.msra.mxu1 %v6770_v57  ;;  %699 = vmatpush.bf16.msrb.mxu3 %v6750_v62  ;;  %v9597_v57 = vld [vmem:[#allocation7 + $0x2c] sm:$0xf]  ;;  %v6542_v61 = vor.u32 %v9599_v53, %v6541_v52  ;;  %v6670_v62 = vor.u32 %v9631_v56, %v6669_v54  ;;  %v9595_v1 = vld [vmem:[#allocation7 + $0x14] sm:$0xf0]  ;;  %v6527_v6 = vld [vmem:[#allocation7 + $0x18] sm:$0xf0] }
  0x53   :  { %v6546_v63 = vor.u32 %v9597_v57, %v6543_v58  ;;  %v9625_v7 = vld [vmem:[#allocation7 + $0x10c] sm:$0xf]  ;;  %v6526_v9 = vor.u32 %v9595_v1, %v6525_v0  ;;  %v6530_v11 = vor.u32 %v9593_v5, %v6527_v6  ;;  %v7253_v21 = vld [vmem:[#allocation10 + $0x3c0] sm:$0xf]  ;;  %s6474_s28 = sshll.u32 %s10653_s0, 4  ;;  %s10654_s10 = smov 896   ;;  %s6475_s28 = int_to_ptr.vmem [resolvable:$true] %s6474_s28 }
  0x54   :  { %686 = vmatpush.bf16.msrb.mxu2 %v6606_v8  ;;  %v6655_v8 = vld [vmem:[#allocation7 + $0x118] sm:$0xf0]  ;;  %v9780_v22 = vld [vmem:[#allocation10 + $0x3dc] sm:$0xf0]  ;;  %s10655_s11 = smov 56  }
  0x55   :  { %713 = vmatpush.bf16.msra.mxu0 %v6626_v2  ;;  %v6653_v2 = vld [vmem:[#allocation7 + $0x108] sm:$0xf]  ;;  %v6997_v26 = vld [vmem:[#allocation10 + $0x1c0] sm:$0xf]  ;;  %v7254_v38 = vor.u32 %v9780_v22, %v7253_v21 }
  0x56   :  { %727 = vmatpush.bf16.msra.mxu1 %v6754_v4  ;;  %700 = vmatpush.bf16.msrb.mxu3 %v6734_v12  ;;  %v9627_v4 = vld [vmem:[#allocation7 + $0x114] sm:$0xf0]  ;;  %v157_v12 = vld [vmem:[#allocation5] sm:$0x3]  ;;  %v9716_v27 = vld [vmem:[#allocation10 + $0x1dc] sm:$0xf0] }
  0x57   :  { %v6654_v10 = vor.u32 %v9627_v4, %v6653_v2  ;;  %v159_v15 = vperm.slane %v157_v12, 0  ;;  %v160_v17 = vperm.slane %v157_v12, 1  ;;  %v7765_v30 = vld [vmem:[#allocation10 + $0x7c0] sm:$0xf]  ;;  %v6998_v44 = vor.u32 %v9716_v27, %v6997_v26 }
  0x58   :  { %687 = vmatpush.bf16.msrb.mxu2 %v6590_v20  ;;  %v9908_v31 = vld [vmem:[#allocation10 + $0x7dc] sm:$0xf0] }
  0x59   :  { %714 = vmatpush.bf16.msra.mxu0 %v6610_v13  ;;  %v6658_v13 = vor.u32 %v9625_v7, %v6655_v8  ;;  %v7509_v33 = vld [vmem:[#allocation10 + $0x5c0] sm:$0xf] }
  0x5a   :  { %728 = vmatpush.bf16.msra.mxu1 %v6738_v16  ;;  %701 = vmatpush.bf16.msrb.mxu3 %v6718_v24  ;;  %v9844_v35 = vld [vmem:[#allocation10 + $0x5dc] sm:$0xf0] }
  0x5b   :  { %v7221_v42 = vld [vmem:[#allocation10 + $0x380] sm:$0xf] }
  0x5c   :  { %688 = vmatpush.bf16.msrb.mxu2 %v6574_v32  ;;  %v9772_v43 = vld [vmem:[#allocation10 + $0x39c] sm:$0xf0] }
  0x5d   :  { %715 = vmatpush.bf16.msra.mxu0 %v6594_v25  ;;  %v6965_v46 = vld [vmem:[#allocation10 + $0x180] sm:$0xf]  ;;  %v7222_v54 = vor.u32 %v9772_v43, %v7221_v42 }
  0x5e   :  { %729 = vmatpush.bf16.msra.mxu1 %v6722_v28  ;;  %702 = vmatpush.bf16.msrb.mxu3 %v6702_v36  ;;  %v9708_v47 = vld [vmem:[#allocation10 + $0x19c] sm:$0xf0] }
  0x5f   :  { %v7733_v49 = vld [vmem:[#allocation10 + $0x780] sm:$0xf]  ;;  %v6966_v57 = vor.u32 %v9708_v47, %v6965_v46 }
  0x60   :  { %689 = vmatpush.bf16.msrb.mxu2 %v6558_v48  ;;  %v7766_v48 = vor.u32 %v9908_v31, %v7765_v30  ;;  %v7477_v52 = vld [vmem:[#allocation10 + $0x580] sm:$0xf] }
  0x61   :  { %716 = vmatpush.bf16.msra.mxu0 %v6578_v37  ;;  %v9836_v53 = vld [vmem:[#allocation10 + $0x59c] sm:$0xf0] }
  0x62   :  { %730 = vmatpush.bf16.msra.mxu1 %v6706_v41  ;;  %703 = vmatpush.bf16.msrb.mxu3 %v6686_v50  ;;  %v7510_v50 = vor.u32 %v9844_v35, %v7509_v33  ;;  %v9764_v56 = vld [vmem:[#allocation10 + $0x35c] sm:$0xf0] }
  0x63   :  { %v6933_v58 = vld [vmem:[#allocation10 + $0x140] sm:$0xf] }
  0x64   :  { %690 = vmatpush.bf16.msrb.mxu2 %v6542_v61  ;;  %v9700_v59 = vld [vmem:[#allocation10 + $0x15c] sm:$0xf0] }
  0x65   :  { %717 = vmatpush.bf16.msra.mxu0 %v6562_v51  ;;  %v9900_v51 = vld [vmem:[#allocation10 + $0x79c] sm:$0xf0]  ;;  %v6934_v5 = vor.u32 %v9700_v59, %v6933_v58  ;;  %v7223_v58 = vld [vmem:[#allocation10 + $0x3a0] sm:$0xf0] }
  0x66   :  { %731 = vmatpush.bf16.msra.mxu1 %v6690_v55  ;;  %704 = vmatpush.bf16.msrb.mxu3 %v6670_v62  ;;  %v7189_v55 = vld [vmem:[#allocation10 + $0x340] sm:$0xf]  ;;  %v7734_v60 = vor.u32 %v9900_v51, %v7733_v49  ;;  %v7478_v62 = vor.u32 %v9836_v53, %v7477_v52  ;;  %v9712_v51 = vld [vmem:[#allocation10 + $0x1c4] sm:$0xf] }
  0x67   :  { %v7701_v61 = vld [vmem:[#allocation10 + $0x740] sm:$0xf]  ;;  %v7190_v2 = vor.u32 %v9764_v56, %v7189_v55  ;;  %v6999_v52 = vld [vmem:[#allocation10 + $0x1e0] sm:$0xf0] }
  0x68   :  { %691 = vmatpush.bf16.msrb.mxu2 %v6526_v9  ;;  %v7445_v0 = vld [vmem:[#allocation10 + $0x540] sm:$0xf]  ;;  %v9768_v56 = vld [vmem:[#allocation10 + $0x384] sm:$0xf] }
  0x69   :  { %718 = vmatpush.bf16.msra.mxu0 %v6546_v63  ;;  %v9892_v63 = vld [vmem:[#allocation10 + $0x75c] sm:$0xf0]  ;;  %v9704_v59 = vld [vmem:[#allocation10 + $0x184] sm:$0xf] }
  0x6a   :  { %732 = vmatpush.bf16.msra.mxu1 %v6674_v3  ;;  %705 = vmatpush.bf16.msrb.mxu3 %v6654_v10  ;;  %v9828_v1 = vld [vmem:[#allocation10 + $0x55c] sm:$0xf0]  ;;  %v7702_v8 = vor.u32 %v9892_v63, %v7701_v61  ;;  %v7226_v61 = vor.u32 %v9768_v56, %v7223_v58  ;;  %v9760_v63 = vld [vmem:[#allocation10 + $0x344] sm:$0xf] }
  0x6b   :  { %v7157_v3 = vld [vmem:[#allocation10 + $0x300] sm:$0xf]  ;;  %v7446_v10 = vor.u32 %v9828_v1, %v7445_v0  ;;  %v7191_v0 = vld [vmem:[#allocation10 + $0x360] sm:$0xf0] }
  0x6c   :  { %v9756_v4 = vld [vmem:[#allocation10 + $0x31c] sm:$0xf0]  ;;  %v7194_v1 = vor.u32 %v9760_v63, %v7191_v0  ;;  %v9720_v56 = vld [vmem:[#allocation10 + $0x204] sm:$0xf] }
  0x6d   :  { %719 = vmatpush.bf16.msra.mxu0 %v6530_v11  ;;  %v6901_v6 = vld [vmem:[#allocation10 + $0x100] sm:$0xf]  ;;  %v9880_v58 = vld [vmem:[#allocation10 + $0x704] sm:$0xf] }
  0x6e   :  { %733 = vmatpush.bf16.msra.mxu1 %v6658_v13  ;;  %v9692_v7 = vld [vmem:[#allocation10 + $0x11c] sm:$0xf0]  ;;  %v6807_v63 = vld [vmem:[#allocation10 + $0x60] sm:$0xf0] }
  0x6f   :  { %v7669_v9 = vld [vmem:[#allocation10 + $0x700] sm:$0xf] }
  0x70   :  { %v9884_v11 = vld [vmem:[#allocation10 + $0x71c] sm:$0xf0] }
  0x71   :  { %v7413_v12 = vld [vmem:[#allocation10 + $0x500] sm:$0xf] }
  0x72   :  { %v9820_v13 = vld [vmem:[#allocation10 + $0x51c] sm:$0xf0] }
  0x73   :  { %v7637_v21 = vld [vmem:[#allocation10 + $0x6c0] sm:$0xf]  ;;  %v7414_v22 = vor.u32 %v9820_v13, %v7413_v12  ;;  %v6935_v12 = vld [vmem:[#allocation10 + $0x160] sm:$0xf0] }
  0x74   :  { %v7093_v27 = vld [vmem:[#allocation10 + $0x280] sm:$0xf] }
  0x75   :  { %v6837_v30 = vld [vmem:[#allocation10 + $0x80] sm:$0xf] }
  0x76   :  { %v9676_v31 = vld [vmem:[#allocation10 + $0x9c] sm:$0xf0] }
  0x77   :  { %v9868_v35 = vld [vmem:[#allocation10 + $0x69c] sm:$0xf0] }
  0x78   :  { %v9668_v42 = vld [vmem:[#allocation10 + $0x5c] sm:$0xf0] }
  0x79   :  { %v9724_v46 = vld [vmem:[#allocation10 + $0x21c] sm:$0xf0] }
  0x7a   :  { %v6773_v49 = vld [vmem:[#allocation10] sm:$0xf] }
  0xad   :  { %v201_v14 = vpop.f32.mrf.mxu0 }
  0xae   :  { %v215_v16 = vpop.f32.mrf.mxu1  ;;  %v202_v18 = vadd.f32 %v201_v14, %v159_v15  ;;  %v7158_v14 = vor.u32 %v9756_v4, %v7157_v3  ;;  %v9860_v3 = vld [vmem:[#allocation10 + $0x65c] sm:$0xf0] }
  0xaf   :  { %v216_v19 = vadd.f32 %v215_v16, %v160_v17  ;;  %v9748_v16 = vld [vmem:[#allocation10 + $0x2dc] sm:$0xf0] }
  0xb0   :  { %vm220_vm1 = vcmp.gt.f32.partialorder %v202_v18, 0.0  ;;  %v224_v23 = vmul.f32 0.2, %v202_v18 }
  0xb1   :  { %v225_v28 = vmul.f32 0.2, %v216_v19  ;;  %vm221_vm2 = vcmp.gt.f32.partialorder %v216_v19, 0.0 }
  0xb2   :  { %v228_v36 = vsel %vm220_vm1, %v202_v18, %v224_v23  ;;  %v6869_v18 = vld [vmem:[#allocation10 + $0xc0] sm:$0xf] }
  0xb3   :  { %v229_v39 = vsel %vm221_vm2, %v216_v19, %v225_v28  ;;  %v9684_v19 = vld [vmem:[#allocation10 + $0xdc] sm:$0xf0] }
  0xb4   :  { %v9876_v23 = vld [vmem:[#allocation10 + $0x6dc] sm:$0xf0]  ;;  %v6870_v28 = vor.u32 %v9684_v19, %v6869_v18  ;;  %v7127_v18 = vld [vmem:[#allocation10 + $0x2e0] sm:$0xf0] }
  0xb5   :  { %v203_v20 = vpop.f32.mrf.mxu0  ;;  %v9904_v19 = vld [vmem:[#allocation10 + $0x7c4] sm:$0xf] }
  0xb6   :  { %v204_v24 = vadd.f32 %v203_v20, %v159_v15  ;;  %v217_v25 = vpop.f32.mrf.mxu1  ;;  %v7125_v15 = vld [vmem:[#allocation10 + $0x2c0] sm:$0xf]  ;;  %v7670_v20 = vor.u32 %v9884_v11, %v7669_v9  ;;  %v9696_v11 = vld [vmem:[#allocation10 + $0x144] sm:$0xf] }
  0xb7   :  { %v218_v29 = vadd.f32 %v217_v25, %v160_v17  ;;  %v6902_v17 = vor.u32 %v9692_v7, %v6901_v6  ;;  %v9812_v25 = vld [vmem:[#allocation10 + $0x4dc] sm:$0xf0]  ;;  %v7126_v26 = vor.u32 %v9748_v16, %v7125_v15  ;;  %v7159_v6 = vld [vmem:[#allocation10 + $0x320] sm:$0xf0]  ;;  %v6938_v13 = vor.u32 %v9696_v11, %v6935_v12 }
  0xb8   :  { %vm222_vm3 = vcmp.gt.f32.partialorder %v204_v24, 0.0  ;;  %v226_v32 = vmul.f32 0.2, %v204_v24  ;;  %v9804_v9 = vld [vmem:[#allocation10 + $0x49c] sm:$0xf0] }
  0xb9   :  { %vm223_vm4 = vcmp.gt.f32.partialorder %v218_v29, 0.0  ;;  %v227_v34 = vmul.f32 0.2, %v218_v29  ;;  %v9852_v15 = vld [vmem:[#allocation10 + $0x61c] sm:$0xf0] }
  0xba   :  { %v230_v37 = vsel %vm222_vm3, %v204_v24, %v226_v32  ;;  %v7381_v24 = vld [vmem:[#allocation10 + $0x4c0] sm:$0xf]  ;;  %v7638_v32 = vor.u32 %v9876_v23, %v7637_v21  ;;  %v7767_v21 = vld [vmem:[#allocation10 + $0x7e0] sm:$0xf0] }
  0xbb   :  { %v10736_v40 = vpack.c.bf16 %v230_v37, %v228_v36  ;;  %v231_v41 = vsel %vm223_vm4, %v218_v29, %v227_v34  ;;  %v9740_v29 = vld [vmem:[#allocation10 + $0x29c] sm:$0xf0]  ;;  %v7382_v33 = vor.u32 %v9812_v25, %v7381_v24  ;;  %v7770_v24 = vor.u32 %v9904_v19, %v7767_v21  ;;  %v7415_v11 = vld [vmem:[#allocation10 + $0x520] sm:$0xf0]  ;;  %v10748_v21 = vld [vmem:[#allocation8] sm:$0xf] }
  0xbc   :  { %v10738_v45 = vpack.c.bf16 %v231_v41, %v229_v39  ;;  %v7605_v34 = vld [vmem:[#allocation10 + $0x680] sm:$0xf]  ;;  %v7094_v36 = vor.u32 %v9740_v29, %v7093_v27  ;;  %v6903_v27 = vld [vmem:[#allocation10 + $0x120] sm:$0xf0] }
  0xbd   :  { %636 = vmatmul.bf16.vlgmr.msra.gmra.mxu2 %v10736_v40  ;;  %664 = vmatmul.bf16.vlgmr.msrb.gmra.mxu0 %v10736_v40  ;;  %v7061_v37 = vld [vmem:[#allocation10 + $0x240] sm:$0xf]  ;;  %v7606_v43 = vor.u32 %v9868_v35, %v7605_v34  ;;  %v9736_v29 = vld [vmem:[#allocation10 + $0x284] sm:$0xf] }
  0xbe   :  { %650 = vmatmul.bf16.vlgmr.msra.gmra.mxu3 %v10738_v45  ;;  %678 = vmatmul.bf16.vlgmr.msrb.gmra.mxu1 %v10738_v45  ;;  %v9732_v39 = vld [vmem:[#allocation10 + $0x25c] sm:$0xf0]  ;;  %v9856_v19 = vld [vmem:[#allocation10 + $0x644] sm:$0xf] }
  0xbf   :  { %2336 = vmatpush.bf16.msra.mxu3 %v7254_v38  ;;  %2322 = vmatpush.bf16.msra.mxu2 %v6998_v44  ;;  %v6838_v38 = vor.u32 %v9676_v31, %v6837_v30  ;;  %v6805_v41 = vld [vmem:[#allocation10 + $0x40] sm:$0xf]  ;;  %v7062_v44 = vor.u32 %v9732_v39, %v7061_v37  ;;  %v7095_v30 = vld [vmem:[#allocation10 + $0x2a0] sm:$0xf0] }
  0xc0   :  { %2364 = vmatpush.bf16.msrb.mxu1 %v7766_v48  ;;  %2350 = vmatpush.bf16.msrb.mxu0 %v7510_v50  ;;  %v6806_v47 = vor.u32 %v9668_v42, %v6805_v41  ;;  %v9776_v48 = vld [vmem:[#allocation10 + $0x3c4] sm:$0xf]  ;;  %v9796_v23 = vld [vmem:[#allocation10 + $0x45c] sm:$0xf0] }
  0xc1   :  { %v7255_v50 = vld [vmem:[#allocation10 + $0x3e0] sm:$0xf0]  ;;  %v7285_v34 = vld [vmem:[#allocation10 + $0x400] sm:$0xf] }
  0xc2   :  { %v7258_v55 = vor.u32 %v9776_v48, %v7255_v50  ;;  %v9896_v31 = vld [vmem:[#allocation10 + $0x784] sm:$0xf]  ;;  %v9788_v35 = vld [vmem:[#allocation10 + $0x41c] sm:$0xf0] }
  0xc3   :  { %2337 = vmatpush.bf16.msra.mxu3 %v7222_v54  ;;  %2323 = vmatpush.bf16.msra.mxu2 %v6966_v57  ;;  %v7002_v57 = vor.u32 %v9712_v51, %v6999_v52  ;;  %v7286_v37 = vor.u32 %v9788_v35, %v7285_v34  ;;  %v6871_v39 = vld [vmem:[#allocation10 + $0xe0] sm:$0xf0] }
  0xc4   :  { %2365 = vmatpush.bf16.msrb.mxu1 %v7734_v60  ;;  %2351 = vmatpush.bf16.msrb.mxu0 %v7478_v62  ;;  %v6967_v60 = vld [vmem:[#allocation10 + $0x1a0] sm:$0xf0] }
  0xc5   :  { %v6970_v62 = vor.u32 %v9704_v59, %v6967_v60  ;;  %v9840_v41 = vld [vmem:[#allocation10 + $0x5c4] sm:$0xf] }
  0xc6   :  { %v9672_v50 = vld [vmem:[#allocation10 + $0x84] sm:$0xf] }
  0xc7   :  { %2338 = vmatpush.bf16.msra.mxu3 %v7190_v2  ;;  %2324 = vmatpush.bf16.msra.mxu2 %v6934_v5  ;;  %v7573_v2 = vld [vmem:[#allocation10 + $0x640] sm:$0xf]  ;;  %v9752_v5 = vld [vmem:[#allocation10 + $0x304] sm:$0xf] }
  0xc8   :  { %2366 = vmatpush.bf16.msrb.mxu1 %v7702_v8  ;;  %2352 = vmatpush.bf16.msrb.mxu0 %v7446_v10  ;;  %v7574_v4 = vor.u32 %v9860_v3, %v7573_v2  ;;  %v7162_v7 = vor.u32 %v9752_v5, %v7159_v6  ;;  %v7349_v8 = vld [vmem:[#allocation10 + $0x480] sm:$0xf]  ;;  %v6839_v51 = vld [vmem:[#allocation10 + $0xa0] sm:$0xf0] }
  0xc9   :  { %v7350_v10 = vor.u32 %v9804_v9, %v7349_v8  ;;  %v9832_v52 = vld [vmem:[#allocation10 + $0x584] sm:$0xf] }
  0xca   :  { %v7671_v60 = vld [vmem:[#allocation10 + $0x720] sm:$0xf0] }
  0xcb   :  { %2339 = vmatpush.bf16.msra.mxu3 %v7158_v14  ;;  %2325 = vmatpush.bf16.msra.mxu2 %v6902_v17  ;;  %v7541_v14 = vld [vmem:[#allocation10 + $0x600] sm:$0xf]  ;;  %v9744_v17 = vld [vmem:[#allocation10 + $0x2c4] sm:$0xf] }
  0xcc   :  { %2367 = vmatpush.bf16.msrb.mxu1 %v7670_v20  ;;  %2353 = vmatpush.bf16.msrb.mxu0 %v7414_v22  ;;  %v7542_v16 = vor.u32 %v9852_v15, %v7541_v14  ;;  %v7130_v20 = vor.u32 %v9744_v17, %v7127_v18  ;;  %v7317_v22 = vld [vmem:[#allocation10 + $0x440] sm:$0xf]  ;;  %v7447_v2 = vld [vmem:[#allocation10 + $0x560] sm:$0xf0] }
  0xcd   :  { %692 = vmatmul.bf16.vlgmr.msrb.gmra.mxu2 %v10736_v40  ;;  %720 = vmatmul.bf16.vlgmr.msra.gmra.mxu0 %v10736_v40  ;;  %v7029_v40 = vld [vmem:[#allocation10 + $0x200] sm:$0xf]  ;;  %v7318_v25 = vor.u32 %v9796_v23, %v7317_v22  ;;  %v7639_v5 = vld [vmem:[#allocation10 + $0x6e0] sm:$0xf0] }
  0xce   :  { %706 = vmatmul.bf16.vlgmr.msrb.gmra.mxu3 %v10738_v45  ;;  %734 = vmatmul.bf16.vlgmr.msra.gmra.mxu1 %v10738_v45  ;;  %v9660_v45 = vld [vmem:[#allocation10 + $0x1c] sm:$0xf0]  ;;  %v7030_v53 = vor.u32 %v9724_v46, %v7029_v40  ;;  %v9728_v40 = vld [vmem:[#allocation10 + $0x244] sm:$0xf] }
  0xcf   :  { %2340 = vmatpush.bf16.msra.mxu3 %v7126_v26  ;;  %2326 = vmatpush.bf16.msra.mxu2 %v6870_v28  ;;  %v6774_v54 = vor.u32 %v9660_v45, %v6773_v49  ;;  %v9688_v26 = vld [vmem:[#allocation10 + $0x104] sm:$0xf] }
  0xd0   :  { %2368 = vmatpush.bf16.msrb.mxu1 %v7638_v32  ;;  %2354 = vmatpush.bf16.msrb.mxu0 %v7382_v33  ;;  %v6906_v28 = vor.u32 %v9688_v26, %v6903_v27  ;;  %v7098_v32 = vor.u32 %v9736_v29, %v7095_v30  ;;  %v7735_v33 = vld [vmem:[#allocation10 + $0x7a0] sm:$0xf0]  ;;  %v301_v26 = vperm.slane %v10748_v21, 1 }
  0xd1   :  { %v7063_v46 = vld [vmem:[#allocation10 + $0x260] sm:$0xf0] }
  0xd2   :  { %v7066_v48 = vor.u32 %v9728_v40, %v7063_v46  ;;  %v7703_v49 = vld [vmem:[#allocation10 + $0x760] sm:$0xf0] }
  0xd3   :  { %2341 = vmatpush.bf16.msra.mxu3 %v7094_v36  ;;  %2327 = vmatpush.bf16.msra.mxu2 %v6838_v38  ;;  %v7738_v36 = vor.u32 %v9896_v31, %v7735_v33  ;;  %v9680_v38 = vld [vmem:[#allocation10 + $0xc4] sm:$0xf] }
  0xd4   :  { %2369 = vmatpush.bf16.msrb.mxu1 %v7606_v43  ;;  %2355 = vmatpush.bf16.msrb.mxu0 %v7350_v10  ;;  %v6874_v42 = vor.u32 %v9680_v38, %v6871_v39  ;;  %v7511_v43 = vld [vmem:[#allocation10 + $0x5e0] sm:$0xf0] }
  0xd5   :  { %v6775_v8 = vld [vmem:[#allocation10 + $0x20] sm:$0xf0] }
  0xd6   :  { %v9816_v9 = vld [vmem:[#allocation10 + $0x504] sm:$0xf] }
  0xd7   :  { %2342 = vmatpush.bf16.msra.mxu3 %v7062_v44  ;;  %2328 = vmatpush.bf16.msra.mxu2 %v6806_v47  ;;  %v7514_v44 = vor.u32 %v9840_v41, %v7511_v43  ;;  %v9888_v47 = vld [vmem:[#allocation10 + $0x744] sm:$0xf]  ;;  %v7418_v12 = vor.u32 %v9816_v9, %v7415_v11  ;;  %v9765_v9 = vld [vmem:[#allocation10 + $0x364] sm:$0xf0] }
  0xd8   :  { %2370 = vmatpush.bf16.msrb.mxu1 %v7574_v4  ;;  %2356 = vmatpush.bf16.msrb.mxu0 %v7318_v25  ;;  %v7706_v45 = vor.u32 %v9888_v47, %v7703_v49  ;;  %v9872_v4 = vld [vmem:[#allocation10 + $0x6c4] sm:$0xf] }
  0xd9   :  { %v7642_v6 = vor.u32 %v9872_v4, %v7639_v5  ;;  %v7607_v14 = vld [vmem:[#allocation10 + $0x6a0] sm:$0xf0]  ;;  %v9717_v4 = vld [vmem:[#allocation10 + $0x1e4] sm:$0xf0] }
  0xda   :  { %v7383_v17 = vld [vmem:[#allocation10 + $0x4e0] sm:$0xf0] }
  0xdb   :  { %2343 = vmatpush.bf16.msra.mxu3 %v7030_v53  ;;  %2329 = vmatpush.bf16.msra.mxu2 %v6774_v54  ;;  %v6842_v53 = vor.u32 %v9672_v50, %v6839_v51  ;;  %v7479_v54 = vld [vmem:[#allocation10 + $0x5a0] sm:$0xf0]  ;;  %v9781_v50 = vld [vmem:[#allocation10 + $0x3e4] sm:$0xf0] }
  0xdc   :  { %2371 = vmatpush.bf16.msrb.mxu1 %v7542_v16  ;;  %2357 = vmatpush.bf16.msrb.mxu0 %v7286_v37  ;;  %v9808_v16 = vld [vmem:[#allocation10 + $0x4c4] sm:$0xf] }
  0xdd   :  { %v7386_v18 = vor.u32 %v9808_v16, %v7383_v17  ;;  %v9800_v23 = vld [vmem:[#allocation10 + $0x484] sm:$0xf]  ;;  %v6973_v16 = vld [vmem:[#allocation10 + $0x188] sm:$0xf] }
  0xde   :  { %v9848_v27 = vld [vmem:[#allocation10 + $0x604] sm:$0xf]  ;;  %v9709_v17 = vld [vmem:[#allocation10 + $0x1a4] sm:$0xf0] }
  0xdf   :  { %2392 = vmatpush.bf16.msrb.mxu3 %v7258_v55  ;;  %2378 = vmatpush.bf16.msrb.mxu2 %v7002_v57  ;;  %v7482_v55 = vor.u32 %v9832_v52, %v7479_v54  ;;  %v7031_v57 = vld [vmem:[#allocation10 + $0x220] sm:$0xf0]  ;;  %v303_v54 = vperm.slane %v10748_v21, 3 }
  0xe0   :  { %2420 = vmatpush.bf16.msra.mxu1 %v7770_v24  ;;  %2406 = vmatpush.bf16.msra.mxu0 %v7514_v44  ;;  %v7034_v59 = vor.u32 %v9720_v56, %v7031_v57  ;;  %v7351_v24 = vld [vmem:[#allocation10 + $0x4a0] sm:$0xf0] }
  0xe1   :  { %v7354_v25 = vor.u32 %v9800_v23, %v7351_v24  ;;  %v7319_v33 = vld [vmem:[#allocation10 + $0x460] sm:$0xf0]  ;;  %v7165_v23 = vld [vmem:[#allocation10 + $0x308] sm:$0xf] }
  0xe2   :  { %v9784_v38 = vld [vmem:[#allocation10 + $0x404] sm:$0xf]  ;;  %v9757_v24 = vld [vmem:[#allocation10 + $0x324] sm:$0xf0] }
  0xe3   :  { %2393 = vmatpush.bf16.msrb.mxu3 %v7226_v61  ;;  %2379 = vmatpush.bf16.msrb.mxu2 %v6970_v62  ;;  %v7674_v61 = vor.u32 %v9880_v58, %v7671_v60  ;;  %v9664_v62 = vld [vmem:[#allocation10 + $0x44] sm:$0xf] }
  0xe4   :  { %2421 = vmatpush.bf16.msra.mxu1 %v7738_v36  ;;  %2407 = vmatpush.bf16.msra.mxu0 %v7482_v55  ;;  %v6810_v0 = vor.u32 %v9664_v62, %v6807_v63  ;;  %v300_v36 = vperm.slane %v10748_v21, 0  ;;  %v7287_v39 = vld [vmem:[#allocation10 + $0x420] sm:$0xf0]  ;;  %v7229_v62 = vld [vmem:[#allocation10 + $0x388] sm:$0xf] }
  0xe5   :  { %v7290_v43 = vor.u32 %v9784_v38, %v7287_v39  ;;  %v9773_v63 = vld [vmem:[#allocation10 + $0x3a4] sm:$0xf0] }
  0xe7   :  { %2394 = vmatpush.bf16.msrb.mxu3 %v7194_v1  ;;  %2380 = vmatpush.bf16.msrb.mxu2 %v6938_v13  ;;  %v9824_v1 = vld [vmem:[#allocation10 + $0x544] sm:$0xf] }
  0xe8   :  { %2422 = vmatpush.bf16.msra.mxu1 %v7706_v45  ;;  %v7450_v3 = vor.u32 %v9824_v1, %v7447_v2  ;;  %v9864_v13 = vld [vmem:[#allocation10 + $0x684] sm:$0xf]  ;;  %v7261_v45 = vld [vmem:[#allocation10 + $0x3c8] sm:$0xf] }
  0xe9   :  { %v7610_v15 = vor.u32 %v9864_v13, %v7607_v14 }
  0xea   :  { %2408 = vmatpush.bf16.msra.mxu0 %v7450_v3  ;;  %v7005_v3 = vld [vmem:[#allocation10 + $0x1c8] sm:$0xf] }
  0xeb   :  { %2395 = vmatpush.bf16.msrb.mxu3 %v7162_v7  ;;  %2381 = vmatpush.bf16.msrb.mxu2 %v6906_v28  ;;  %v9656_v7 = vld [vmem:[#allocation10 + $0x4] sm:$0xf]  ;;  %v7006_v13 = vor.u32 %v9717_v4, %v7005_v3  ;;  %v7709_v3 = vld [vmem:[#allocation10 + $0x748] sm:$0xf] }
  0xec   :  { %2423 = vmatpush.bf16.msra.mxu1 %v7674_v61  ;;  %v6778_v10 = vor.u32 %v9656_v7, %v6775_v8  ;;  %v7543_v28 = vld [vmem:[#allocation10 + $0x620] sm:$0xf0]  ;;  %v7230_v7 = vor.u32 %v9773_v63, %v7229_v62  ;;  %v7197_v8 = vld [vmem:[#allocation10 + $0x348] sm:$0xf] }
  0xed   :  { %v7546_v30 = vor.u32 %v9848_v27, %v7543_v28  ;;  %v6974_v27 = vor.u32 %v9709_v17, %v6973_v16  ;;  %v6941_v28 = vld [vmem:[#allocation10 + $0x148] sm:$0xf] }
  0xee   :  { %2409 = vmatpush.bf16.msra.mxu0 %v7418_v12  ;;  %v302_v12 = vperm.slane %v10748_v21, 2  ;;  %v9893_v4 = vld [vmem:[#allocation10 + $0x764] sm:$0xf0] }
  0xef   :  { %2396 = vmatpush.bf16.msrb.mxu3 %v7130_v20  ;;  %2382 = vmatpush.bf16.msrb.mxu2 %v6874_v42  ;;  %v7575_v20 = vld [vmem:[#allocation10 + $0x660] sm:$0xf0]  ;;  %v7710_v16 = vor.u32 %v9893_v4, %v7709_v3  ;;  %v7037_v17 = vld [vmem:[#allocation10 + $0x208] sm:$0xf] }
  0xf0   :  { %2424 = vmatpush.bf16.msra.mxu1 %v7642_v6  ;;  %v7578_v22 = vor.u32 %v9856_v19, %v7575_v20  ;;  %v7198_v20 = vor.u32 %v9765_v9, %v7197_v8  ;;  %v6845_v9 = vld [vmem:[#allocation10 + $0x88] sm:$0xf] }
  0xf1   :  { %v7357_v3 = vld [vmem:[#allocation10 + $0x488] sm:$0xf] }
  0xf2   :  { %2410 = vmatpush.bf16.msra.mxu0 %v7386_v18  ;;  %v9805_v4 = vld [vmem:[#allocation10 + $0x4a4] sm:$0xf0] }
  0xf3   :  { %2397 = vmatpush.bf16.msrb.mxu3 %v7098_v32  ;;  %2383 = vmatpush.bf16.msrb.mxu2 %v6842_v53  ;;  %v9792_v32 = vld [vmem:[#allocation10 + $0x444] sm:$0xf] }
  0xf4   :  { %2425 = vmatpush.bf16.msra.mxu1 %v7610_v15  ;;  %v7322_v34 = vor.u32 %v9792_v32, %v7319_v33  ;;  %v7166_v32 = vor.u32 %v9757_v24, %v7165_v23  ;;  %v7133_v33 = vld [vmem:[#allocation10 + $0x2c8] sm:$0xf]  ;;  %v9777_v24 = vld [vmem:[#allocation10 + $0x3cc] sm:$0xf] }
  0xf6   :  { %2411 = vmatpush.bf16.msra.mxu0 %v7354_v25 }
  0xf7   :  { %2398 = vmatpush.bf16.msrb.mxu3 %v7066_v48  ;;  %2384 = vmatpush.bf16.msrb.mxu2 %v6810_v0 }
  0xf8   :  { %2426 = vmatpush.bf16.msra.mxu1 %v7578_v22 }
  0xfa   :  { %2412 = vmatpush.bf16.msra.mxu0 %v7322_v34  ;;  %v9749_v34 = vld [vmem:[#allocation10 + $0x2e4] sm:$0xf0] }
  0xfb   :  { %2399 = vmatpush.bf16.msrb.mxu3 %v7034_v59  ;;  %2385 = vmatpush.bf16.msrb.mxu2 %v6778_v10  ;;  %v7262_v59 = vor.u32 %v9781_v50, %v7261_v45 }
  0xfc   :  { %2427 = vmatpush.bf16.msra.mxu1 %v7546_v30 }
  0xfe   :  { %2413 = vmatpush.bf16.msra.mxu0 %v7290_v43  ;;  %v6909_v43 = vld [vmem:[#allocation10 + $0x108] sm:$0xf] }
 0x13a   :  { %v665_v29 = vpop.f32.mrf.mxu0 }
 0x13b   :  { %v679_v31 = vpop.f32.mrf.mxu1  ;;  %v666_v35 = vadd.f32 %v665_v29, %v301_v26  ;;  %v9701_v29 = vld [vmem:[#allocation10 + $0x164] sm:$0xf0] }
 0x13c   :  { %v6942_v39 = vor.u32 %v9701_v29, %v6941_v28  ;;  %v9829_v28 = vld [vmem:[#allocation10 + $0x564] sm:$0xf0] }
 0x13d   :  { %v680_v41 = vadd.f32 %v679_v31, %v666_v35  ;;  %v7773_v35 = vld [vmem:[#allocation10 + $0x7c8] sm:$0xf] }
 0x13f   :  { %v749_v48 = vmul.f32 0.2, %v680_v41  ;;  %vm741_vm5 = vcmp.gt.f32.partialorder %v680_v41, 0.0 }
 0x140   :  { %v637_v37 = vpop.f32.mrf.mxu2 }
 0x141   :  { %v651_v42 = vpop.f32.mrf.mxu3  ;;  %v638_v40 = vadd.f32 %v637_v37, %v300_v36  ;;  %v757_v55 = vsel %vm741_vm5, %v680_v41, %v749_v48 }
 0x142   :  { %v667_v44 = vpop.f32.mrf.mxu0 }
 0x143   :  { %v668_v46 = vadd.f32 %v667_v44, %v301_v26  ;;  %v681_v47 = vpop.f32.mrf.mxu1  ;;  %v652_v51 = vadd.f32 %v651_v42, %v638_v40  ;;  %v7134_v42 = vor.u32 %v9749_v34, %v7133_v33  ;;  %v9693_v44 = vld [vmem:[#allocation10 + $0x124] sm:$0xf0] }
 0x144   :  { %v9877_v33 = vld [vmem:[#allocation10 + $0x6e4] sm:$0xf0] }
 0x145   :  { %v682_v49 = vadd.f32 %v681_v47, %v668_v46  ;;  %v748_v0 = vmul.f32 0.2, %v652_v51  ;;  %vm740_vm7 = vcmp.gt.f32.partialorder %v652_v51, 0.0 }
 0x147   :  { %vm745_vm6 = vcmp.gt.f32.partialorder %v682_v49, 0.0  ;;  %v753_v52 = vmul.f32 0.2, %v682_v49  ;;  %v756_v10 = vsel %vm740_vm7, %v652_v51, %v748_v0  ;;  %v9741_v51 = vld [vmem:[#allocation10 + $0x2a4] sm:$0xf0] }
 0x148   :  { %v639_v53 = vpop.f32.mrf.mxu2 }
 0x149   :  { %v761_v56 = vsel %vm745_vm6, %v682_v49, %v753_v52  ;;  %v640_v57 = vadd.f32 %v639_v53, %v300_v36  ;;  %v653_v58 = vpop.f32.mrf.mxu3  ;;  %v9909_v36 = vld [vmem:[#allocation10 + $0x7e4] sm:$0xf0] }
 0x14a   :  { %v10753_v60 = vpack.c.bf16 %v761_v56, %v757_v55  ;;  %v721_v61 = vpop.f32.mrf.mxu0  ;;  %v7774_v48 = vor.u32 %v9909_v36, %v7773_v35  ;;  %v7101_v49 = vld [vmem:[#allocation10 + $0x288] sm:$0xf]  ;;  %v6910_v56 = vor.u32 %v9693_v44, %v6909_v43  ;;  %v9769_v36 = vld [vmem:[#allocation10 + $0x38c] sm:$0xf] }
 0x14b   :  { %v654_v1 = vadd.f32 %v653_v58, %v640_v57  ;;  %v735_v2 = vpop.f32.mrf.mxu1  ;;  %v722_v6 = vadd.f32 %v721_v61, %v303_v54  ;;  %v7741_v52 = vld [vmem:[#allocation10 + $0x788] sm:$0xf]  ;;  %v7102_v63 = vor.u32 %v9741_v51, %v7101_v49  ;;  %v9713_v44 = vld [vmem:[#allocation10 + $0x1cc] sm:$0xf] }
 0x14c   :  { %2344 = vmatmul.bf16.vlgmr.msra.gmra.mxu3 %v10753_v60  ;;  %v9901_v53 = vld [vmem:[#allocation10 + $0x7a4] sm:$0xf0]  ;;  %v9761_v51 = vld [vmem:[#allocation10 + $0x34c] sm:$0xf] }
 0x14d   :  { %vm744_vm8 = vcmp.gt.f32.partialorder %v654_v1, 0.0  ;;  %v752_v5 = vmul.f32 0.2, %v654_v1  ;;  %2448 = vmatpush.bf16.msra.mxu3 %v7262_v59  ;;  %v736_v18 = vadd.f32 %v735_v2, %v722_v6  ;;  %v6877_v57 = vld [vmem:[#allocation10 + $0xc8] sm:$0xf]  ;;  %v7742_v0 = vor.u32 %v9901_v53, %v7741_v52 }
 0x14e   :  { %v9685_v58 = vld [vmem:[#allocation10 + $0xe4] sm:$0xf0]  ;;  %v7199_v52 = vld [vmem:[#allocation10 + $0x368] sm:$0xf0] }
 0x14f   :  { %v760_v11 = vsel %vm744_vm8, %v654_v1, %v752_v5  ;;  %v751_v30 = vmul.f32 0.2, %v736_v18  ;;  %vm743_vm9 = vcmp.gt.f32.partialorder %v736_v18, 0.0  ;;  %v7517_v59 = vld [vmem:[#allocation10 + $0x5c8] sm:$0xf] }
 0x150   :  { %v10757_v14 = vpack.c.bf16 %v760_v11, %v756_v10  ;;  %v693_v15 = vpop.f32.mrf.mxu2  ;;  %v9845_v61 = vld [vmem:[#allocation10 + $0x5e4] sm:$0xf0] }
 0x151   :  { %v707_v19 = vpop.f32.mrf.mxu3  ;;  %2449 = vmatpush.bf16.msra.mxu3 %v7230_v7  ;;  %v694_v25 = vadd.f32 %v693_v15, %v302_v12  ;;  %v759_v40 = vsel %vm743_vm9, %v736_v18, %v751_v30  ;;  %v7069_v1 = vld [vmem:[#allocation10 + $0x248] sm:$0xf]  ;;  %v6878_v7 = vor.u32 %v9685_v58, %v6877_v57  ;;  %v7518_v8 = vor.u32 %v9845_v61, %v7517_v59  ;;  %v9705_v57 = vld [vmem:[#allocation10 + $0x18c] sm:$0xf] }
 0x152   :  { %v723_v22 = vpop.f32.mrf.mxu0  ;;  %2330 = vmatmul.bf16.vlgmr.msra.gmra.mxu2 %v10757_v14  ;;  %v9733_v2 = vld [vmem:[#allocation10 + $0x264] sm:$0xf0]  ;;  %v6975_v58 = vld [vmem:[#allocation10 + $0x1a8] sm:$0xf0]  ;;  %v7202_v59 = vor.u32 %v9761_v51, %v7199_v52 }
 0x153   :  { %v724_v26 = vadd.f32 %v723_v22, %v303_v54  ;;  %2434 = vmatpush.bf16.msra.mxu2 %v7006_v13  ;;  %v737_v21 = vpop.f32.mrf.mxu1  ;;  %v708_v37 = vadd.f32 %v707_v19, %v694_v25  ;;  %v9677_v11 = vld [vmem:[#allocation10 + $0xa4] sm:$0xf0]  ;;  %v7070_v15 = vor.u32 %v9733_v2, %v7069_v1  ;;  %v7263_v25 = vld [vmem:[#allocation10 + $0x3e8] sm:$0xf0]  ;;  %v6978_v2 = vor.u32 %v9705_v57, %v6975_v58 }
 0x154   :  { %v9837_v13 = vld [vmem:[#allocation10 + $0x5a4] sm:$0xf0]  ;;  %v6846_v22 = vor.u32 %v9677_v11, %v6845_v9  ;;  %v7167_v1 = vld [vmem:[#allocation10 + $0x328] sm:$0xf0] }
 0x155   :  { %v738_v31 = vadd.f32 %v737_v21, %v724_v26  ;;  %2450 = vmatpush.bf16.msra.mxu3 %v7198_v20  ;;  %v750_v54 = vmul.f32 0.2, %v708_v37  ;;  %vm742_vm11 = vcmp.gt.f32.partialorder %v708_v37, 0.0  ;;  %v9725_v18 = vld [vmem:[#allocation10 + $0x224] sm:$0xf0] }
 0x156   :  { %v7677_v19 = vld [vmem:[#allocation10 + $0x708] sm:$0xf]  ;;  %v7038_v29 = vor.u32 %v9725_v18, %v7037_v17  ;;  %v7775_v17 = vld [vmem:[#allocation10 + $0x7e8] sm:$0xf0] }
 0x157   :  { %vm747_vm10 = vcmp.gt.f32.partialorder %v738_v31, 0.0  ;;  %v755_v38 = vmul.f32 0.2, %v738_v31  ;;  %2435 = vmatpush.bf16.msra.mxu2 %v6974_v27  ;;  %v758_v5 = vsel %vm742_vm11, %v708_v37, %v750_v54  ;;  %v9885_v20 = vld [vmem:[#allocation10 + $0x724] sm:$0xf0] }
 0x158   :  { %v695_v41 = vpop.f32.mrf.mxu2  ;;  %v6813_v26 = vld [vmem:[#allocation10 + $0x48] sm:$0xf]  ;;  %v7678_v30 = vor.u32 %v9885_v20, %v7677_v19  ;;  %v7231_v37 = vld [vmem:[#allocation10 + $0x3a8] sm:$0xf0] }
 0x159   :  { %v763_v46 = vsel %vm747_vm10, %v738_v31, %v755_v38  ;;  %v696_v47 = vadd.f32 %v695_v41, %v302_v12  ;;  %2451 = vmatpush.bf16.msra.mxu3 %v7166_v32  ;;  %v709_v50 = vpop.f32.mrf.mxu3  ;;  %v7485_v12 = vld [vmem:[#allocation10 + $0x588] sm:$0xf]  ;;  %v7266_v31 = vor.u32 %v9777_v24, %v7263_v25  ;;  %v6911_v24 = vld [vmem:[#allocation10 + $0x128] sm:$0xf0] }
 0x15a   :  { %v10760_v45 = vpack.c.bf16 %v763_v46, %v759_v40  ;;  %v7486_v23 = vor.u32 %v9837_v13, %v7485_v12  ;;  %v9669_v27 = vld [vmem:[#allocation10 + $0x64] sm:$0xf0]  ;;  %v7007_v40 = vld [vmem:[#allocation10 + $0x1e8] sm:$0xf0]  ;;  %v7234_v46 = vor.u32 %v9769_v36, %v7231_v37  ;;  %v7358_v13 = vor.u32 %v9805_v4, %v7357_v3 }
 0x15b   :  { %v710_v55 = vadd.f32 %v709_v50, %v696_v47  ;;  %2436 = vmatpush.bf16.msra.mxu2 %v6942_v39  ;;  %v7453_v21 = vld [vmem:[#allocation10 + $0x548] sm:$0xf]  ;;  %v6814_v34 = vor.u32 %v9669_v27, %v6813_v26  ;;  %v7010_v53 = vor.u32 %v9713_v44, %v7007_v40  ;;  %v9745_v12 = vld [vmem:[#allocation10 + $0x2cc] sm:$0xf] }
 0x15c   :  { %2372 = vmatmul.bf16.vlgmr.msrb.gmra.mxu1 %v10760_v45  ;;  %2400 = vmatmul.bf16.vlgmr.msrb.gmra.mxu3 %v10753_v60  ;;  %v7645_v32 = vld [vmem:[#allocation10 + $0x6c8] sm:$0xf]  ;;  %v7454_v35 = vor.u32 %v9829_v28, %v7453_v21  ;;  %v9737_v27 = vld [vmem:[#allocation10 + $0x28c] sm:$0xf] }
 0x15d   :  { %vm746_vm12 = vcmp.gt.f32.partialorder %v710_v55, 0.0  ;;  %v754_v62 = vmul.f32 0.2, %v710_v55  ;;  %2452 = vmatpush.bf16.msra.mxu3 %v7134_v42  ;;  %2476 = vmatpush.bf16.msrb.mxu1 %v7774_v48  ;;  %v6781_v38 = vld [vmem:[#allocation10 + $0x8] sm:$0xf]  ;;  %v7646_v43 = vor.u32 %v9877_v33, %v7645_v32 }
 0x15e   :  { %v9661_v39 = vld [vmem:[#allocation10 + $0x24] sm:$0xf0]  ;;  %v7103_v28 = vld [vmem:[#allocation10 + $0x2a8] sm:$0xf0] }
 0x15f   :  { %v762_v6 = vsel %vm746_vm12, %v710_v55, %v754_v62  ;;  %2437 = vmatpush.bf16.msra.mxu2 %v6910_v56  ;;  %v7421_v41 = vld [vmem:[#allocation10 + $0x508] sm:$0xf]  ;;  %v6782_v49 = vor.u32 %v9661_v39, %v6781_v38  ;;  %v9841_v36 = vld [vmem:[#allocation10 + $0x5cc] sm:$0xf]  ;;  %v7106_v38 = vor.u32 %v9737_v27, %v7103_v28  ;;  %v7205_v27 = vld [vmem:[#allocation10 + $0x350] sm:$0xf] }
 0x160   :  { %v10764_v10 = vpack.c.bf16 %v762_v6, %v758_v5  ;;  %v9821_v42 = vld [vmem:[#allocation10 + $0x524] sm:$0xf0]  ;;  %v9697_v6 = vld [vmem:[#allocation10 + $0x14c] sm:$0xf] }
 0x161   :  { %2453 = vmatpush.bf16.msra.mxu3 %v7102_v63  ;;  %2477 = vmatpush.bf16.msrb.mxu1 %v7742_v0  ;;  %v7613_v47 = vld [vmem:[#allocation10 + $0x688] sm:$0xf]  ;;  %v7422_v50 = vor.u32 %v9821_v42, %v7421_v41  ;;  %v9753_v0 = vld [vmem:[#allocation10 + $0x30c] sm:$0xf] }
 0x162   :  { %2358 = vmatmul.bf16.vlgmr.msrb.gmra.mxu0 %v10764_v10  ;;  %2386 = vmatmul.bf16.vlgmr.msrb.gmra.mxu2 %v10757_v14  ;;  %v9869_v48 = vld [vmem:[#allocation10 + $0x6a4] sm:$0xf0]  ;;  %v7519_v37 = vld [vmem:[#allocation10 + $0x5e8] sm:$0xf0] }
 0x163   :  { %2438 = vmatpush.bf16.msra.mxu2 %v6878_v7  ;;  %2462 = vmatpush.bf16.msrb.mxu0 %v7518_v8  ;;  %v7389_v54 = vld [vmem:[#allocation10 + $0x4c8] sm:$0xf]  ;;  %v7614_v56 = vor.u32 %v9869_v48, %v7613_v47  ;;  %v6943_v7 = vld [vmem:[#allocation10 + $0x168] sm:$0xf0]  ;;  %v7170_v8 = vor.u32 %v9753_v0, %v7167_v1  ;;  %v7522_v47 = vor.u32 %v9841_v36, %v7519_v37 }
 0x164   :  { %v9813_v55 = vld [vmem:[#allocation10 + $0x4e4] sm:$0xf0]  ;;  %v6946_v18 = vor.u32 %v9697_v6, %v6943_v7  ;;  %v9729_v41 = vld [vmem:[#allocation10 + $0x24c] sm:$0xf] }
 0x165   :  { %2454 = vmatpush.bf16.msra.mxu3 %v7070_v15  ;;  %2478 = vmatpush.bf16.msrb.mxu1 %v7710_v16  ;;  %v7581_v61 = vld [vmem:[#allocation10 + $0x648] sm:$0xf]  ;;  %v7390_v63 = vor.u32 %v9813_v55, %v7389_v54  ;;  %v7135_v15 = vld [vmem:[#allocation10 + $0x2e8] sm:$0xf0] }
 0x166   :  { %v9861_v62 = vld [vmem:[#allocation10 + $0x664] sm:$0xf0]  ;;  %v9905_v16 = vld [vmem:[#allocation10 + $0x7cc] sm:$0xf]  ;;  %v7138_v25 = vor.u32 %v9745_v12, %v7135_v15  ;;  %v9774_v12 = vld [vmem:[#allocation10 + $0x3ac] sm:$0xf0] }
 0x167   :  { %2439 = vmatpush.bf16.msra.mxu2 %v6846_v22  ;;  %2463 = vmatpush.bf16.msrb.mxu0 %v7486_v23  ;;  %v7582_v5 = vor.u32 %v9861_v62, %v7581_v61  ;;  %v7549_v9 = vld [vmem:[#allocation10 + $0x608] sm:$0xf]  ;;  %v9689_v23 = vld [vmem:[#allocation10 + $0x10c] sm:$0xf]  ;;  %v7778_v26 = vor.u32 %v9905_v16, %v7775_v17  ;;  %v7269_v61 = vld [vmem:[#allocation10 + $0x3d0] sm:$0xf] }
 0x168   :  { %v9853_v11 = vld [vmem:[#allocation10 + $0x624] sm:$0xf0]  ;;  %v9889_v44 = vld [vmem:[#allocation10 + $0x74c] sm:$0xf]  ;;  %v9782_v62 = vld [vmem:[#allocation10 + $0x3ec] sm:$0xf0] }
 0x169   :  { %2455 = vmatpush.bf16.msra.mxu3 %v7038_v29  ;;  %2479 = vmatpush.bf16.msrb.mxu1 %v7678_v30  ;;  %v7325_v19 = vld [vmem:[#allocation10 + $0x448] sm:$0xf]  ;;  %v7550_v22 = vor.u32 %v9853_v11, %v7549_v9  ;;  %v9897_v29 = vld [vmem:[#allocation10 + $0x78c] sm:$0xf]  ;;  %v7237_v11 = vld [vmem:[#allocation10 + $0x390] sm:$0xf] }
 0x16a   :  { %v9797_v20 = vld [vmem:[#allocation10 + $0x464] sm:$0xf0]  ;;  %v7743_v30 = vld [vmem:[#allocation10 + $0x7a8] sm:$0xf0] }
 0x16b   :  { %2440 = vmatpush.bf16.msra.mxu2 %v6814_v34  ;;  %2464 = vmatpush.bf16.msrb.mxu0 %v7454_v35  ;;  %v7326_v21 = vor.u32 %v9797_v20, %v7325_v19  ;;  %v7293_v32 = vld [vmem:[#allocation10 + $0x408] sm:$0xf]  ;;  %v9681_v34 = vld [vmem:[#allocation10 + $0xcc] sm:$0xf]  ;;  %v7746_v39 = vor.u32 %v9897_v29, %v7743_v30  ;;  %v7013_v19 = vld [vmem:[#allocation10 + $0x1d0] sm:$0xf] }
 0x16c   :  { %2428 = vmatmul.bf16.vlgmr.msra.gmra.mxu1 %v10760_v45  ;;  %2456 = vmatmul.bf16.vlgmr.msra.gmra.mxu3 %v10753_v60  ;;  %v9789_v33 = vld [vmem:[#allocation10 + $0x424] sm:$0xf0]  ;;  %v6879_v35 = vld [vmem:[#allocation10 + $0xe8] sm:$0xf0]  ;;  %v9718_v20 = vld [vmem:[#allocation10 + $0x1ec] sm:$0xf0] }
 0x16d   :  { %2504 = vmatpush.bf16.msrb.mxu3 %v7266_v31  ;;  %2480 = vmatpush.bf16.msrb.mxu1 %v7646_v43  ;;  %v6914_v31 = vor.u32 %v9689_v23, %v6911_v24  ;;  %v7294_v42 = vor.u32 %v9789_v33, %v7293_v32  ;;  %v7071_v43 = vld [vmem:[#allocation10 + $0x268] sm:$0xf0]  ;;  %v7014_v28 = vor.u32 %v9718_v20, %v7013_v19  ;;  %v6981_v32 = vld [vmem:[#allocation10 + $0x190] sm:$0xf] }
 0x16e   :  { %v7711_v40 = vld [vmem:[#allocation10 + $0x768] sm:$0xf0]  ;;  %v7074_v52 = vor.u32 %v9729_v41, %v7071_v43  ;;  %v9710_v33 = vld [vmem:[#allocation10 + $0x1ac] sm:$0xf0] }
 0x16f   :  { %2441 = vmatpush.bf16.msra.mxu2 %v6782_v49  ;;  %2465 = vmatpush.bf16.msrb.mxu0 %v7422_v50  ;;  %v9673_v48 = vld [vmem:[#allocation10 + $0x8c] sm:$0xf]  ;;  %v6982_v41 = vor.u32 %v9710_v33, %v6981_v32  ;;  %v9886_v32 = vld [vmem:[#allocation10 + $0x72c] sm:$0xf0] }
 0x170   :  { %v6847_v49 = vld [vmem:[#allocation10 + $0xa8] sm:$0xf0] }
 0x171   :  { %2505 = vmatpush.bf16.msrb.mxu3 %v7234_v46  ;;  %2481 = vmatpush.bf16.msrb.mxu1 %v7614_v56  ;;  %v6882_v46 = vor.u32 %v9681_v34, %v6879_v35  ;;  %v9833_v50 = vld [vmem:[#allocation10 + $0x58c] sm:$0xf]  ;;  %v6850_v58 = vor.u32 %v9673_v48, %v6847_v49 }
 0x172   :  { %2414 = vmatmul.bf16.vlgmr.msra.gmra.mxu0 %v10764_v10  ;;  %2442 = vmatmul.bf16.vlgmr.msra.gmra.mxu2 %v10757_v14  ;;  %v7487_v51 = vld [vmem:[#allocation10 + $0x5a8] sm:$0xf0] }
 0x173   :  { %2490 = vmatpush.bf16.msrb.mxu2 %v7010_v53  ;;  %2466 = vmatpush.bf16.msrb.mxu0 %v7390_v63  ;;  %v7714_v53 = vor.u32 %v9889_v44, %v7711_v40  ;;  %v9721_v54 = vld [vmem:[#allocation10 + $0x20c] sm:$0xf]  ;;  %v6949_v40 = vld [vmem:[#allocation10 + $0x150] sm:$0xf] }
 0x174   :  { %v7039_v55 = vld [vmem:[#allocation10 + $0x228] sm:$0xf0] }
 0x175   :  { %2506 = vmatpush.bf16.msrb.mxu3 %v7202_v59  ;;  %2482 = vmatpush.bf16.msrb.mxu1 %v7582_v5  ;;  %v9881_v56 = vld [vmem:[#allocation10 + $0x70c] sm:$0xf]  ;;  %v7490_v59 = vor.u32 %v9833_v50, %v7487_v51  ;;  %v7042_v3 = vor.u32 %v9721_v54, %v7039_v55  ;;  %v7270_v5 = vor.u32 %v9782_v62, %v7269_v61  ;;  %v7141_v50 = vld [vmem:[#allocation10 + $0x2d0] sm:$0xf] }
 0x176   :  { %v7679_v57 = vld [vmem:[#allocation10 + $0x728] sm:$0xf0]  ;;  %v9910_v54 = vld [vmem:[#allocation10 + $0x7ec] sm:$0xf0] }
 0x177   :  { %2491 = vmatpush.bf16.msrb.mxu2 %v6978_v2  ;;  %2467 = vmatpush.bf16.msrb.mxu0 %v7358_v13  ;;  %v9665_v63 = vld [vmem:[#allocation10 + $0x4c] sm:$0xf]  ;;  %v7682_v4 = vor.u32 %v9881_v56, %v7679_v57  ;;  %v9694_v61 = vld [vmem:[#allocation10 + $0x12c] sm:$0xf0] }
 0x178   :  { %v6815_v0 = vld [vmem:[#allocation10 + $0x68] sm:$0xf0] }
 0x179   :  { %2507 = vmatpush.bf16.msrb.mxu3 %v7170_v8  ;;  %2483 = vmatpush.bf16.msrb.mxu1 %v7550_v22  ;;  %v9825_v1 = vld [vmem:[#allocation10 + $0x54c] sm:$0xf]  ;;  %v6818_v8 = vor.u32 %v9665_v63, %v6815_v0  ;;  %v7238_v22 = vor.u32 %v9774_v12, %v7237_v11  ;;  %v7109_v0 = vld [vmem:[#allocation10 + $0x290] sm:$0xf] }
 0x17a   :  { %v7455_v2 = vld [vmem:[#allocation10 + $0x568] sm:$0xf0]  ;;  %v7525_v11 = vld [vmem:[#allocation10 + $0x5d0] sm:$0xf] }
 0x17b   :  { %2492 = vmatpush.bf16.msrb.mxu2 %v6946_v18  ;;  %2468 = vmatpush.bf16.msrb.mxu0 %v7326_v21  ;;  %v9873_v6 = vld [vmem:[#allocation10 + $0x6cc] sm:$0xf]  ;;  %v7458_v9 = vor.u32 %v9825_v1, %v7455_v2  ;;  %v9766_v21 = vld [vmem:[#allocation10 + $0x36c] sm:$0xf0] }
 0x17c   :  { %2484 = vmatmul.bf16.vlgmr.msrb.gmra.mxu1 %v10760_v45  ;;  %v7647_v7 = vld [vmem:[#allocation10 + $0x6e8] sm:$0xf0]  ;;  %v7206_v34 = vor.u32 %v9766_v21, %v7205_v27  ;;  %v9742_v2 = vld [vmem:[#allocation10 + $0x2ac] sm:$0xf0] }
 0x17d   :  { %2508 = vmatpush.bf16.msrb.mxu3 %v7138_v25  ;;  %2532 = vmatpush.bf16.msra.mxu1 %v7778_v26  ;;  %v9657_v13 = vld [vmem:[#allocation10 + $0xc] sm:$0xf]  ;;  %v7650_v18 = vor.u32 %v9873_v6, %v7647_v7  ;;  %v9846_v12 = vld [vmem:[#allocation10 + $0x5ec] sm:$0xf0] }
 0x17e   :  { %v6783_v15 = vld [vmem:[#allocation10 + $0x28] sm:$0xf0]  ;;  %v7526_v20 = vor.u32 %v9846_v12, %v7525_v11  ;;  %v9838_v27 = vld [vmem:[#allocation10 + $0x5ac] sm:$0xf0] }
 0x17f   :  { %2493 = vmatpush.bf16.msrb.mxu2 %v6914_v31  ;;  %2469 = vmatpush.bf16.msrb.mxu0 %v7294_v42  ;;  %v9817_v16 = vld [vmem:[#allocation10 + $0x50c] sm:$0xf]  ;;  %v6786_v25 = vor.u32 %v9657_v13, %v6783_v15  ;;  %v7110_v13 = vor.u32 %v9742_v2, %v7109_v0  ;;  %v9762_v0 = vld [vmem:[#allocation10 + $0x354] sm:$0xf]  ;;  %v7589_v11 = vld [vmem:[#allocation10 + $0x650] sm:$0xf] }
 0x180   :  { %v7423_v17 = vld [vmem:[#allocation10 + $0x528] sm:$0xf0]  ;;  %v7207_v2 = vld [vmem:[#allocation10 + $0x370] sm:$0xf0]  ;;  %v9862_v12 = vld [vmem:[#allocation10 + $0x66c] sm:$0xf0] }
 0x181   :  { %2509 = vmatpush.bf16.msrb.mxu3 %v7106_v38  ;;  %2533 = vmatpush.bf16.msra.mxu1 %v7746_v39  ;;  %v9865_v23 = vld [vmem:[#allocation10 + $0x68c] sm:$0xf]  ;;  %v7426_v26 = vor.u32 %v9817_v16, %v7423_v17  ;;  %v7173_v38 = vld [vmem:[#allocation10 + $0x310] sm:$0xf] }
 0x182   :  { %2470 = vmatmul.bf16.vlgmr.msrb.gmra.mxu0 %v10764_v10  ;;  %v7615_v24 = vld [vmem:[#allocation10 + $0x6a8] sm:$0xf0]  ;;  %v9758_v39 = vld [vmem:[#allocation10 + $0x32c] sm:$0xf0] }
 0x183   :  { %2494 = vmatpush.bf16.msrb.mxu2 %v6882_v46  ;;  %2518 = vmatpush.bf16.msra.mxu0 %v7522_v47  ;;  %v9809_v29 = vld [vmem:[#allocation10 + $0x4cc] sm:$0xf]  ;;  %v7618_v31 = vor.u32 %v9865_v23, %v7615_v24  ;;  %v9702_v46 = vld [vmem:[#allocation10 + $0x16c] sm:$0xf0]  ;;  %v7174_v47 = vor.u32 %v9758_v39, %v7173_v38 }
 0x184   :  { %v7391_v30 = vld [vmem:[#allocation10 + $0x4e8] sm:$0xf0]  ;;  %v6950_v55 = vor.u32 %v9702_v46, %v6949_v40  ;;  %v7077_v17 = vld [vmem:[#allocation10 + $0x250] sm:$0xf] }
 0x185   :  { %2510 = vmatpush.bf16.msrb.mxu3 %v7074_v52  ;;  %2534 = vmatpush.bf16.msra.mxu1 %v7714_v53  ;;  %v9857_v35 = vld [vmem:[#allocation10 + $0x64c] sm:$0xf]  ;;  %v7394_v37 = vor.u32 %v9809_v29, %v7391_v30  ;;  %v9750_v52 = vld [vmem:[#allocation10 + $0x2ec] sm:$0xf0] }
 0x186   :  { %v7583_v36 = vld [vmem:[#allocation10 + $0x668] sm:$0xf0]  ;;  %v7781_v53 = vld [vmem:[#allocation10 + $0x7d0] sm:$0xf]  ;;  %v7142_v62 = vor.u32 %v9750_v52, %v7141_v50  ;;  %v7239_v50 = vld [vmem:[#allocation10 + $0x3b0] sm:$0xf0] }
 0x187   :  { %2495 = vmatpush.bf16.msrb.mxu2 %v6850_v58  ;;  %2519 = vmatpush.bf16.msra.mxu0 %v7490_v59  ;;  %v9801_v42 = vld [vmem:[#allocation10 + $0x48c] sm:$0xf]  ;;  %v7586_v44 = vor.u32 %v9857_v35, %v7583_v36  ;;  %v6917_v59 = vld [vmem:[#allocation10 + $0x110] sm:$0xf]  ;;  %v7782_v63 = vor.u32 %v9910_v54, %v7781_v53  ;;  %v9778_v35 = vld [vmem:[#allocation10 + $0x3d4] sm:$0xf] }
 0x188   :  { %v7359_v43 = vld [vmem:[#allocation10 + $0x4a8] sm:$0xf0]  ;;  %v9894_v23 = vld [vmem:[#allocation10 + $0x76c] sm:$0xf0]  ;;  %v7271_v36 = vld [vmem:[#allocation10 + $0x3f0] sm:$0xf0] }
 0x189   :  { %2511 = vmatpush.bf16.msrb.mxu3 %v7042_v3  ;;  %2535 = vmatpush.bf16.msra.mxu1 %v7682_v4  ;;  %v9849_v48 = vld [vmem:[#allocation10 + $0x60c] sm:$0xf]  ;;  %v7362_v51 = vor.u32 %v9801_v42, %v7359_v43  ;;  %v7749_v3 = vld [vmem:[#allocation10 + $0x790] sm:$0xf] }
 0x18a   :  { %v7551_v49 = vld [vmem:[#allocation10 + $0x628] sm:$0xf0]  ;;  %v9902_v4 = vld [vmem:[#allocation10 + $0x7ac] sm:$0xf0] }
 0x18b   :  { %2496 = vmatpush.bf16.msrb.mxu2 %v6818_v8  ;;  %2520 = vmatpush.bf16.msra.mxu0 %v7458_v9  ;;  %v9793_v56 = vld [vmem:[#allocation10 + $0x44c] sm:$0xf]  ;;  %v7554_v58 = vor.u32 %v9849_v48, %v7551_v49  ;;  %v6885_v8 = vld [vmem:[#allocation10 + $0xd0] sm:$0xf]  ;;  %v7750_v15 = vor.u32 %v9902_v4, %v7749_v3  ;;  %v9770_v49 = vld [vmem:[#allocation10 + $0x394] sm:$0xf] }
 0x18c   :  { %2512 = vmatmul.bf16.vlgmr.msrb.gmra.mxu3 %v10753_v60  ;;  %v7327_v57 = vld [vmem:[#allocation10 + $0x468] sm:$0xf0]  ;;  %v9686_v9 = vld [vmem:[#allocation10 + $0xec] sm:$0xf0] }
 0x18d   :  { %2560 = vmatpush.bf16.msra.mxu3 %v7270_v5  ;;  %2536 = vmatpush.bf16.msra.mxu1 %v7650_v18  ;;  %v7330_v1 = vor.u32 %v9793_v56, %v7327_v57  ;;  %v6918_v5 = vor.u32 %v9694_v61, %v6917_v59  ;;  %v9785_v6 = vld [vmem:[#allocation10 + $0x40c] sm:$0xf]  ;;  %v9734_v18 = vld [vmem:[#allocation10 + $0x26c] sm:$0xf0]  ;;  %v6886_v19 = vor.u32 %v9686_v9, %v6885_v8  ;;  %v7015_v56 = vld [vmem:[#allocation10 + $0x1f0] sm:$0xf0] }
 0x18e   :  { %v7295_v7 = vld [vmem:[#allocation10 + $0x428] sm:$0xf0]  ;;  %v6853_v24 = vld [vmem:[#allocation10 + $0x90] sm:$0xf]  ;;  %v7078_v21 = vor.u32 %v9734_v18, %v7077_v17  ;;  %v7210_v8 = vor.u32 %v9762_v0, %v7207_v2  ;;  %v7495_v0 = vld [vmem:[#allocation10 + $0x5b0] sm:$0xf0] }
 0x18f   :  { %2497 = vmatpush.bf16.msrb.mxu2 %v6786_v25  ;;  %2521 = vmatpush.bf16.msra.mxu0 %v7426_v26  ;;  %v7298_v16 = vor.u32 %v9785_v6, %v7295_v7  ;;  %v9678_v25 = vld [vmem:[#allocation10 + $0xac] sm:$0xf0]  ;;  %v6983_v6 = vld [vmem:[#allocation10 + $0x1b0] sm:$0xf0] }
 0x190   :  { %v7493_v26 = vld [vmem:[#allocation10 + $0x590] sm:$0xf]  ;;  %v6854_v33 = vor.u32 %v9678_v25, %v6853_v24  ;;  %v9722_v2 = vld [vmem:[#allocation10 + $0x214] sm:$0xf] }
 0x191   :  { %2561 = vmatpush.bf16.msra.mxu3 %v7238_v22  ;;  %2537 = vmatpush.bf16.msra.mxu1 %v7618_v31  ;;  %v7717_v22 = vld [vmem:[#allocation10 + $0x750] sm:$0xf] }
 0x192   :  { %2498 = vmatmul.bf16.vlgmr.msrb.gmra.mxu2 %v10757_v14  ;;  %v7718_v29 = vor.u32 %v9894_v23, %v7717_v22  ;;  %v9726_v30 = vld [vmem:[#allocation10 + $0x22c] sm:$0xf0]  ;;  %v7590_v22 = vor.u32 %v9862_v12, %v7589_v11  ;;  %v9783_v11 = vld [vmem:[#allocation10 + $0x3f4] sm:$0xf0]  ;;  %v9666_v12 = vld [vmem:[#allocation10 + $0x54] sm:$0xf] }
 0x193   :  { %2546 = vmatpush.bf16.msra.mxu2 %v7014_v28  ;;  %2522 = vmatpush.bf16.msra.mxu0 %v7394_v37  ;;  %v7045_v28 = vld [vmem:[#allocation10 + $0x210] sm:$0xf] }
 0x194   :  { %v7685_v31 = vld [vmem:[#allocation10 + $0x710] sm:$0xf]  ;;  %v7046_v42 = vor.u32 %v9726_v30, %v7045_v28  ;;  %v7783_v30 = vld [vmem:[#allocation10 + $0x7f0] sm:$0xf0] }
 0x195   :  { %2562 = vmatpush.bf16.msra.mxu3 %v7206_v34  ;;  %2538 = vmatpush.bf16.msra.mxu1 %v7586_v44  ;;  %v7494_v34 = vor.u32 %v9838_v27, %v7493_v26  ;;  %v6821_v37 = vld [vmem:[#allocation10 + $0x50] sm:$0xf]  ;;  %v7686_v43 = vor.u32 %v9886_v32, %v7685_v31  ;;  %v7274_v44 = vor.u32 %v9778_v35, %v7271_v36  ;;  %v9746_v27 = vld [vmem:[#allocation10 + $0x2d4] sm:$0xf] }
 0x196   :  { %v9670_v38 = vld [vmem:[#allocation10 + $0x6c] sm:$0xf0] }
 0x197   :  { %2547 = vmatpush.bf16.msra.mxu2 %v6982_v41  ;;  %2523 = vmatpush.bf16.msra.mxu0 %v7362_v51  ;;  %v7461_v39 = vld [vmem:[#allocation10 + $0x550] sm:$0xf] }
 0x198   :  { %v9830_v41 = vld [vmem:[#allocation10 + $0x56c] sm:$0xf0] }
 0x199   :  { %2563 = vmatpush.bf16.msra.mxu3 %v7174_v47  ;;  %2539 = vmatpush.bf16.msra.mxu1 %v7554_v58  ;;  %v7653_v40 = vld [vmem:[#allocation10 + $0x6d0] sm:$0xf]  ;;  %v6822_v47 = vor.u32 %v9670_v38, %v6821_v37  ;;  %v7462_v48 = vor.u32 %v9830_v41, %v7461_v39  ;;  %v7242_v58 = vor.u32 %v9770_v49, %v7239_v50  ;;  %v9738_v38 = vld [vmem:[#allocation10 + $0x294] sm:$0xf] }
 0x19a   :  { %v9878_v46 = vld [vmem:[#allocation10 + $0x6ec] sm:$0xf0]  ;;  %v7111_v39 = vld [vmem:[#allocation10 + $0x2b0] sm:$0xf0] }
 0x19b   :  { %2548 = vmatpush.bf16.msra.mxu2 %v6950_v55  ;;  %2524 = vmatpush.bf16.msra.mxu0 %v7330_v1  ;;  %v6789_v51 = vld [vmem:[#allocation10 + $0x10] sm:$0xf]  ;;  %v9714_v55 = vld [vmem:[#allocation10 + $0x1d4] sm:$0xf]  ;;  %v7654_v57 = vor.u32 %v9878_v46, %v7653_v40 }
 0x19c   :  { %2540 = vmatmul.bf16.vlgmr.msra.gmra.mxu1 %v10760_v45  ;;  %v9662_v52 = vld [vmem:[#allocation10 + $0x2c] sm:$0xf0]  ;;  %v7018_v1 = vor.u32 %v9714_v55, %v7015_v56  ;;  %v9842_v49 = vld [vmem:[#allocation10 + $0x5d4] sm:$0xf] }
 0x19d   :  { %2564 = vmatpush.bf16.msra.mxu3 %v7142_v62  ;;  %2588 = vmatpush.bf16.msrb.mxu1 %v7782_v63  ;;  %v7429_v53 = vld [vmem:[#allocation10 + $0x510] sm:$0xf]  ;;  %v6790_v59 = vor.u32 %v9662_v52, %v6789_v51  ;;  %v7527_v50 = vld [vmem:[#allocation10 + $0x5f0] sm:$0xf0]  ;;  %v7114_v51 = vor.u32 %v9738_v38, %v7111_v39  ;;  %v7213_v38 = vld [vmem:[#allocation10 + $0x358] sm:$0xf] }
 0x19e   :  { %v9822_v54 = vld [vmem:[#allocation10 + $0x52c] sm:$0xf0]  ;;  %v9730_v55 = vld [vmem:[#allocation10 + $0x254] sm:$0xf] }
 0x19f   :  { %2549 = vmatpush.bf16.msra.mxu2 %v6918_v5  ;;  %2525 = vmatpush.bf16.msra.mxu0 %v7298_v16  ;;  %v7430_v61 = vor.u32 %v9822_v54, %v7429_v53  ;;  %v7621_v62 = vld [vmem:[#allocation10 + $0x690] sm:$0xf]  ;;  %v9706_v5 = vld [vmem:[#allocation10 + $0x194] sm:$0xf] }
 0x1a0   :  { %v9870_v63 = vld [vmem:[#allocation10 + $0x6ac] sm:$0xf0]  ;;  %v7175_v16 = vld [vmem:[#allocation10 + $0x330] sm:$0xf0] }
 0x1a1   :  { %2565 = vmatpush.bf16.msra.mxu3 %v7110_v13  ;;  %2589 = vmatpush.bf16.msrb.mxu1 %v7750_v15  ;;  %v7397_v3 = vld [vmem:[#allocation10 + $0x4d0] sm:$0xf]  ;;  %v7622_v7 = vor.u32 %v9870_v63, %v7621_v62  ;;  %v9754_v13 = vld [vmem:[#allocation10 + $0x314] sm:$0xf]  ;;  %v6986_v15 = vor.u32 %v9706_v5, %v6983_v6 }
 0x1a2   :  { %2526 = vmatmul.bf16.vlgmr.msra.gmra.mxu0 %v10764_v10  ;;  %v9814_v4 = vld [vmem:[#allocation10 + $0x4ec] sm:$0xf0]  ;;  %v7178_v24 = vor.u32 %v9754_v13, %v7175_v16  ;;  %v7079_v56 = vld [vmem:[#allocation10 + $0x270] sm:$0xf0] }
 0x1a3   :  { %2550 = vmatpush.bf16.msra.mxu2 %v6886_v19  ;;  %2574 = vmatpush.bf16.msrb.mxu0 %v7526_v20  ;;  %v7398_v9 = vor.u32 %v9814_v4, %v7397_v3  ;;  %v7365_v17 = vld [vmem:[#allocation10 + $0x490] sm:$0xf]  ;;  %v9698_v19 = vld [vmem:[#allocation10 + $0x154] sm:$0xf] }
 0x1a4   :  { %v9806_v18 = vld [vmem:[#allocation10 + $0x4ac] sm:$0xf0]  ;;  %v6951_v20 = vld [vmem:[#allocation10 + $0x170] sm:$0xf0] }
 0x1a5   :  { %2566 = vmatpush.bf16.msra.mxu3 %v7078_v21  ;;  %2590 = vmatpush.bf16.msrb.mxu1 %v7718_v29  ;;  %v7557_v23 = vld [vmem:[#allocation10 + $0x610] sm:$0xf]  ;;  %v7366_v25 = vor.u32 %v9806_v18, %v7365_v17  ;;  %v7143_v21 = vld [vmem:[#allocation10 + $0x2f0] sm:$0xf0]  ;;  %v6954_v28 = vor.u32 %v9698_v19, %v6951_v20 }
 0x1a6   :  { %v9854_v26 = vld [vmem:[#allocation10 + $0x62c] sm:$0xf0]  ;;  %v9906_v29 = vld [vmem:[#allocation10 + $0x7d4] sm:$0xf]  ;;  %v7146_v36 = vor.u32 %v9746_v27, %v7143_v21 }
 0x1a7   :  { %2551 = vmatpush.bf16.msra.mxu2 %v6854_v33  ;;  %2575 = vmatpush.bf16.msrb.mxu0 %v7494_v34  ;;  %v7333_v31 = vld [vmem:[#allocation10 + $0x450] sm:$0xf]  ;;  %v9690_v33 = vld [vmem:[#allocation10 + $0x114] sm:$0xf]  ;;  %v7558_v35 = vor.u32 %v9854_v26, %v7557_v23  ;;  %v7786_v37 = vor.u32 %v9906_v29, %v7783_v30  ;;  %v9775_v26 = vld [vmem:[#allocation10 + $0x3b4] sm:$0xf0] }
 0x1a8   :  { %v9798_v32 = vld [vmem:[#allocation10 + $0x46c] sm:$0xf0]  ;;  %v6919_v34 = vld [vmem:[#allocation10 + $0x130] sm:$0xf0]  ;;  %v7021_v30 = vld [vmem:[#allocation10 + $0x1d8] sm:$0xf] }
 0x1a9   :  { %2567 = vmatpush.bf16.msra.mxu3 %v7046_v42  ;;  %2591 = vmatpush.bf16.msrb.mxu1 %v7686_v43  ;;  %v7334_v41 = vor.u32 %v9798_v32, %v7333_v31  ;;  %v6922_v42 = vor.u32 %v9690_v33, %v6919_v34  ;;  %v9898_v43 = vld [vmem:[#allocation10 + $0x794] sm:$0xf]  ;;  %v7301_v40 = vld [vmem:[#allocation10 + $0x410] sm:$0xf]  ;;  %v9719_v31 = vld [vmem:[#allocation10 + $0x1f4] sm:$0xf0] }
 0x1aa   :  { %v9790_v46 = vld [vmem:[#allocation10 + $0x42c] sm:$0xf0]  ;;  %v6855_v62 = vld [vmem:[#allocation10 + $0xb0] sm:$0xf0]  ;;  %v7022_v39 = vor.u32 %v9719_v31, %v7021_v30  ;;  %v7085_v30 = vld [vmem:[#allocation10 + $0x258] sm:$0xf] }
 0x1ab   :  { %2552 = vmatpush.bf16.msra.mxu2 %v6822_v47  ;;  %2576 = vmatpush.bf16.msrb.mxu0 %v7462_v48  ;;  %v9682_v47 = vld [vmem:[#allocation10 + $0xd4] sm:$0xf]  ;;  %v7302_v53 = vor.u32 %v9790_v46, %v7301_v40  ;;  %v9711_v40 = vld [vmem:[#allocation10 + $0x1b4] sm:$0xf0] }
 0x1ac   :  { %2568 = vmatmul.bf16.vlgmr.msra.gmra.mxu3 %v10753_v60  ;;  %v6887_v48 = vld [vmem:[#allocation10 + $0xf0] sm:$0xf0]  ;;  %v9735_v31 = vld [vmem:[#allocation10 + $0x274] sm:$0xf0] }
 0x1ad   :  { %2616 = vmatpush.bf16.msrb.mxu3 %v7274_v44  ;;  %2592 = vmatpush.bf16.msrb.mxu1 %v7654_v57  ;;  %v7751_v44 = vld [vmem:[#allocation10 + $0x7b0] sm:$0xf0]  ;;  %v6890_v54 = vor.u32 %v9682_v47, %v6887_v48 }
 0x1ae   :  { %v7754_v52 = vor.u32 %v9898_v43, %v7751_v44  ;;  %v9890_v57 = vld [vmem:[#allocation10 + $0x754] sm:$0xf]  ;;  %v6989_v44 = vld [vmem:[#allocation10 + $0x198] sm:$0xf] }
 0x1af   :  { %2553 = vmatpush.bf16.msra.mxu2 %v6790_v59  ;;  %2577 = vmatpush.bf16.msrb.mxu0 %v7430_v61  ;;  %v7719_v59 = vld [vmem:[#allocation10 + $0x770] sm:$0xf0] }
 0x1b0   :  { %v9674_v61 = vld [vmem:[#allocation10 + $0x94] sm:$0xf]  ;;  %v7722_v3 = vor.u32 %v9890_v57, %v7719_v59  ;;  %v9703_v57 = vld [vmem:[#allocation10 + $0x174] sm:$0xf0] }
 0x1b1   :  { %2617 = vmatpush.bf16.msrb.mxu3 %v7242_v58  ;;  %2593 = vmatpush.bf16.msrb.mxu1 %v7622_v7  ;;  %v7530_v58 = vor.u32 %v9842_v49, %v7527_v50  ;;  %v9834_v63 = vld [vmem:[#allocation10 + $0x594] sm:$0xf]  ;;  %v6858_v4 = vor.u32 %v9674_v61, %v6855_v62 }
 0x1b2   :  { %2554 = vmatmul.bf16.vlgmr.msra.gmra.mxu2 %v10757_v14  ;;  %v7047_v5 = vld [vmem:[#allocation10 + $0x230] sm:$0xf0] }
 0x1b3   :  { %2602 = vmatpush.bf16.msrb.mxu2 %v7018_v1  ;;  %2578 = vmatpush.bf16.msrb.mxu0 %v7398_v9  ;;  %v7082_v1 = vor.u32 %v9730_v55, %v7079_v56  ;;  %v9882_v6 = vld [vmem:[#allocation10 + $0x714] sm:$0xf]  ;;  %v7277_v9 = vld [vmem:[#allocation10 + $0x3d8] sm:$0xf]  ;;  %v7050_v17 = vor.u32 %v9722_v2, %v7047_v5 }
 0x1b4   :  { %v7687_v7 = vld [vmem:[#allocation10 + $0x730] sm:$0xf0]  ;;  %v7278_v19 = vor.u32 %v9783_v11, %v7277_v9  ;;  %v6957_v56 = vld [vmem:[#allocation10 + $0x158] sm:$0xf] }
 0x1b5   :  { %2618 = vmatpush.bf16.msrb.mxu3 %v7210_v8  ;;  %2594 = vmatpush.bf16.msrb.mxu1 %v7590_v22  ;;  %v7498_v8 = vor.u32 %v9834_v63, %v7495_v0  ;;  %v6823_v13 = vld [vmem:[#allocation10 + $0x70] sm:$0xf0]  ;;  %v7690_v18 = vor.u32 %v9882_v6, %v7687_v7  ;;  %v7149_v0 = vld [vmem:[#allocation10 + $0x2d8] sm:$0xf]  ;;  %v6958_v2 = vor.u32 %v9703_v57, %v6957_v56 }
 0x1b6   :  { %v7463_v16 = vld [vmem:[#allocation10 + $0x570] sm:$0xf0]  ;;  %v6826_v23 = vor.u32 %v9666_v12, %v6823_v13  ;;  %v6925_v7 = vld [vmem:[#allocation10 + $0x118] sm:$0xf] }
 0x1b7   :  { %2603 = vmatpush.bf16.msrb.mxu2 %v6986_v15  ;;  %2579 = vmatpush.bf16.msrb.mxu0 %v7366_v25  ;;  %v9826_v15 = vld [vmem:[#allocation10 + $0x554] sm:$0xf]  ;;  %v7245_v25 = vld [vmem:[#allocation10 + $0x398] sm:$0xf] }
 0x1b8   :  { %v9874_v20 = vld [vmem:[#allocation10 + $0x6d4] sm:$0xf]  ;;  %v7246_v33 = vor.u32 %v9775_v26, %v7245_v25  ;;  %v7117_v13 = vld [vmem:[#allocation10 + $0x298] sm:$0xf] }
 0x1b9   :  { %2619 = vmatpush.bf16.msrb.mxu3 %v7178_v24  ;;  %2595 = vmatpush.bf16.msrb.mxu1 %v7558_v35  ;;  %v7655_v22 = vld [vmem:[#allocation10 + $0x6f0] sm:$0xf0]  ;;  %v7466_v24 = vor.u32 %v9826_v15, %v7463_v16  ;;  %v9743_v15 = vld [vmem:[#allocation10 + $0x2b4] sm:$0xf0] }
 0x1ba   :  { %v9658_v27 = vld [vmem:[#allocation10 + $0x14] sm:$0xf]  ;;  %v7658_v32 = vor.u32 %v9874_v20, %v7655_v22  ;;  %v7533_v25 = vld [vmem:[#allocation10 + $0x5d8] sm:$0xf] }
 0x1bb   :  { %2604 = vmatpush.bf16.msrb.mxu2 %v6954_v28  ;;  %2580 = vmatpush.bf16.msrb.mxu0 %v7334_v41  ;;  %v6791_v21 = vld [vmem:[#allocation10 + $0x30] sm:$0xf0]  ;;  %v9767_v41 = vld [vmem:[#allocation10 + $0x374] sm:$0xf0] }
 0x1bc   :  { %2596 = vmatmul.bf16.vlgmr.msrb.gmra.mxu1 %v10760_v45  ;;  %v9818_v28 = vld [vmem:[#allocation10 + $0x514] sm:$0xf]  ;;  %v6794_v34 = vor.u32 %v9658_v27, %v6791_v21  ;;  %v7214_v47 = vor.u32 %v9767_v41, %v7213_v38  ;;  %v9847_v26 = vld [vmem:[#allocation10 + $0x5f4] sm:$0xf0]  ;;  %v7118_v27 = vor.u32 %v9743_v15, %v7117_v13 }
 0x1bd   :  { %2620 = vmatpush.bf16.msrb.mxu3 %v7146_v36  ;;  %2644 = vmatpush.bf16.msra.mxu1 %v7786_v37  ;;  %v7431_v29 = vld [vmem:[#allocation10 + $0x530] sm:$0xf0]  ;;  %v9839_v38 = vld [vmem:[#allocation10 + $0x5b4] sm:$0xf0] }
 0x1be   :  { %v7434_v35 = vor.u32 %v9818_v28, %v7431_v29  ;;  %v9866_v36 = vld [vmem:[#allocation10 + $0x694] sm:$0xf]  ;;  %v7053_v41 = vld [vmem:[#allocation10 + $0x218] sm:$0xf] }
 0x1bf   :  { %2605 = vmatpush.bf16.msrb.mxu2 %v6922_v42  ;;  %2581 = vmatpush.bf16.msrb.mxu0 %v7302_v53  ;;  %v7623_v37 = vld [vmem:[#allocation10 + $0x6b0] sm:$0xf0]  ;;  %v9759_v53 = vld [vmem:[#allocation10 + $0x334] sm:$0xf0] }
 0x1c0   :  { %v9810_v42 = vld [vmem:[#allocation10 + $0x4d4] sm:$0xf]  ;;  %v7626_v46 = vor.u32 %v9866_v36, %v7623_v37  ;;  %v9679_v36 = vld [vmem:[#allocation10 + $0xb4] sm:$0xf0] }
 0x1c1   :  { %2621 = vmatpush.bf16.msrb.mxu3 %v7114_v51  ;;  %2645 = vmatpush.bf16.msra.mxu1 %v7754_v52  ;;  %v7399_v43 = vld [vmem:[#allocation10 + $0x4f0] sm:$0xf0]  ;;  %v7181_v51 = vld [vmem:[#allocation10 + $0x318] sm:$0xf]  ;;  %v6990_v52 = vor.u32 %v9711_v40, %v6989_v44 }
 0x1c2   :  { %2582 = vmatmul.bf16.vlgmr.msrb.gmra.mxu0 %v10764_v10  ;;  %v7402_v48 = vor.u32 %v9810_v42, %v7399_v43  ;;  %v9858_v49 = vld [vmem:[#allocation10 + $0x654] sm:$0xf]  ;;  %v7182_v61 = vor.u32 %v9759_v53, %v7181_v51  ;;  %v7501_v37 = vld [vmem:[#allocation10 + $0x598] sm:$0xf] }
 0x1c3   :  { %2606 = vmatpush.bf16.msrb.mxu2 %v6890_v54  ;;  %2630 = vmatpush.bf16.msra.mxu0 %v7530_v58  ;;  %v7591_v50 = vld [vmem:[#allocation10 + $0x670] sm:$0xf0]  ;;  %v9727_v40 = vld [vmem:[#allocation10 + $0x234] sm:$0xf0] }
 0x1c4   :  { %v9802_v54 = vld [vmem:[#allocation10 + $0x494] sm:$0xf]  ;;  %v7594_v58 = vor.u32 %v9858_v49, %v7591_v50  ;;  %v9779_v49 = vld [vmem:[#allocation10 + $0x3dc] sm:$0xf]  ;;  %v6829_v51 = vld [vmem:[#allocation10 + $0x58] sm:$0xf] }
 0x1c5   :  { %2622 = vmatpush.bf16.msrb.mxu3 %v7082_v1  ;;  %2646 = vmatpush.bf16.msra.mxu1 %v7722_v3  ;;  %v7367_v55 = vld [vmem:[#allocation10 + $0x4b0] sm:$0xf0]  ;;  %v9751_v1 = vld [vmem:[#allocation10 + $0x2f4] sm:$0xf0]  ;;  %v7279_v50 = vld [vmem:[#allocation10 + $0x3f8] sm:$0xf0] }
 0x1c6   :  { %v9850_v59 = vld [vmem:[#allocation10 + $0x614] sm:$0xf]  ;;  %v7370_v62 = vor.u32 %v9802_v54, %v7367_v55  ;;  %v7789_v3 = vld [vmem:[#allocation10 + $0x7d8] sm:$0xf]  ;;  %v7150_v11 = vor.u32 %v9751_v1, %v7149_v0  ;;  %v7054_v55 = vor.u32 %v9727_v40, %v7053_v41  ;;  %v7282_v57 = vor.u32 %v9779_v49, %v7279_v50  ;;  %v7247_v0 = vld [vmem:[#allocation10 + $0x3b8] sm:$0xf0] }
 0x1c7   :  { %2607 = vmatpush.bf16.msrb.mxu2 %v6858_v4  ;;  %2631 = vmatpush.bf16.msra.mxu0 %v7498_v8  ;;  %v7559_v63 = vld [vmem:[#allocation10 + $0x630] sm:$0xf0]  ;;  %v9911_v4 = vld [vmem:[#allocation10 + $0x7f4] sm:$0xf0]  ;;  %v9907_v49 = vld [vmem:[#allocation10 + $0x7dc] sm:$0xf] }
 0x1c8   :  { %v9794_v5 = vld [vmem:[#allocation10 + $0x454] sm:$0xf]  ;;  %v9695_v8 = vld [vmem:[#allocation10 + $0x134] sm:$0xf0]  ;;  %v7562_v9 = vor.u32 %v9850_v59, %v7559_v63  ;;  %v7790_v12 = vor.u32 %v9911_v4, %v7789_v3  ;;  %v9771_v63 = vld [vmem:[#allocation10 + $0x39c] sm:$0xf] }
 0x1c9   :  { %2623 = vmatpush.bf16.msrb.mxu3 %v7050_v17  ;;  %2647 = vmatpush.bf16.msra.mxu1 %v7690_v18  ;;  %v7335_v6 = vld [vmem:[#allocation10 + $0x470] sm:$0xf0]  ;;  %v6926_v17 = vor.u32 %v9695_v8, %v6925_v7  ;;  %v7757_v18 = vld [vmem:[#allocation10 + $0x798] sm:$0xf]  ;;  %v7023_v7 = vld [vmem:[#allocation10 + $0x1f8] sm:$0xf0] }
 0x1ca   :  { %v7338_v16 = vor.u32 %v9794_v5, %v7335_v6  ;;  %v9786_v20 = vld [vmem:[#allocation10 + $0x414] sm:$0xf]  ;;  %v7469_v53 = vld [vmem:[#allocation10 + $0x558] sm:$0xf]  ;;  %v9715_v6 = vld [vmem:[#allocation10 + $0x1dc] sm:$0xf] }
 0x1cb   :  { %2608 = vmatpush.bf16.msrb.mxu2 %v6826_v23  ;;  %2632 = vmatpush.bf16.msra.mxu0 %v7466_v24  ;;  %v7303_v22 = vld [vmem:[#allocation10 + $0x430] sm:$0xf0]  ;;  %v6893_v23 = vld [vmem:[#allocation10 + $0xd8] sm:$0xf]  ;;  %v7791_v50 = vld [vmem:[#allocation10 + $0x7f8] sm:$0xf0] }
 0x1cc   :  { %2624 = vmatmul.bf16.vlgmr.msrb.gmra.mxu3 %v10753_v60  ;;  %v9687_v24 = vld [vmem:[#allocation10 + $0xf4] sm:$0xf0]  ;;  %v7306_v28 = vor.u32 %v9786_v20, %v7303_v22  ;;  %v7026_v20 = vor.u32 %v9715_v6, %v7023_v7  ;;  %v7215_v22 = vld [vmem:[#allocation10 + $0x378] sm:$0xf0] }
 0x1cd   :  { %2672 = vmatpush.bf16.msra.mxu3 %v7278_v19  ;;  %2648 = vmatpush.bf16.msra.mxu1 %v7658_v32  ;;  %v9903_v19 = vld [vmem:[#allocation10 + $0x7b4] sm:$0xf0]  ;;  %v6894_v29 = vor.u32 %v9687_v24, %v6893_v23  ;;  %v9683_v7 = vld [vmem:[#allocation10 + $0xdc] sm:$0xf] }
 0x1ce   :  { %v7758_v21 = vor.u32 %v9903_v19, %v7757_v18  ;;  %v7725_v32 = vld [vmem:[#allocation10 + $0x758] sm:$0xf] }
 0x1cf   :  { %2609 = vmatpush.bf16.msrb.mxu2 %v6794_v34  ;;  %2633 = vmatpush.bf16.msra.mxu0 %v7434_v35  ;;  %v9895_v34 = vld [vmem:[#allocation10 + $0x774] sm:$0xf0] }
 0x1d0   :  { %v6861_v35 = vld [vmem:[#allocation10 + $0x98] sm:$0xf]  ;;  %v7726_v43 = vor.u32 %v9895_v34, %v7725_v32 }
 0x1d1   :  { %2673 = vmatpush.bf16.msra.mxu3 %v7246_v33  ;;  %2649 = vmatpush.bf16.msra.mxu1 %v7626_v46  ;;  %v7534_v33 = vor.u32 %v9847_v26, %v7533_v25  ;;  %v6862_v44 = vor.u32 %v9679_v36, %v6861_v35  ;;  %v7693_v46 = vld [vmem:[#allocation10 + $0x718] sm:$0xf]  ;;  %v9707_v25 = vld [vmem:[#allocation10 + $0x19c] sm:$0xf] }
 0x1d2   :  { %2610 = vmatmul.bf16.vlgmr.msrb.gmra.mxu2 %v10757_v14  ;;  %v9831_v54 = vld [vmem:[#allocation10 + $0x574] sm:$0xf0]  ;;  %v6991_v26 = vld [vmem:[#allocation10 + $0x1b8] sm:$0xf0] }
 0x1d3   :  { %2658 = vmatpush.bf16.msra.mxu2 %v7022_v39  ;;  %2634 = vmatpush.bf16.msra.mxu0 %v7402_v48  ;;  %v7086_v39 = vor.u32 %v9735_v31, %v7085_v30  ;;  %v7502_v48 = vor.u32 %v9839_v38, %v7501_v37  ;;  %v9879_v59 = vld [vmem:[#allocation10 + $0x6f4] sm:$0xf0]  ;;  %v9755_v31 = vld [vmem:[#allocation10 + $0x31c] sm:$0xf]  ;;  %v6994_v32 = vor.u32 %v9707_v25, %v6991_v26 }
 0x1d4   :  { %v6797_v1 = vld [vmem:[#allocation10 + $0x18] sm:$0xf]  ;;  %v9699_v36 = vld [vmem:[#allocation10 + $0x15c] sm:$0xf] }
 0x1d5   :  { %2674 = vmatpush.bf16.msra.mxu3 %v7214_v47  ;;  %2650 = vmatpush.bf16.msra.mxu1 %v7594_v58  ;;  %v10785_v42 = vpop.f32.mrf.mxu2  ;;  %v9887_v47 = vld [vmem:[#allocation10 + $0x734] sm:$0xf0]  ;;  %v6959_v37 = vld [vmem:[#allocation10 + $0x178] sm:$0xf0] }
 0x1d6   :  { %v7694_v56 = vor.u32 %v9887_v47, %v7693_v46  ;;  %v7661_v58 = vld [vmem:[#allocation10 + $0x6d8] sm:$0xf]  ;;  %v9747_v46 = vld [vmem:[#allocation10 + $0x2dc] sm:$0xf] }
 0x1d7   :  { %2659 = vmatpush.bf16.msra.mxu2 %v6990_v52  ;;  %2635 = vmatpush.bf16.msra.mxu0 %v7370_v62  ;;  %v9671_v52 = vld [vmem:[#allocation10 + $0x74] sm:$0xf0]  ;;  %v7470_v62 = vor.u32 %v9831_v54, %v7469_v53  ;;  %v7662_v8 = vor.u32 %v9879_v59, %v7661_v58  ;;  %v7151_v47 = vld [vmem:[#allocation10 + $0x2f8] sm:$0xf0] }
 0x1d8   :  { %v9663_v3 = vld [vmem:[#allocation10 + $0x34] sm:$0xf0]  ;;  %v9691_v54 = vld [vmem:[#allocation10 + $0x11c] sm:$0xf]  ;;  %v7154_v59 = vor.u32 %v9747_v46, %v7151_v47 }
 0x1d9   :  { %2675 = vmatpush.bf16.msra.mxu3 %v7182_v61  ;;  %2651 = vmatpush.bf16.msra.mxu1 %v7562_v9  ;;  %v6830_v61 = vor.u32 %v9671_v52, %v6829_v51  ;;  %v7437_v4 = vld [vmem:[#allocation10 + $0x518] sm:$0xf]  ;;  %v7250_v9 = vor.u32 %v9771_v63, %v7247_v0  ;;  %v7119_v63 = vld [vmem:[#allocation10 + $0x2b8] sm:$0xf0] }
 0x1da   :  { %v9823_v5 = vld [vmem:[#allocation10 + $0x534] sm:$0xf0]  ;;  %v7727_v26 = vld [vmem:[#allocation10 + $0x778] sm:$0xf0] }
 0x1db   :  { %2660 = vmatpush.bf16.msra.mxu2 %v6958_v2  ;;  %2636 = vmatpush.bf16.msra.mxu0 %v7338_v16  ;;  %v10788_v2 = vpop.f32.mrf.mxu3  ;;  %v7438_v13 = vor.u32 %v9823_v5, %v7437_v4  ;;  %v7629_v15 = vld [vmem:[#allocation10 + $0x698] sm:$0xf]  ;;  %v7759_v4 = vld [vmem:[#allocation10 + $0x7b8] sm:$0xf0] }
 0x1dc   :  { %2652 = vmatmul.bf16.vlgmr.msra.gmra.mxu1 %v10760_v45  ;;  %v9871_v16 = vld [vmem:[#allocation10 + $0x6b4] sm:$0xf0]  ;;  %v9667_v46 = vld [vmem:[#allocation10 + $0x5c] sm:$0xf] }
 0x1dd   :  { %2676 = vmatpush.bf16.msra.mxu3 %v7150_v11  ;;  %2700 = vmatpush.bf16.msrb.mxu1 %v7790_v12  ;;  %v10790_v11 = vpop.f32.mrf.mxu1  ;;  %v6798_v12 = vor.u32 %v9663_v3, %v6797_v1  ;;  %v10792_v18 = vpop.f32.mrf.mxu2  ;;  %v7405_v23 = vld [vmem:[#allocation10 + $0x4d8] sm:$0xf]  ;;  %v9899_v3 = vld [vmem:[#allocation10 + $0x79c] sm:$0xf] }
 0x1de   :  { %v9815_v24 = vld [vmem:[#allocation10 + $0x4f4] sm:$0xf0]  ;;  %v6831_v47 = vld [vmem:[#allocation10 + $0x78] sm:$0xf0] }
 0x1df   :  { %2661 = vmatpush.bf16.msra.mxu2 %v6926_v17  ;;  %2637 = vmatpush.bf16.msra.mxu0 %v7306_v28  ;;  %v9763_v17 = vld [vmem:[#allocation10 + $0x35c] sm:$0xf]  ;;  %v10794_v19 = vpop.f32.mrf.mxu0  ;;  %v7406_v28 = vor.u32 %v9815_v24, %v7405_v23  ;;  %v9863_v30 = vld [vmem:[#allocation10 + $0x674] sm:$0xf0] }
 0x1e0   :  { %v7373_v34 = vld [vmem:[#allocation10 + $0x498] sm:$0xf]  ;;  %v7087_v23 = vld [vmem:[#allocation10 + $0x278] sm:$0xf0] }
 0x1e1   :  { %2677 = vmatpush.bf16.msra.mxu3 %v7118_v27  ;;  %2701 = vmatpush.bf16.msrb.mxu1 %v7758_v21  ;;  %v7630_v27 = vor.u32 %v9871_v16, %v7629_v15  ;;  %v7218_v21 = vor.u32 %v9763_v17, %v7215_v22  ;;  %v9807_v35 = vld [vmem:[#allocation10 + $0x4b4] sm:$0xf0]  ;;  %v7762_v15 = vor.u32 %v9899_v3, %v7759_v4  ;;  %v9731_v22 = vld [vmem:[#allocation10 + $0x25c] sm:$0xf] }
 0x1e2   :  { %2638 = vmatmul.bf16.vlgmr.msra.gmra.mxu0 %v10764_v10  ;;  %v7565_v41 = vld [vmem:[#allocation10 + $0x618] sm:$0xf]  ;;  %v9891_v24 = vld [vmem:[#allocation10 + $0x75c] sm:$0xf] }
 0x1e3   :  { %2662 = vmatpush.bf16.msra.mxu2 %v6894_v29  ;;  %2686 = vmatpush.bf16.msrb.mxu0 %v7534_v33  ;;  %v7597_v29 = vld [vmem:[#allocation10 + $0x658] sm:$0xf]  ;;  %v7183_v33 = vld [vmem:[#allocation10 + $0x338] sm:$0xf0]  ;;  %v10797_v38 = vpop.f32.mrf.mxu3 }
 0x1e4   :  { %v9855_v40 = vld [vmem:[#allocation10 + $0x634] sm:$0xf0]  ;;  %v9819_v3 = vld [vmem:[#allocation10 + $0x51c] sm:$0xf] }
 0x1e5   :  { %2678 = vmatpush.bf16.msra.mxu3 %v7086_v39  ;;  %2702 = vmatpush.bf16.msrb.mxu1 %v7726_v43  ;;  %v7598_v39 = vor.u32 %v9863_v30, %v7597_v29  ;;  %v7186_v43 = vor.u32 %v9755_v31, %v7183_v33  ;;  %v7341_v51 = vld [vmem:[#allocation10 + $0x458] sm:$0xf]  ;;  %v10800_v52 = vpop.f32.mrf.mxu1  ;;  %v7566_v58 = vor.u32 %v9855_v40, %v7565_v41  ;;  %v7503_v29 = vld [vmem:[#allocation10 + $0x5b8] sm:$0xf0]  ;;  %v10020_v40 = vld [vmem:[#allocation13 + $0x360] sm:$0xf0] }
 0x1e6   :  { %v9799_v53 = vld [vmem:[#allocation10 + $0x474] sm:$0xf0]  ;;  %v7090_v31 = vor.u32 %v9731_v22, %v7087_v23  ;;  %v7695_v41 = vld [vmem:[#allocation10 + $0x738] sm:$0xf0]  ;;  %v8161_v23 = vld [vmem:[#allocation13 + $0x2d8] sm:$0xf] }
 0x1e7   :  { %2663 = vmatpush.bf16.msra.mxu2 %v6862_v44  ;;  %2687 = vmatpush.bf16.msrb.mxu0 %v7502_v48  ;;  %v7374_v44 = vor.u32 %v9807_v35, %v7373_v34  ;;  %v6962_v48 = vor.u32 %v9699_v36, %v6959_v37  ;;  %v7342_v0 = vor.u32 %v9799_v53, %v7341_v51  ;;  %v7309_v5 = vld [vmem:[#allocation10 + $0x418] sm:$0xf]  ;;  %v7055_v37 = vld [vmem:[#allocation10 + $0x238] sm:$0xf0] }
 0x1e8   :  { %v9791_v6 = vld [vmem:[#allocation10 + $0x434] sm:$0xf0]  ;;  %v7730_v35 = vor.u32 %v9891_v24, %v7727_v26  ;;  %v7439_v4 = vld [vmem:[#allocation10 + $0x538] sm:$0xf0] }
 0x1e9   :  { %2679 = vmatpush.bf16.msra.mxu3 %v7054_v55  ;;  %2703 = vmatpush.bf16.msrb.mxu1 %v7694_v56  ;;  %v6927_v55 = vld [vmem:[#allocation10 + $0x138] sm:$0xf0]  ;;  %v10802_v56 = vpop.f32.mrf.mxu2  ;;  %v7310_v17 = vor.u32 %v9791_v6, %v7309_v5  ;;  %v10818_v5 = vld [vmem:[#allocation11] sm:$0xff]  ;;  %v7993_v6 = vld [vmem:[#allocation13 + $0x188] sm:$0xf] }
 0x1ea   :  { %v6930_v1 = vor.u32 %v9691_v54, %v6927_v55  ;;  %v9875_v54 = vld [vmem:[#allocation10 + $0x6dc] sm:$0xf] }
 0x1eb   :  { %2664 = vmatpush.bf16.msra.mxu2 %v6830_v61  ;;  %2688 = vmatpush.bf16.msrb.mxu0 %v7470_v62  ;;  %v7794_v61 = vor.u32 %v9907_v49, %v7791_v50  ;;  %v9739_v62 = vld [vmem:[#allocation10 + $0x29c] sm:$0xf]  ;;  %v10806_v16 = vpop.f32.mrf.mxu3 }
 0x1ec   :  { %2680 = vmatmul.bf16.vlgmr.msra.gmra.mxu3 %v10753_v60  ;;  %v7471_v49 = vld [vmem:[#allocation10 + $0x578] sm:$0xf0] }
 0x1ed   :  { %2728 = vmatpush.bf16.msrb.mxu3 %v7282_v57  ;;  %2704 = vmatpush.bf16.msrb.mxu1 %v7662_v8  ;;  %v10804_v57 = vpop.f32.mrf.mxu0  ;;  %v6895_v8 = vld [vmem:[#allocation10 + $0xf8] sm:$0xf0]  ;;  %v10809_v30 = vpop.f32.mrf.mxu1 }
 0x1ee   :  { %v7663_v55 = vld [vmem:[#allocation10 + $0x6f8] sm:$0xf0] }
 0x1ef   :  { %2665 = vmatpush.bf16.msra.mxu2 %v6798_v12  ;;  %2689 = vmatpush.bf16.msrb.mxu0 %v7438_v13  ;;  %v7535_v12 = vld [vmem:[#allocation10 + $0x5f8] sm:$0xf0]  ;;  %v7122_v13 = vor.u32 %v9739_v62, %v7119_v63  ;;  %v10013_v62 = vld [vmem:[#allocation13 + $0x328] sm:$0xf0] }
 0x1f0   :  { %v9659_v63 = vld [vmem:[#allocation10 + $0x1c] sm:$0xf] }
 0x1f1   :  { %2729 = vmatpush.bf16.msrb.mxu3 %v7250_v9  ;;  %2705 = vmatpush.bf16.msrb.mxu1 %v7630_v27  ;;  %v9843_v9 = vld [vmem:[#allocation10 + $0x5dc] sm:$0xf]  ;;  %v10811_v33 = vpop.f32.mrf.mxu2 }
 0x1f2   :  { %2666 = vmatmul.bf16.vlgmr.msra.gmra.mxu2 %v10757_v14  ;;  %v7538_v25 = vor.u32 %v9843_v9, %v7535_v12  ;;  %v9675_v27 = vld [vmem:[#allocation10 + $0x9c] sm:$0xf]  ;;  %v7666_v9 = vor.u32 %v9875_v54, %v7663_v55 }
 0x1f3   :  { %2714 = vmatpush.bf16.msrb.mxu2 %v7026_v20  ;;  %2690 = vmatpush.bf16.msrb.mxu0 %v7406_v28  ;;  %v6898_v20 = vor.u32 %v9683_v7, %v6895_v8  ;;  %v9835_v28 = vld [vmem:[#allocation10 + $0x59c] sm:$0xf]  ;;  %v9964_v7 = vld [vmem:[#allocation13 + $0x1a0] sm:$0xf0]  ;;  %v1027_v8 = vperm.slane %v10818_v5, 1 }
 0x1f4   :  { %v7631_v22 = vld [vmem:[#allocation10 + $0x6b8] sm:$0xf0]  ;;  %v7994_v26 = vor.u32 %v9964_v7, %v7993_v6  ;;  %v8665_v7 = vld [vmem:[#allocation13 + $0x6c8] sm:$0xf] }
 0x1f5   :  { %2730 = vmatpush.bf16.msrb.mxu3 %v7218_v21  ;;  %2706 = vmatpush.bf16.msrb.mxu1 %v7598_v39  ;;  %v6863_v21 = vld [vmem:[#allocation10 + $0xb8] sm:$0xf0]  ;;  %v10813_v34 = vpop.f32.mrf.mxu0 }
 0x1f6   :  { %v6866_v36 = vor.u32 %v9675_v27, %v6863_v21  ;;  %v9883_v39 = vld [vmem:[#allocation10 + $0x71c] sm:$0xf] }
 0x1f7   :  { %2715 = vmatpush.bf16.msrb.mxu2 %v6994_v32  ;;  %2691 = vmatpush.bf16.msrb.mxu0 %v7374_v44  ;;  %v9723_v32 = vld [vmem:[#allocation10 + $0x21c] sm:$0xf]  ;;  %v8217_v44 = vld [vmem:[#allocation13 + $0x348] sm:$0xf]  ;;  %v7698_v51 = vor.u32 %v9883_v39, %v7695_v41  ;;  %v8133_v41 = vld [vmem:[#allocation13 + $0x2a0] sm:$0xf] }
 0x1f8   :  { %v7058_v50 = vor.u32 %v9723_v32, %v7055_v37  ;;  %v8218_v53 = vor.u32 %v10020_v40, %v8217_v44  ;;  %v10006_v27 = vld [vmem:[#allocation13 + $0x2f0] sm:$0xf0]  ;;  %v9999_v44 = vld [vmem:[#allocation13 + $0x2b8] sm:$0xf0] }
 0x1f9   :  { %2731 = vmatpush.bf16.msrb.mxu3 %v7186_v43  ;;  %2707 = vmatpush.bf16.msrb.mxu1 %v7566_v58  ;;  %v7506_v43 = vor.u32 %v9835_v28, %v7503_v29  ;;  %v6834_v58 = vor.u32 %v9667_v46, %v6831_v47  ;;  %v10823_v24 = vpop.f32.mrf.mxu2  ;;  %v9811_v21 = vld [vmem:[#allocation10 + $0x4dc] sm:$0xf]  ;;  %v7965_v29 = vld [vmem:[#allocation13 + $0x150] sm:$0xf]  ;;  %v7937_v47 = vld [vmem:[#allocation13 + $0x118] sm:$0xf] }
 0x1fa   :  { %v7407_v28 = vld [vmem:[#allocation10 + $0x4f8] sm:$0xf0] }
 0x1fb   :  { %2716 = vmatpush.bf16.msrb.mxu2 %v6962_v48  ;;  %2692 = vmatpush.bf16.msrb.mxu0 %v7342_v0  ;;  %v9827_v48 = vld [vmem:[#allocation10 + $0x55c] sm:$0xf]  ;;  %v10816_v0 = vpop.f32.mrf.mxu3 }
 0x1fc   :  { %2708 = vmatmul.bf16.vlgmr.msrb.gmra.mxu1 %v10760_v45  ;;  %v9859_v37 = vld [vmem:[#allocation10 + $0x65c] sm:$0xf] }
 0x1fd   :  { %2732 = vmatpush.bf16.msrb.mxu3 %v7154_v59  ;;  %2756 = vmatpush.bf16.msra.mxu1 %v7794_v61  ;;  %v7474_v59 = vor.u32 %v9827_v48, %v7471_v49  ;;  %v8189_v61 = vld [vmem:[#allocation13 + $0x310] sm:$0xf]  ;;  %v7599_v39 = vld [vmem:[#allocation10 + $0x678] sm:$0xf0]  ;;  %v1026_v49 = vperm.slane %v10818_v5, 0 }
 0x1fe   :  { %v8190_v12 = vor.u32 %v10013_v62, %v8189_v61  ;;  %v9803_v40 = vld [vmem:[#allocation10 + $0x49c] sm:$0xf]  ;;  %v9992_v61 = vld [vmem:[#allocation13 + $0x280] sm:$0xf0] }
 0x1ff   :  { %2717 = vmatpush.bf16.msrb.mxu2 %v6930_v1  ;;  %2693 = vmatpush.bf16.msrb.mxu0 %v7310_v17  ;;  %v6799_v1 = vld [vmem:[#allocation10 + $0x38] sm:$0xf0]  ;;  %v7442_v17 = vor.u32 %v9819_v3, %v7439_v4  ;;  %v7909_v3 = vld [vmem:[#allocation13 + $0xe0] sm:$0xf]  ;;  %v2334_v4 = vadd.f32 %v10792_v18, %v1026_v49  ;;  %v8077_v18 = vld [vmem:[#allocation13 + $0x230] sm:$0xf] }
 0x200   :  { %v7375_v46 = vld [vmem:[#allocation10 + $0x4b8] sm:$0xf0] }
 0x201   :  { %2733 = vmatpush.bf16.msrb.mxu3 %v7122_v13  ;;  %2757 = vmatpush.bf16.msra.mxu1 %v7762_v15  ;;  %v10821_v13 = vpop.f32.mrf.mxu1  ;;  %v6802_v15 = vor.u32 %v9659_v63, %v6799_v1  ;;  %v9950_v48 = vld [vmem:[#allocation13 + $0x130] sm:$0xf0]  ;;  %v7378_v55 = vor.u32 %v9803_v40, %v7375_v46  ;;  %v8049_v46 = vld [vmem:[#allocation13 + $0x1f8] sm:$0xf] }
 0x202   :  { %2694 = vmatmul.bf16.vlgmr.msrb.gmra.mxu0 %v10764_v10  ;;  %v9851_v54 = vld [vmem:[#allocation10 + $0x61c] sm:$0xf]  ;;  %v7938_v63 = vor.u32 %v9950_v48, %v7937_v47  ;;  %v7853_v47 = vld [vmem:[#allocation13 + $0x70] sm:$0xf] }
 0x203   :  { %2718 = vmatpush.bf16.msrb.mxu2 %v6898_v20  ;;  %2742 = vmatpush.bf16.msra.mxu0 %v7538_v25  ;;  %v9867_v20 = vld [vmem:[#allocation10 + $0x69c] sm:$0xf]  ;;  %v10825_v25 = vpop.f32.mrf.mxu0 }
 0x204   :  { %v7634_v32 = vor.u32 %v9867_v20, %v7631_v22  ;;  %v9795_v1 = vld [vmem:[#allocation10 + $0x45c] sm:$0xf] }
 0x205   :  { %2734 = vmatpush.bf16.msrb.mxu3 %v7090_v31  ;;  %2758 = vmatpush.bf16.msra.mxu1 %v7730_v35  ;;  %v9957_v31 = vld [vmem:[#allocation13 + $0x168] sm:$0xf0]  ;;  %v8162_v35 = vor.u32 %v10006_v27, %v8161_v23 }
 0x206   :  { %v9985_v23 = vld [vmem:[#allocation13 + $0x248] sm:$0xf0] }
 0x207   :  { %2719 = vmatpush.bf16.msrb.mxu2 %v6866_v36  ;;  %2743 = vmatpush.bf16.msra.mxu0 %v7506_v43  ;;  %v7410_v36 = vor.u32 %v9811_v21, %v7407_v28  ;;  %v2388_v43 = vadd.f32 %v10802_v56, %v1027_v8  ;;  %v8134_v56 = vor.u32 %v9999_v44, %v8133_v41  ;;  %v7311_v28 = vld [vmem:[#allocation10 + $0x438] sm:$0xf0]  ;;  %v10125_v41 = vld [vmem:[#allocation13 + $0x6a8] sm:$0xf0] }
 0x209   :  { %2735 = vmatpush.bf16.msrb.mxu3 %v7058_v50  ;;  %2759 = vmatpush.bf16.msra.mxu1 %v7698_v51  ;;  %v2390_v50 = vadd.f32 %v10811_v33, %v1027_v8  ;;  %v10831_v51 = vpop.f32.mrf.mxu3  ;;  %v2402_v62 = vadd.f32 %v10806_v16, %v2388_v43  ;;  %v7343_v33 = vld [vmem:[#allocation10 + $0x478] sm:$0xf0]  ;;  %v10836_v6 = vpop.f32.mrf.mxu1  ;;  %v10132_v8 = vld [vmem:[#allocation13 + $0x6e0] sm:$0xf0]  ;;  %v8078_v43 = vor.u32 %v9985_v23, %v8077_v18  ;;  %v1028_v18 = vperm.slane %v10818_v5, 2 }
 0x20a   :  { %v7346_v22 = vor.u32 %v9795_v1, %v7343_v33  ;;  %v8666_v21 = vor.u32 %v10132_v8, %v8665_v7  ;;  %v1029_v7 = vperm.slane %v10818_v5, 3 }
 0x20b   :  { %2720 = vmatpush.bf16.msrb.mxu2 %v6834_v58  ;;  %2744 = vmatpush.bf16.msra.mxu0 %v7474_v59  ;;  %v7567_v58 = vld [vmem:[#allocation10 + $0x638] sm:$0xf0]  ;;  %v8105_v59 = vld [vmem:[#allocation13 + $0x268] sm:$0xf] }
 0x20c   :  { %2736 = vmatmul.bf16.vlgmr.msrb.gmra.mxu3 %v10753_v60  ;;  %v7966_v60 = vor.u32 %v9957_v31, %v7965_v29  ;;  %v7570_v16 = vor.u32 %v9851_v54, %v7567_v58  ;;  %v8106_v20 = vor.u32 %v9992_v61, %v8105_v59  ;;  %v2332_v29 = vadd.f32 %v10785_v42, %v1026_v49  ;;  %v9929_v49 = vld [vmem:[#allocation13 + $0x88] sm:$0xf0] }
 0x20d   :  { %5672 = vmatpush.bf16.msra.mxu3 %v8218_v53  ;;  %2760 = vmatpush.bf16.msra.mxu1 %v7666_v9  ;;  %v7602_v53 = vor.u32 %v9859_v37, %v7599_v39  ;;  %v2416_v9 = vadd.f32 %v10813_v34, %v2402_v62  ;;  %v9787_v34 = vld [vmem:[#allocation10 + $0x41c] sm:$0xf]  ;;  %v2348_v31 = vadd.f32 %v10797_v38, %v2334_v4  ;;  %v8637_v39 = vld [vmem:[#allocation13 + $0x690] sm:$0xf]  ;;  %v8021_v62 = vld [vmem:[#allocation13 + $0x1c0] sm:$0xf] }
 0x20e   :  { %v2346_v48 = vadd.f32 %v10788_v2, %v2332_v29  ;;  %v9971_v2 = vld [vmem:[#allocation13 + $0x1d8] sm:$0xf0] }
 0x20f   :  { %2721 = vmatpush.bf16.msrb.mxu2 %v6802_v15  ;;  %2745 = vmatpush.bf16.msra.mxu0 %v7442_v17  ;;  %v10840_v15 = vpop.f32.mrf.mxu2  ;;  %v10842_v17 = vpop.f32.mrf.mxu0  ;;  %v10848_v37 = vadd.f32 %v10809_v30, %v2416_v9  ;;  %v9978_v30 = vld [vmem:[#allocation13 + $0x210] sm:$0xf0]  ;;  %v8022_v23 = vor.u32 %v9971_v2, %v8021_v62  ;;  %v10097_v62 = vld [vmem:[#allocation13 + $0x5c8] sm:$0xf0] }
 0x210   :  { %v2360_v58 = vadd.f32 %v10794_v19, %v2346_v48  ;;  %v8050_v61 = vor.u32 %v9978_v30, %v8049_v46  ;;  %v8385_v19 = vld [vmem:[#allocation13 + $0x498] sm:$0xf]  ;;  %v10062_v9 = vld [vmem:[#allocation13 + $0x4b0] sm:$0xf0]  ;;  %v2446_v30 = vadd.f32 %v10840_v15, %v1028_v18  ;;  %v2444_v15 = vadd.f32 %v10823_v24, %v1028_v18 }
 0x211   :  { %5673 = vmatpush.bf16.msra.mxu3 %v8190_v12  ;;  %2761 = vmatpush.bf16.msra.mxu1 %v7634_v32  ;;  %v2404_v12 = vadd.f32 %v10816_v0, %v2390_v50  ;;  %v7881_v0 = vld [vmem:[#allocation13 + $0xa8] sm:$0xf]  ;;  %v9936_v32 = vld [vmem:[#allocation13 + $0xc0] sm:$0xf0]  ;;  %v10852_v42 = vpop.f32.mrf.mxu3  ;;  %v8413_v50 = vld [vmem:[#allocation13 + $0x4d0] sm:$0xf]  ;;  %v10858_v59 = vpop.f32.mrf.mxu1 }
 0x212   :  { %2722 = vmatmul.bf16.vlgmr.msrb.gmra.mxu2 %v10757_v14  ;;  %v9943_v14 = vld [vmem:[#allocation13 + $0xf8] sm:$0xf0]  ;;  %v7882_v38 = vor.u32 %v9936_v32, %v7881_v0  ;;  %v2787_v54 = vmul.f32 0.2, %v10848_v37  ;;  %vm2771_vm14 = vcmp.gt.f32.partialorder %v10848_v37, 0.0 }
 0x213   :  { %5658 = vmatpush.bf16.msra.mxu2 %v7994_v26  ;;  %2746 = vmatpush.bf16.msra.mxu0 %v7410_v36  ;;  %v2418_v26 = vadd.f32 %v10825_v25, %v2404_v12  ;;  %v7910_v27 = vor.u32 %v9943_v14, %v7909_v3  ;;  %v10076_v36 = vld [vmem:[#allocation13 + $0x520] sm:$0xf0]  ;;  %v2362_v25 = vadd.f32 %v10804_v57, %v2348_v31  ;;  %v9922_v14 = vld [vmem:[#allocation13 + $0x50] sm:$0xf0]  ;;  %v8581_v12 = vld [vmem:[#allocation13 + $0x620] sm:$0xf] }
 0x214   :  { %v8638_v57 = vor.u32 %v10125_v41, %v8637_v39  ;;  %v7854_v3 = vor.u32 %v9929_v49, %v7853_v47  ;;  %v9915_v0 = vld [vmem:[#allocation13 + $0x18] sm:$0xf0]  ;;  %v8357_v31 = vld [vmem:[#allocation13 + $0x460] sm:$0xf]  ;;  %v2803_v39 = vsel %vm2771_vm14, %v10848_v37, %v2787_v54  ;;  %v10188_v41 = vld [vmem:[#allocation13 + $0x8a0] sm:$0xf0] }
 0x215   :  { %5674 = vmatpush.bf16.msra.mxu3 %v8162_v35  ;;  %2762 = vmatpush.bf16.msra.mxu1 %v7602_v53  ;;  %v8441_v35 = vld [vmem:[#allocation13 + $0x508] sm:$0xf]  ;;  %v2432_v44 = vadd.f32 %v10821_v13, %v2418_v26  ;;  %v10069_v53 = vld [vmem:[#allocation13 + $0x4e8] sm:$0xf0]  ;;  %v10055_v32 = vld [vmem:[#allocation13 + $0x478] sm:$0xf0] }
 0x216   :  { %v8442_v40 = vor.u32 %v10076_v36, %v8441_v35  ;;  %v8414_v4 = vor.u32 %v10069_v53, %v8413_v50  ;;  %v8889_v35 = vld [vmem:[#allocation13 + $0x888] sm:$0xf] }
 0x217   :  { %5659 = vmatpush.bf16.msra.mxu2 %v7966_v60  ;;  %2747 = vmatpush.bf16.msra.mxu0 %v7378_v55  ;;  %v7314_v60 = vor.u32 %v9787_v34, %v7311_v28  ;;  %v2499_v13 = vpop.f32.mrf.mxu2  ;;  %v10118_v55 = vld [vmem:[#allocation13 + $0x670] sm:$0xf0]  ;;  %v2795_v1 = vmul.f32 0.2, %v2432_v44  ;;  %v10863_v33 = vpop.f32.mrf.mxu0  ;;  %vm2779_vm13 = vcmp.gt.f32.partialorder %v2432_v44, 0.0  ;;  %v8890_v50 = vor.u32 %v10188_v41, %v8889_v35 }
 0x218   :  { %v7797_v28 = vld [vmem:[#allocation13] sm:$0xf]  ;;  %v8329_v54 = vld [vmem:[#allocation13 + $0x428] sm:$0xf]  ;;  %v10167_v41 = vld [vmem:[#allocation13 + $0x7f8] sm:$0xf0] }
 0x219   :  { %5675 = vmatpush.bf16.msra.mxu3 %v8134_v56  ;;  %2763 = vmatpush.bf16.msra.mxu1 %v7570_v16  ;;  %v8609_v56 = vld [vmem:[#allocation13 + $0x658] sm:$0xf]  ;;  %v9113_v16 = vld [vmem:[#allocation13 + $0xa48] sm:$0xf]  ;;  %v7798_v37 = vor.u32 %v9915_v0, %v7797_v28  ;;  %v8805_v35 = vld [vmem:[#allocation13 + $0x7e0] sm:$0xf] }
 0x21a   :  { %v8610_v8 = vor.u32 %v10118_v55, %v8609_v56  ;;  %v8861_v56 = vld [vmem:[#allocation13 + $0x850] sm:$0xf] }
 0x21b   :  { %5660 = vmatpush.bf16.msra.mxu2 %v7938_v63  ;;  %2748 = vmatpush.bf16.msra.mxu0 %v7346_v22  ;;  %v7825_v63 = vld [vmem:[#allocation13 + $0x38] sm:$0xf]  ;;  %v2374_v22 = vadd.f32 %v10790_v11, %v2360_v58  ;;  %v2500_v11 = vadd.f32 %v2499_v13, %v1029_v7  ;;  %v10048_v13 = vld [vmem:[#allocation13 + $0x440] sm:$0xf0]  ;;  %v10181_v58 = vld [vmem:[#allocation13 + $0x868] sm:$0xf0] }
 0x21c   :  { %2764 = vmatmul.bf16.vlgmr.msra.gmra.mxu1 %v10760_v45  ;;  %v10861_v45 = vadd.f32 %v10800_v52, %v2362_v25  ;;  %v10111_v52 = vld [vmem:[#allocation13 + $0x638] sm:$0xf0]  ;;  %v7826_v34 = vor.u32 %v9922_v14, %v7825_v63  ;;  %v8553_v25 = vld [vmem:[#allocation13 + $0x5e8] sm:$0xf] }
 0x21d   :  { %5676 = vmatpush.bf16.msra.mxu3 %v8106_v20  ;;  %5700 = vmatpush.bf16.msrb.mxu1 %v8666_v21  ;;  %v10244_v20 = vld [vmem:[#allocation13 + $0xa60] sm:$0xf0]  ;;  %v2513_v21 = vpop.f32.mrf.mxu3  ;;  %v8582_v29 = vor.u32 %v10111_v52, %v8581_v12  ;;  %vm2770_vm15 = vcmp.gt.f32.partialorder %v2374_v22, 0.0  ;;  %v2786_v46 = vmul.f32 0.2, %v2374_v22 }
 0x21e   :  { %v2794_v26 = vmul.f32 0.2, %v10861_v45  ;;  %v9114_v36 = vor.u32 %v10244_v20, %v9113_v16  ;;  %vm2778_vm0 = vcmp.gt.f32.partialorder %v10861_v45, 0.0  ;;  %v2514_v49 = vadd.f32 %v2513_v21, %v2500_v11  ;;  %v8301_v12 = vld [vmem:[#allocation13 + $0x3f0] sm:$0xf] }
 0x21f   :  { %5661 = vmatpush.bf16.msra.mxu2 %v7910_v27  ;;  %2749 = vmatpush.bf16.msra.mxu0 %v7314_v60  ;;  %v2811_v27 = vsel %vm2779_vm13, %v2432_v44, %v2795_v1  ;;  %v2541_v44 = vpop.f32.mrf.mxu1  ;;  %v2501_v47 = vpop.f32.mrf.mxu2  ;;  %v2802_v14 = vsel %vm2770_vm15, %v2374_v22, %v2786_v46  ;;  %v10041_v52 = vld [vmem:[#allocation13 + $0x408] sm:$0xf0]  ;;  %v8833_v16 = vld [vmem:[#allocation13 + $0x818] sm:$0xf]  ;;  %v10174_v22 = vld [vmem:[#allocation13 + $0x830] sm:$0xf0] }
 0x220   :  { %v10878_v60 = vpack.c.bf16 %v2811_v27, %v2803_v39  ;;  %v2527_v48 = vpop.f32.mrf.mxu0  ;;  %v2810_v55 = vsel %vm2778_vm0, %v10861_v45, %v2794_v26  ;;  %v2502_v63 = vadd.f32 %v2501_v47, %v1029_v7  ;;  %v8330_v45 = vor.u32 %v10048_v13, %v8329_v54  ;;  %v10216_v46 = vld [vmem:[#allocation13 + $0x980] sm:$0xf0] }
 0x221   :  { %5677 = vmatpush.bf16.msra.mxu3 %v8078_v43  ;;  %5701 = vmatpush.bf16.msrb.mxu1 %v8638_v57  ;;  %v10104_v43 = vld [vmem:[#allocation13 + $0x600] sm:$0xf0]  ;;  %v8358_v57 = vor.u32 %v10055_v32, %v8357_v31  ;;  %v2528_v1 = vadd.f32 %v2527_v48, %v2514_v49  ;;  %v10890_v24 = vpack.c.bf16 %v2810_v55, %v2802_v14  ;;  %v8273_v31 = vld [vmem:[#allocation13 + $0x3b8] sm:$0xf]  ;;  %v10034_v32 = vld [vmem:[#allocation13 + $0x3d0] sm:$0xf0] }
 0x222   :  { %2750 = vmatmul.bf16.vlgmr.msra.gmra.mxu0 %v10764_v10  ;;  %v8386_v10 = vor.u32 %v10062_v9, %v8385_v19  ;;  %v8554_v53 = vor.u32 %v10104_v43, %v8553_v25  ;;  %v2460_v19 = vadd.f32 %v10852_v42, %v2446_v30  ;;  %v2458_v7 = vadd.f32 %v10831_v51, %v2444_v15  ;;  %v10090_v42 = vld [vmem:[#allocation13 + $0x590] sm:$0xf0]  ;;  %v8469_v25 = vld [vmem:[#allocation13 + $0x540] sm:$0xf]  ;;  %v10083_v43 = vld [vmem:[#allocation13 + $0x558] sm:$0xf0] }
 0x223   :  { %5662 = vmatpush.bf16.msra.mxu2 %v7882_v38  ;;  %5686 = vmatpush.bf16.msrb.mxu0 %v8442_v40  ;;  %v9085_v38 = vld [vmem:[#allocation13 + $0xa10] sm:$0xf]  ;;  %v10237_v40 = vld [vmem:[#allocation13 + $0xa28] sm:$0xf0]  ;;  %v2542_v27 = vadd.f32 %v2541_v44, %v2528_v1  ;;  %v8302_v11 = vor.u32 %v10041_v52, %v8301_v12  ;;  %v8274_v47 = vor.u32 %v10034_v32, %v8273_v31  ;;  %v8245_v48 = vld [vmem:[#allocation13 + $0x380] sm:$0xf] }
 0x224   :  { %v9086_v2 = vor.u32 %v10237_v40, %v9085_v38  ;;  %v2474_v20 = vadd.f32 %v10863_v33, %v2460_v19  ;;  %v2472_v28 = vadd.f32 %v10842_v17, %v2458_v7  ;;  %v8834_v33 = vor.u32 %v10174_v22, %v8833_v16  ;;  %v9001_v40 = vld [vmem:[#allocation13 + $0x968] sm:$0xf]  ;;  %v10027_v49 = vld [vmem:[#allocation13 + $0x398] sm:$0xf0]  ;;  %v10160_v54 = vld [vmem:[#allocation13 + $0x7c0] sm:$0xf0] }
 0x225   :  { %5678 = vmatpush.bf16.msra.mxu3 %v8050_v61  ;;  %5702 = vmatpush.bf16.msrb.mxu1 %v8610_v8  ;;  %v8525_v61 = vld [vmem:[#allocation13 + $0x5b0] sm:$0xf]  ;;  %v8862_v8 = vor.u32 %v10181_v58, %v8861_v56  ;;  %v2515_v18 = vpop.f32.mrf.mxu3  ;;  %v2789_v17 = vmul.f32 0.2, %v2542_v27  ;;  %vm2773_vm1 = vcmp.gt.f32.partialorder %v2542_v27, 0.0  ;;  %v9002_v13 = vor.u32 %v10216_v46, %v9001_v40 }
 0x226   :  { %v8526_v9 = vor.u32 %v10097_v62, %v8525_v61  ;;  %v2516_v21 = vadd.f32 %v2515_v18, %v2502_v63  ;;  %v2486_v30 = vadd.f32 %v10836_v6, %v2472_v28  ;;  %v8973_v55 = vld [vmem:[#allocation13 + $0x930] sm:$0xf]  ;;  %v10209_v15 = vld [vmem:[#allocation13 + $0x948] sm:$0xf0]  ;;  %v8246_v62 = vor.u32 %v10027_v49, %v8245_v48  ;;  %v10300_v63 = vld [vmem:[#allocation13 + $0xc20] sm:$0xf0] }
 0x227   :  { %5663 = vmatpush.bf16.msra.mxu2 %v7854_v3  ;;  %5687 = vmatpush.bf16.msrb.mxu0 %v8414_v4  ;;  %v9057_v3 = vld [vmem:[#allocation13 + $0x9d8] sm:$0xf]  ;;  %v10230_v4 = vld [vmem:[#allocation13 + $0x9f0] sm:$0xf0]  ;;  %v2543_v39 = vpop.f32.mrf.mxu1  ;;  %v2805_v56 = vsel %vm2773_vm1, %v2542_v27, %v2789_v17  ;;  %v8749_v14 = vld [vmem:[#allocation13 + $0x770] sm:$0xf] }
 0x228   :  { %v9058_v26 = vor.u32 %v10230_v4, %v9057_v3  ;;  %v2529_v0 = vpop.f32.mrf.mxu0  ;;  %v2788_v58 = vmul.f32 0.2, %v2486_v30  ;;  %vm2772_vm4 = vcmp.gt.f32.partialorder %v2486_v30, 0.0  ;;  %v10153_v19 = vld [vmem:[#allocation13 + $0x788] sm:$0xf0] }
 0x229   :  { %5679 = vmatpush.bf16.msra.mxu3 %v8022_v23  ;;  %5703 = vmatpush.bf16.msrb.mxu1 %v8582_v29  ;;  %v8497_v23 = vld [vmem:[#allocation13 + $0x578] sm:$0xf]  ;;  %v2530_v51 = vadd.f32 %v2529_v0, %v2516_v21  ;;  %v9309_v12 = vld [vmem:[#allocation13 + $0xbd0] sm:$0xf]  ;;  %v10293_v52 = vld [vmem:[#allocation13 + $0xbe8] sm:$0xf0]  ;;  %v8750_v18 = vor.u32 %v10153_v19, %v8749_v14 }
 0x22a   :  { %v8498_v29 = vor.u32 %v10090_v42, %v8497_v23  ;;  %v2804_v16 = vsel %vm2772_vm4, %v2486_v30, %v2788_v58  ;;  %v8721_v22 = vld [vmem:[#allocation13 + $0x738] sm:$0xf]  ;;  %v9310_v23 = vor.u32 %v10293_v52, %v9309_v12  ;;  %v10146_v42 = vld [vmem:[#allocation13 + $0x750] sm:$0xf0]  ;;  %v10195_v28 = vld [vmem:[#allocation13 + $0x8d8] sm:$0xf0] }
 0x22b   :  { %5664 = vmatpush.bf16.msra.mxu2 %v7826_v34  ;;  %5688 = vmatpush.bf16.msrb.mxu0 %v8386_v10  ;;  %v9029_v34 = vld [vmem:[#allocation13 + $0x9a0] sm:$0xf]  ;;  %v10223_v10 = vld [vmem:[#allocation13 + $0x9b8] sm:$0xf0]  ;;  %v2544_v38 = vadd.f32 %v2543_v39, %v2530_v51  ;;  %v9281_v27 = vld [vmem:[#allocation13 + $0xb98] sm:$0xf]  ;;  %v8722_v51 = vor.u32 %v10146_v42, %v8721_v22 }
 0x22c   :  { %5680 = vmatmul.bf16.vlgmr.msra.gmra.mxu3 %v10878_v60  ;;  %v9030_v44 = vor.u32 %v10223_v10, %v9029_v34  ;;  %v10286_v21 = vld [vmem:[#allocation13 + $0xbb0] sm:$0xf0]  ;;  %v1030_v34 = vperm.slane %v10818_v5, 4  ;;  %v8917_v10 = vld [vmem:[#allocation13 + $0x8c0] sm:$0xf] }
 0x22d   :  { %5728 = vmatpush.bf16.msrb.mxu3 %v9114_v36  ;;  %5704 = vmatpush.bf16.msrb.mxu1 %v8554_v53  ;;  %v2488_v36 = vadd.f32 %v10858_v59, %v2474_v20  ;;  %vm2781_vm2 = vcmp.gt.f32.partialorder %v2544_v38, 0.0  ;;  %v8806_v59 = vor.u32 %v10167_v41, %v8805_v35  ;;  %v8777_v53 = vld [vmem:[#allocation13 + $0x7a8] sm:$0xf]  ;;  %v10017_v0 = vld [vmem:[#allocation13 + $0x34c] sm:$0xf]  ;;  %v8918_v35 = vor.u32 %v10195_v28, %v8917_v10 }
 0x22e   :  { %v8778_v1 = vor.u32 %v10160_v54, %v8777_v53  ;;  %v8693_v31 = vld [vmem:[#allocation13 + $0x700] sm:$0xf]  ;;  %v10139_v32 = vld [vmem:[#allocation13 + $0x718] sm:$0xf0]  ;;  %v9961_v39 = vld [vmem:[#allocation13 + $0x18c] sm:$0xf] }
 0x22f   :  { %5665 = vmatpush.bf16.msra.mxu2 %v7798_v37  ;;  %5689 = vmatpush.bf16.msrb.mxu0 %v8358_v57  ;;  %v2797_v37 = vmul.f32 0.2, %v2544_v38  ;;  %v8470_v57 = vor.u32 %v10083_v43, %v8469_v25  ;;  %vm2780_vm3 = vcmp.gt.f32.partialorder %v2488_v36, 0.0  ;;  %v7995_v41 = vld [vmem:[#allocation13 + $0x1a4] sm:$0xf0]  ;;  %v8694_v46 = vor.u32 %v10139_v32, %v8693_v31 }
 0x230   :  { %v10010_v43 = vld [vmem:[#allocation13 + $0x314] sm:$0xf]  ;;  %v9253_v17 = vld [vmem:[#allocation13 + $0xb60] sm:$0xf]  ;;  %v7967_v49 = vld [vmem:[#allocation13 + $0x16c] sm:$0xf0] }
 0x231   :  { %5729 = vmatpush.bf16.msrb.mxu3 %v9086_v2  ;;  %5705 = vmatpush.bf16.msrb.mxu1 %v8526_v9  ;;  %v2813_v6 = vsel %vm2781_vm2, %v2544_v38, %v2797_v37  ;;  %v9337_v2 = vld [vmem:[#allocation13 + $0xc08] sm:$0xf]  ;;  %v10202_v9 = vld [vmem:[#allocation13 + $0x910] sm:$0xf0]  ;;  %v10279_v38 = vld [vmem:[#allocation13 + $0xb78] sm:$0xf0]  ;;  %v7998_v37 = vor.u32 %v9961_v39, %v7995_v41 }
 0x232   :  { %5666 = vmatmul.bf16.vlgmr.msra.gmra.mxu2 %v10890_v24  ;;  %v10899_v61 = vpack.c.bf16 %v2813_v6, %v2805_v56  ;;  %v9338_v3 = vor.u32 %v10300_v63, %v9337_v2  ;;  %v9254_v30 = vor.u32 %v10279_v38, %v9253_v17  ;;  %v10003_v53 = vld [vmem:[#allocation13 + $0x2dc] sm:$0xf]  ;;  %v8163_v54 = vld [vmem:[#allocation13 + $0x2f4] sm:$0xf0]  ;;  %v10272_v56 = vld [vmem:[#allocation13 + $0xb40] sm:$0xf0] }
 0x233   :  { %5714 = vmatpush.bf16.msrb.mxu2 %v8890_v50  ;;  %5690 = vmatpush.bf16.msrb.mxu0 %v8330_v45  ;;  %v2796_v50 = vmul.f32 0.2, %v2488_v36  ;;  %v8974_v45 = vor.u32 %v10209_v15, %v8973_v55  ;;  %v7939_v2 = vld [vmem:[#allocation13 + $0x134] sm:$0xf0]  ;;  %v8166_v63 = vor.u32 %v10003_v53, %v8163_v54  ;;  %v9197_v14 = vld [vmem:[#allocation13 + $0xaf0] sm:$0xf] }
 0x234   :  { %v10265_v19 = vld [vmem:[#allocation13 + $0xb08] sm:$0xf0]  ;;  %v9982_v31 = vld [vmem:[#allocation13 + $0x234] sm:$0xf]  ;;  %v8079_v32 = vld [vmem:[#allocation13 + $0x24c] sm:$0xf0] }
 0x235   :  { %5730 = vmatpush.bf16.msrb.mxu3 %v9058_v26  ;;  %5706 = vmatpush.bf16.msrb.mxu1 %v8498_v29  ;;  %v2812_v4 = vsel %vm2780_vm3, %v2488_v36, %v2796_v50  ;;  %v2555_v7 = vpop.f32.mrf.mxu2  ;;  %v2569_v29 = vpop.f32.mrf.mxu3  ;;  %v10349_v53 = vld [vmem:[#allocation13 + $0xda8] sm:$0xf0]  ;;  %v10066_v54 = vld [vmem:[#allocation13 + $0x4d4] sm:$0xf] }
 0x236   :  { %v10903_v20 = vpack.c.bf16 %v2812_v4, %v2804_v16  ;;  %v2556_v36 = vadd.f32 %v2555_v7, %v1030_v34  ;;  %v8135_v4 = vld [vmem:[#allocation13 + $0x2bc] sm:$0xf0]  ;;  %v9940_v7 = vld [vmem:[#allocation13 + $0xe4] sm:$0xf] }
 0x237   :  { %5715 = vmatpush.bf16.msrb.mxu2 %v8862_v8  ;;  %5691 = vmatpush.bf16.msrb.mxu0 %v8302_v11  ;;  %v8945_v8 = vld [vmem:[#allocation13 + $0x8f8] sm:$0xf]  ;;  %v8219_v11 = vld [vmem:[#allocation13 + $0x364] sm:$0xf0] }
 0x238   :  { %v8946_v26 = vor.u32 %v10202_v9, %v8945_v8  ;;  %v8222_v25 = vor.u32 %v10017_v0, %v8219_v11  ;;  %v9198_v9 = vor.u32 %v10265_v19, %v9197_v14  ;;  %v9933_v11 = vld [vmem:[#allocation13 + $0xac] sm:$0xf]  ;;  %v10059_v14 = vld [vmem:[#allocation13 + $0x49c] sm:$0xf]  ;;  %v1031_v19 = vperm.slane %v10818_v5, 5 }
 0x239   :  { %5731 = vmatpush.bf16.msrb.mxu3 %v9030_v44  ;;  %5707 = vmatpush.bf16.msrb.mxu1 %v8470_v57  ;;  %v8191_v44 = vld [vmem:[#allocation13 + $0x32c] sm:$0xf0]  ;;  %v2597_v40 = vpop.f32.mrf.mxu1  ;;  %v9954_v57 = vld [vmem:[#allocation13 + $0x154] sm:$0xf] }
 0x23a   :  { %v8194_v50 = vor.u32 %v10010_v43, %v8191_v44  ;;  %v7970_v58 = vor.u32 %v9954_v57, %v7967_v49  ;;  %v9561_v43 = vld [vmem:[#allocation13 + $0xdc8] sm:$0xf]  ;;  %v10356_v44 = vld [vmem:[#allocation13 + $0xde0] sm:$0xf0]  ;;  %v9975_v57 = vld [vmem:[#allocation13 + $0x1fc] sm:$0xf] }
 0x23b   :  { %5716 = vmatpush.bf16.msrb.mxu2 %v8834_v33  ;;  %5692 = vmatpush.bf16.msrb.mxu0 %v8274_v47  ;;  %v9282_v33 = vor.u32 %v10286_v21, %v9281_v27  ;;  %v9169_v27 = vld [vmem:[#allocation13 + $0xab8] sm:$0xf]  ;;  %v10258_v21 = vld [vmem:[#allocation13 + $0xad0] sm:$0xf0] }
 0x23c   :  { %5708 = vmatmul.bf16.vlgmr.msrb.gmra.mxu1 %v10899_v61  ;;  %v9170_v28 = vor.u32 %v10258_v21, %v9169_v27  ;;  %v8051_v49 = vld [vmem:[#allocation13 + $0x214] sm:$0xf0]  ;;  %v10335_v27 = vld [vmem:[#allocation13 + $0xd38] sm:$0xf0]  ;;  %v10052_v21 = vld [vmem:[#allocation13 + $0x464] sm:$0xf] }
 0x23d   :  { %5732 = vmatpush.bf16.msrb.mxu3 %v9002_v13  ;;  %v2557_v47 = vpop.f32.mrf.mxu2  ;;  %v9225_v13 = vld [vmem:[#allocation13 + $0xb28] sm:$0xf] }
 0x23e   :  { %v2558_v6 = vadd.f32 %v2557_v47, %v1030_v34  ;;  %v9226_v15 = vor.u32 %v10272_v56, %v9225_v13  ;;  %v9926_v47 = vld [vmem:[#allocation13 + $0x74] sm:$0xf] }
 0x23f   :  { %5717 = vmatpush.bf16.msrb.mxu2 %v8806_v59  ;;  %5693 = vmatpush.bf16.msrb.mxu0 %v8246_v62  ;;  %v2583_v48 = vpop.f32.mrf.mxu0  ;;  %v2570_v59 = vadd.f32 %v2569_v29, %v2556_v36  ;;  %v9947_v62 = vld [vmem:[#allocation13 + $0x11c] sm:$0xf] }
 0x240   :  { %v7942_v52 = vor.u32 %v9947_v62, %v7939_v2  ;;  %v10251_v36 = vld [vmem:[#allocation13 + $0xa98] sm:$0xf0]  ;;  %v8054_v62 = vor.u32 %v9975_v57, %v8051_v49  ;;  %v9968_v2 = vld [vmem:[#allocation13 + $0x1c4] sm:$0xf]  ;;  %v10038_v57 = vld [vmem:[#allocation13 + $0x3f4] sm:$0xf] }
 0x241   :  { %5733 = vmatpush.bf16.msrb.mxu3 %v8974_v45  ;;  %v2584_v55 = vadd.f32 %v2583_v48, %v2570_v59  ;;  %v2599_v42 = vpop.f32.mrf.mxu1  ;;  %v7855_v48 = vld [vmem:[#allocation13 + $0x8c] sm:$0xf0] }
 0x242   :  { %5694 = vmatmul.bf16.vlgmr.msrb.gmra.mxu0 %v10903_v20  ;;  %v7858_v56 = vor.u32 %v9926_v47, %v7855_v48  ;;  %v9421_v47 = vld [vmem:[#allocation13 + $0xcb0] sm:$0xf] }
 0x243   :  { %5718 = vmatpush.bf16.msrb.mxu2 %v8778_v1  ;;  %5742 = vmatpush.bf16.msra.mxu0 %v9338_v3  ;;  %v9996_v1 = vld [vmem:[#allocation13 + $0x2a4] sm:$0xf]  ;;  %v2571_v3 = vpop.f32.mrf.mxu3  ;;  %v2598_v45 = vadd.f32 %v2597_v40, %v2584_v55  ;;  %v9562_v40 = vor.u32 %v10356_v44, %v9561_v43  ;;  %v8303_v49 = vld [vmem:[#allocation13 + $0x40c] sm:$0xf0] }
 0x244   :  { %v2572_v8 = vadd.f32 %v2571_v3, %v2558_v6  ;;  %v8138_v22 = vor.u32 %v9996_v1, %v8135_v4  ;;  %v9919_v6 = vld [vmem:[#allocation13 + $0x3c] sm:$0xf]  ;;  %v9505_v3 = vld [vmem:[#allocation13 + $0xd58] sm:$0xf]  ;;  %v10342_v4 = vld [vmem:[#allocation13 + $0xd70] sm:$0xf0] }
 0x245   :  { %5734 = vmatpush.bf16.msrb.mxu3 %v8946_v26  ;;  %v8107_v26 = vld [vmem:[#allocation13 + $0x284] sm:$0xf0]  ;;  %v2790_v34 = vmul.f32 0.2, %v2598_v45  ;;  %vm2774_vm5 = vcmp.gt.f32.partialorder %v2598_v45, 0.0  ;;  %5756 = vmatpush.bf16.msra.mxu1 %v9562_v40 }
 0x246   :  { %v10171_v40 = vld [vmem:[#allocation13 + $0x81c] sm:$0xf] }
 0x247   :  { %5719 = vmatpush.bf16.msrb.mxu2 %v8750_v18  ;;  %5743 = vmatpush.bf16.msra.mxu0 %v9310_v23  ;;  %v2585_v12 = vpop.f32.mrf.mxu0  ;;  %v7911_v18 = vld [vmem:[#allocation13 + $0xfc] sm:$0xf0]  ;;  %v9989_v23 = vld [vmem:[#allocation13 + $0x26c] sm:$0xf]  ;;  %v2806_v39 = vsel %vm2774_vm5, %v2598_v45, %v2790_v34  ;;  %v9506_v45 = vor.u32 %v10342_v4, %v9505_v3  ;;  %v8779_v3 = vld [vmem:[#allocation13 + $0x7c4] sm:$0xf0] }
 0x248   :  { %v2586_v16 = vadd.f32 %v2585_v12, %v2572_v8  ;;  %v7914_v0 = vor.u32 %v9940_v7, %v7911_v18  ;;  %v8110_v29 = vor.u32 %v9989_v23, %v8107_v26  ;;  %v8387_v8 = vld [vmem:[#allocation13 + $0x4b4] sm:$0xf0]  ;;  %v8891_v23 = vld [vmem:[#allocation13 + $0x8a4] sm:$0xf0]  ;;  %v9477_v26 = vld [vmem:[#allocation13 + $0xd20] sm:$0xf] }
 0x249   :  { %5735 = vmatpush.bf16.msrb.mxu3 %v8918_v35  ;;  %v9141_v35 = vld [vmem:[#allocation13 + $0xa80] sm:$0xf]  ;;  %v8390_v12 = vor.u32 %v10059_v14, %v8387_v8  ;;  %v9478_v34 = vor.u32 %v10335_v27, %v9477_v26  ;;  %v8275_v14 = vld [vmem:[#allocation13 + $0x3d4] sm:$0xf0] }
 0x24a   :  { %v2600_v10 = vadd.f32 %v2599_v42, %v2586_v16  ;;  %v7799_v16 = vld [vmem:[#allocation13 + $0x1c] sm:$0xf0] }
 0x24b   :  { %5720 = vmatpush.bf16.msrb.mxu2 %v8722_v51  ;;  %5744 = vmatpush.bf16.msra.mxu0 %v9282_v33  ;;  %v7883_v51 = vld [vmem:[#allocation13 + $0xc4] sm:$0xf0]  ;;  %v8247_v26 = vld [vmem:[#allocation13 + $0x39c] sm:$0xf0] }
 0x24c   :  { %vm2782_vm6 = vcmp.gt.f32.partialorder %v2600_v10, 0.0  ;;  %v2798_v33 = vmul.f32 0.2, %v2600_v10  ;;  %v7886_v38 = vor.u32 %v9933_v11, %v7883_v51 }
 0x24d   :  { %5784 = vmatpush.bf16.msra.mxu3 %v8222_v25  ;;  %v9142_v25 = vor.u32 %v10251_v36, %v9141_v35  ;;  %v9449_v35 = vld [vmem:[#allocation13 + $0xce8] sm:$0xf]  ;;  %v10328_v36 = vld [vmem:[#allocation13 + $0xd00] sm:$0xf0] }
 0x24e   :  { %v2814_v41 = vsel %vm2782_vm6, %v2600_v10, %v2798_v33  ;;  %v8359_v10 = vld [vmem:[#allocation13 + $0x47c] sm:$0xf0] }
 0x24f   :  { %5721 = vmatpush.bf16.msrb.mxu2 %v8694_v46  ;;  %5745 = vmatpush.bf16.msra.mxu0 %v9254_v30  ;;  %v10907_v17 = vpack.c.bf16 %v2814_v41, %v2806_v39  ;;  %v10073_v46 = vld [vmem:[#allocation13 + $0x50c] sm:$0xf]  ;;  %v8443_v30 = vld [vmem:[#allocation13 + $0x524] sm:$0xf0]  ;;  %v2625_v18 = vpop.f32.mrf.mxu3  ;;  %v8362_v11 = vor.u32 %v10052_v21, %v8359_v10  ;;  %v9450_v41 = vor.u32 %v10328_v36, %v9449_v35 }
 0x250   :  { %v8446_v59 = vor.u32 %v10073_v46, %v8443_v30  ;;  %v10045_v39 = vld [vmem:[#allocation13 + $0x42c] sm:$0xf]  ;;  %v8835_v46 = vld [vmem:[#allocation13 + $0x834] sm:$0xf0] }
 0x251   :  { %5785 = vmatpush.bf16.msra.mxu3 %v8194_v50  ;;  %v9533_v50 = vld [vmem:[#allocation13 + $0xd90] sm:$0xf] }
 0x252   :  { %5722 = vmatmul.bf16.vlgmr.msrb.gmra.mxu2 %v10907_v17  ;;  %v9534_v55 = vor.u32 %v10349_v53, %v9533_v50 }
 0x253   :  { %5770 = vmatpush.bf16.msra.mxu2 %v7998_v37  ;;  %5746 = vmatpush.bf16.msra.mxu0 %v9226_v15  ;;  %v8082_v37 = vor.u32 %v9982_v31, %v8079_v32  ;;  %v8415_v15 = vld [vmem:[#allocation13 + $0x4ec] sm:$0xf0] }
 0x254   :  { %v8418_v1 = vor.u32 %v10066_v54, %v8415_v15  ;;  %5757 = vmatpush.bf16.msra.mxu1 %v9534_v55  ;;  %v8863_v31 = vld [vmem:[#allocation13 + $0x86c] sm:$0xf0]  ;;  %v8807_v55 = vld [vmem:[#allocation13 + $0x7fc] sm:$0xf0] }
 0x255   :  { %5786 = vmatpush.bf16.msra.mxu3 %v8166_v63  ;;  %v2611_v13 = vpop.f32.mrf.mxu2  ;;  %v8023_v63 = vld [vmem:[#allocation13 + $0x1dc] sm:$0xf0] }
 0x256   :  { %v8026_v7 = vor.u32 %v9968_v2, %v8023_v63  ;;  %v2612_v42 = vadd.f32 %v2611_v13, %v1031_v19  ;;  %v8306_v13 = vor.u32 %v10038_v57, %v8303_v49  ;;  %v10031_v2 = vld [vmem:[#allocation13 + $0x3bc] sm:$0xf]  ;;  %v10136_v57 = vld [vmem:[#allocation13 + $0x704] sm:$0xf]  ;;  %v8695_v49 = vld [vmem:[#allocation13 + $0x71c] sm:$0xf0] }
 0x257   :  { %5771 = vmatpush.bf16.msra.mxu2 %v7970_v58  ;;  %5747 = vmatpush.bf16.msra.mxu0 %v9198_v9  ;;  %v7827_v58 = vld [vmem:[#allocation13 + $0x54] sm:$0xf0]  ;;  %v2627_v48 = vpop.f32.mrf.mxu3 }
 0x258   :  { %v7830_v9 = vor.u32 %v9919_v6, %v7827_v58  ;;  %5758 = vmatpush.bf16.msra.mxu1 %v9506_v45  ;;  %v2626_v32 = vadd.f32 %v2625_v18, %v2612_v42  ;;  %v10164_v6 = vld [vmem:[#allocation13 + $0x7e4] sm:$0xf]  ;;  %v9393_v58 = vld [vmem:[#allocation13 + $0xc78] sm:$0xf] }
 0x259   :  { %5787 = vmatpush.bf16.msra.mxu3 %v8138_v22  ;;  %v10185_v22 = vld [vmem:[#allocation13 + $0x88c] sm:$0xf]  ;;  %v8810_v8 = vor.u32 %v10164_v6, %v8807_v55  ;;  %v10024_v42 = vld [vmem:[#allocation13 + $0x384] sm:$0xf] }
 0x25a   :  { %v10108_v55 = vld [vmem:[#allocation13 + $0x624] sm:$0xf] }
 0x25b   :  { %5772 = vmatpush.bf16.msra.mxu2 %v7942_v52  ;;  %5748 = vmatpush.bf16.msra.mxu0 %v9170_v28  ;;  %v9912_v52 = vld [vmem:[#allocation13 + $0x4] sm:$0xf]  ;;  %v2653_v28 = vpop.f32.mrf.mxu1 }
 0x25c   :  { %v7802_v5 = vor.u32 %v9912_v52, %v7799_v16  ;;  %5759 = vmatpush.bf16.msra.mxu1 %v9478_v34  ;;  %v8278_v52 = vor.u32 %v10031_v2, %v8275_v14  ;;  %v8751_v34 = vld [vmem:[#allocation13 + $0x78c] sm:$0xf0] }
 0x25d   :  { %5788 = vmatpush.bf16.msra.mxu3 %v8110_v29  ;;  %v2613_v51 = vpop.f32.mrf.mxu2  ;;  %v10178_v29 = vld [vmem:[#allocation13 + $0x854] sm:$0xf] }
 0x25e   :  { %v2614_v43 = vadd.f32 %v2613_v51, %v1031_v19  ;;  %v10234_v51 = vld [vmem:[#allocation13 + $0xa14] sm:$0xf] }
 0x25f   :  { %5773 = vmatpush.bf16.msra.mxu2 %v7914_v0  ;;  %5749 = vmatpush.bf16.msra.mxu0 %v9142_v25  ;;  %v8894_v0 = vor.u32 %v10185_v22, %v8891_v23  ;;  %v2639_v33 = vpop.f32.mrf.mxu0  ;;  %v8331_v25 = vld [vmem:[#allocation13 + $0x444] sm:$0xf0]  ;;  %v10307_v23 = vld [vmem:[#allocation13 + $0xc58] sm:$0xf0] }
 0x260   :  { %v2640_v44 = vadd.f32 %v2639_v33, %v2626_v32  ;;  %v8334_v30 = vor.u32 %v10045_v39, %v8331_v25  ;;  %5760 = vmatpush.bf16.msra.mxu1 %v9450_v41  ;;  %v2628_v53 = vadd.f32 %v2627_v48, %v2614_v43  ;;  %v9087_v33 = vld [vmem:[#allocation13 + $0xa2c] sm:$0xf0]  ;;  %v10122_v32 = vld [vmem:[#allocation13 + $0x694] sm:$0xf]  ;;  %v10143_v39 = vld [vmem:[#allocation13 + $0x73c] sm:$0xf] }
 0x261   :  { %5789 = vmatpush.bf16.msra.mxu3 %v8082_v37  ;;  %v8838_v37 = vor.u32 %v10171_v40, %v8835_v46  ;;  %v9090_v36 = vor.u32 %v10234_v51, %v9087_v33  ;;  %v8639_v41 = vld [vmem:[#allocation13 + $0x6ac] sm:$0xf0]  ;;  %v8723_v43 = vld [vmem:[#allocation13 + $0x754] sm:$0xf0]  ;;  %v10115_v46 = vld [vmem:[#allocation13 + $0x65c] sm:$0xf] }
 0x262   :  { %v2654_v50 = vadd.f32 %v2653_v28, %v2640_v44  ;;  %v8250_v28 = vor.u32 %v10024_v42, %v8247_v26  ;;  %v10227_v44 = vld [vmem:[#allocation13 + $0x9dc] sm:$0xf]  ;;  %v8642_v40 = vor.u32 %v10122_v32, %v8639_v41 }
 0x263   :  { %5774 = vmatpush.bf16.msra.mxu2 %v7886_v38  ;;  %5798 = vmatpush.bf16.msrb.mxu0 %v8446_v59  ;;  %v8866_v38 = vor.u32 %v10178_v29, %v8863_v31  ;;  %v10321_v59 = vld [vmem:[#allocation13 + $0xcc8] sm:$0xf0]  ;;  %v2655_v63 = vpop.f32.mrf.mxu1  ;;  %v8667_v29 = vld [vmem:[#allocation13 + $0x6e4] sm:$0xf0]  ;;  %v10199_v33 = vld [vmem:[#allocation13 + $0x8fc] sm:$0xf] }
 0x264   :  { %v9422_v54 = vor.u32 %v10321_v59, %v9421_v47  ;;  %v2791_v19 = vmul.f32 0.2, %v2654_v50  ;;  %vm2775_vm7 = vcmp.gt.f32.partialorder %v2654_v50, 0.0  ;;  %v10915_v47 = vld [vmem:[#allocation11] sm:$0xff] }
 0x265   :  { %5790 = vmatpush.bf16.msra.mxu3 %v8054_v62  ;;  %v10314_v62 = vld [vmem:[#allocation13 + $0xc90] sm:$0xf0]  ;;  %v1032_v48 = vperm.slane %v10915_v47, 6 }
 0x266   :  { %5761 = vmatpush.bf16.msra.mxu1 %v9422_v54  ;;  %v9394_v4 = vor.u32 %v10314_v62, %v9393_v58  ;;  %v2807_v27 = vsel %vm2775_vm7, %v2654_v50, %v2791_v19  ;;  %v10220_v50 = vld [vmem:[#allocation13 + $0x9a4] sm:$0xf]  ;;  %v8698_v62 = vor.u32 %v10136_v57, %v8695_v49  ;;  %v7973_v19 = vld [vmem:[#allocation13 + $0x158] sm:$0xf]  ;;  %v7889_v57 = vld [vmem:[#allocation13 + $0xb0] sm:$0xf] }
 0x267   :  { %5775 = vmatpush.bf16.msra.mxu2 %v7858_v56  ;;  %5799 = vmatpush.bf16.msrb.mxu0 %v8418_v1  ;;  %v2641_v56 = vpop.f32.mrf.mxu0  ;;  %v10157_v1 = vld [vmem:[#allocation13 + $0x7ac] sm:$0xf] }
 0x268   :  { %v2642_v15 = vadd.f32 %v2641_v56, %v2628_v53  ;;  %v8782_v18 = vor.u32 %v10157_v1, %v8779_v3  ;;  %v9031_v53 = vld [vmem:[#allocation13 + $0x9bc] sm:$0xf0]  ;;  %v9965_v56 = vld [vmem:[#allocation13 + $0x1a8] sm:$0xf0]  ;;  %v9003_v3 = vld [vmem:[#allocation13 + $0x984] sm:$0xf0] }
 0x269   :  { %5791 = vmatpush.bf16.msra.mxu3 %v8026_v7  ;;  %v9365_v7 = vld [vmem:[#allocation13 + $0xc40] sm:$0xf]  ;;  %v9034_v2 = vor.u32 %v10220_v50, %v9031_v53  ;;  %v10213_v1 = vld [vmem:[#allocation13 + $0x96c] sm:$0xf] }
 0x26a   :  { %v2656_v45 = vadd.f32 %v2655_v63, %v2642_v15  ;;  %5762 = vmatpush.bf16.msra.mxu1 %v9394_v4  ;;  %v9366_v10 = vor.u32 %v10307_v23, %v9365_v7  ;;  %v8583_v15 = vld [vmem:[#allocation13 + $0x63c] sm:$0xf0]  ;;  %v9006_v7 = vor.u32 %v10213_v1, %v9003_v3  ;;  %v8975_v23 = vld [vmem:[#allocation13 + $0x94c] sm:$0xf0] }
 0x26b   :  { %5776 = vmatpush.bf16.msra.mxu2 %v7830_v9  ;;  %5800 = vmatpush.bf16.msrb.mxu0 %v8390_v12  ;;  %v10241_v9 = vld [vmem:[#allocation13 + $0xa4c] sm:$0xf]  ;;  %v9115_v12 = vld [vmem:[#allocation13 + $0xa64] sm:$0xf0]  ;;  %v8586_v4 = vor.u32 %v10108_v55, %v8583_v15 }
 0x26c   :  { %vm2783_vm8 = vcmp.gt.f32.partialorder %v2656_v45, 0.0  ;;  %v2799_v16 = vmul.f32 0.2, %v2656_v45  ;;  %v9118_v22 = vor.u32 %v10241_v9, %v9115_v12  ;;  %v10101_v12 = vld [vmem:[#allocation13 + $0x5ec] sm:$0xf] }
 0x26e   :  { %v2815_v21 = vsel %vm2783_vm8, %v2656_v45, %v2799_v16  ;;  %5763 = vmatpush.bf16.msra.mxu1 %v9366_v10  ;;  %v9958_v45 = vld [vmem:[#allocation13 + $0x170] sm:$0xf0]  ;;  %v8527_v10 = vld [vmem:[#allocation13 + $0x5cc] sm:$0xf0] }
 0x26f   :  { %5777 = vmatpush.bf16.msra.mxu2 %v7802_v5  ;;  %5801 = vmatpush.bf16.msrb.mxu0 %v8362_v11  ;;  %v10150_v5 = vld [vmem:[#allocation13 + $0x774] sm:$0xf]  ;;  %v10912_v11 = vpack.c.bf16 %v2815_v21, %v2807_v27  ;;  %v2681_v6 = vpop.f32.mrf.mxu3  ;;  %v7945_v21 = vld [vmem:[#allocation13 + $0x120] sm:$0xf] }
 0x270   :  { %v8754_v35 = vor.u32 %v10150_v5, %v8751_v34  ;;  %v9951_v5 = vld [vmem:[#allocation13 + $0x138] sm:$0xf0]  ;;  %v10094_v34 = vld [vmem:[#allocation13 + $0x5b4] sm:$0xf] }
 0x271   :  { %5736 = vmatmul.bf16.vlgmr.msrb.gmra.mxu3 %v10912_v11  ;;  %v7946_v51 = vor.u32 %v9951_v5, %v7945_v21  ;;  %v8169_v21 = vld [vmem:[#allocation13 + $0x2e0] sm:$0xf]  ;;  %v10007_v5 = vld [vmem:[#allocation13 + $0x2f8] sm:$0xf0] }
 0x272   :  { %5778 = vmatmul.bf16.vlgmr.msra.gmra.mxu2 %v10890_v24  ;;  %5840 = vmatpush.bf16.msrb.mxu3 %v9118_v22  ;;  %v10206_v22 = vld [vmem:[#allocation13 + $0x934] sm:$0xf] }
 0x273   :  { %5826 = vmatpush.bf16.msrb.mxu2 %v8894_v0  ;;  %5802 = vmatpush.bf16.msrb.mxu0 %v8334_v30  ;;  %v10129_v0 = vld [vmem:[#allocation13 + $0x6cc] sm:$0xf]  ;;  %v8611_v30 = vld [vmem:[#allocation13 + $0x674] sm:$0xf0] }
 0x274   :  { %v8670_v31 = vor.u32 %v10129_v0, %v8667_v29  ;;  %v8614_v54 = vor.u32 %v10115_v46, %v8611_v30  ;;  %v8947_v29 = vld [vmem:[#allocation13 + $0x914] sm:$0xf0]  ;;  %v8919_v46 = vld [vmem:[#allocation13 + $0x8dc] sm:$0xf0] }
 0x275   :  { %v2667_v25 = vpop.f32.mrf.mxu2 }
 0x276   :  { %5812 = vmatpush.bf16.msrb.mxu1 %v8670_v31  ;;  %5841 = vmatpush.bf16.msrb.mxu3 %v9090_v36  ;;  %v2668_v58 = vadd.f32 %v2667_v25, %v1032_v48  ;;  %v8530_v31 = vor.u32 %v10094_v34, %v8527_v10  ;;  %v7917_v36 = vld [vmem:[#allocation13 + $0xe8] sm:$0xf]  ;;  %v10087_v25 = vld [vmem:[#allocation13 + $0x57c] sm:$0xf]  ;;  %v1033_v34 = vperm.slane %v10915_v47, 7 }
 0x277   :  { %5827 = vmatpush.bf16.msrb.mxu2 %v8866_v38  ;;  %5803 = vmatpush.bf16.msrb.mxu0 %v8306_v13  ;;  %v9059_v38 = vld [vmem:[#allocation13 + $0x9f4] sm:$0xf0]  ;;  %v8001_v13 = vld [vmem:[#allocation13 + $0x190] sm:$0xf]  ;;  %v2683_v0 = vpop.f32.mrf.mxu3 }
 0x278   :  { %v9062_v59 = vor.u32 %v10227_v44, %v9059_v38  ;;  %v8002_v63 = vor.u32 %v9965_v56, %v8001_v13  ;;  %v2682_v16 = vadd.f32 %v2681_v6, %v2668_v58  ;;  %v8950_v38 = vor.u32 %v10199_v33, %v8947_v29  ;;  %v8225_v13 = vld [vmem:[#allocation13 + $0x350] sm:$0xf]  ;;  %v10021_v56 = vld [vmem:[#allocation13 + $0x368] sm:$0xf0]  ;;  %v10080_v6 = vld [vmem:[#allocation13 + $0x544] sm:$0xf] }
 0x279   :  { %v2709_v14 = vpop.f32.mrf.mxu1  ;;  %v8471_v58 = vld [vmem:[#allocation13 + $0x55c] sm:$0xf0]  ;;  %v8226_v3 = vor.u32 %v10021_v56, %v8225_v13  ;;  %v7805_v33 = vld [vmem:[#allocation13 + $0x8] sm:$0xf]  ;;  %v9916_v29 = vld [vmem:[#allocation13 + $0x20] sm:$0xf0] }
 0x27a   :  { %5813 = vmatpush.bf16.msrb.mxu1 %v8642_v40  ;;  %5842 = vmatpush.bf16.msrb.mxu3 %v9062_v59  ;;  %v10192_v40 = vld [vmem:[#allocation13 + $0x8c4] sm:$0xf]  ;;  %v9339_v59 = vld [vmem:[#allocation13 + $0xc24] sm:$0xf0]  ;;  %v10262_v56 = vld [vmem:[#allocation13 + $0xaf4] sm:$0xf] }
 0x27b   :  { %5828 = vmatpush.bf16.msrb.mxu2 %v8838_v37  ;;  %5804 = vmatpush.bf16.msrb.mxu0 %v8278_v52  ;;  %v8726_v37 = vor.u32 %v10143_v39, %v8723_v43  ;;  %v8555_v52 = vld [vmem:[#allocation13 + $0x604] sm:$0xf0]  ;;  %v9944_v39 = vld [vmem:[#allocation13 + $0x100] sm:$0xf0]  ;;  %v8499_v43 = vld [vmem:[#allocation13 + $0x594] sm:$0xf0]  ;;  %v8922_v15 = vor.u32 %v10192_v40, %v8919_v46 }
 0x27c   :  { %v8558_v42 = vor.u32 %v10101_v12, %v8555_v52  ;;  %v8502_v49 = vor.u32 %v10087_v25, %v8499_v43  ;;  %v10014_v12 = vld [vmem:[#allocation13 + $0x330] sm:$0xf0]  ;;  %v8474_v52 = vor.u32 %v10080_v6, %v8471_v58  ;;  %v7806_v43 = vor.u32 %v9916_v29, %v7805_v33  ;;  %v9199_v58 = vld [vmem:[#allocation13 + $0xb0c] sm:$0xf0]  ;;  %v10353_v29 = vld [vmem:[#allocation13 + $0xdcc] sm:$0xf] }
 0x27e   :  { %5814 = vmatpush.bf16.msrb.mxu1 %v8614_v54  ;;  %5843 = vmatpush.bf16.msrb.mxu3 %v9034_v2  ;;  %v9937_v54 = vld [vmem:[#allocation13 + $0xc8] sm:$0xf0] }
 0x27f   :  { %5829 = vmatpush.bf16.msrb.mxu2 %v8810_v8  ;;  %5805 = vmatpush.bf16.msrb.mxu0 %v8250_v28  ;;  %v2669_v8 = vpop.f32.mrf.mxu2  ;;  %v2695_v9 = vpop.f32.mrf.mxu0  ;;  %v8978_v28 = vor.u32 %v10206_v22, %v8975_v23  ;;  %v10283_v23 = vld [vmem:[#allocation13 + $0xb9c] sm:$0xf] }
 0x280   :  { %v2670_v26 = vadd.f32 %v2669_v8, %v1032_v48  ;;  %v2696_v27 = vadd.f32 %v2695_v9, %v2682_v16  ;;  %v7918_v48 = vor.u32 %v9944_v39, %v7917_v36  ;;  %v9311_v8 = vld [vmem:[#allocation13 + $0xbec] sm:$0xf0]  ;;  %v8197_v9 = vld [vmem:[#allocation13 + $0x318] sm:$0xf] }
 0x281   :  { %5792 = vmatmul.bf16.vlgmr.msra.gmra.mxu3 %v10878_v60  ;;  %v2711_v30 = vpop.f32.mrf.mxu1  ;;  %v8198_v22 = vor.u32 %v10014_v12, %v8197_v9  ;;  %v8897_v39 = vld [vmem:[#allocation13 + $0x890] sm:$0xf] }
 0x282   :  { %5815 = vmatpush.bf16.msrb.mxu1 %v8586_v4  ;;  %5844 = vmatpush.bf16.msrb.mxu3 %v9006_v7  ;;  %v2710_v32 = vadd.f32 %v2709_v14, %v2696_v27  ;;  %v10290_v4 = vld [vmem:[#allocation13 + $0xbd4] sm:$0xf]  ;;  %v7861_v14 = vld [vmem:[#allocation13 + $0x78] sm:$0xf] }
 0x283   :  { %5830 = vmatpush.bf16.msrb.mxu2 %v8782_v18  ;;  %v7974_v18 = vor.u32 %v9958_v45, %v7973_v19  ;;  %v9930_v19 = vld [vmem:[#allocation13 + $0x90] sm:$0xf0]  ;;  %v9283_v27 = vld [vmem:[#allocation13 + $0xbb4] sm:$0xf0] }
 0x284   :  { %v2792_v50 = vmul.f32 0.2, %v2710_v32  ;;  %vm2776_vm9 = vcmp.gt.f32.partialorder %v2710_v32, 0.0  ;;  %v7862_v16 = vor.u32 %v9930_v19, %v7861_v14  ;;  %v10255_v19 = vld [vmem:[#allocation13 + $0xabc] sm:$0xf] }
 0x286   :  { %5816 = vmatpush.bf16.msrb.mxu1 %v8558_v42  ;;  %5845 = vmatpush.bf16.msrb.mxu3 %v8978_v28  ;;  %v2808_v2 = vsel %vm2776_vm9, %v2710_v32, %v2792_v50  ;;  %v7833_v42 = vld [vmem:[#allocation13 + $0x40] sm:$0xf]  ;;  %v9286_v28 = vor.u32 %v10283_v23, %v9283_v27  ;;  %v8141_v32 = vld [vmem:[#allocation13 + $0x2a8] sm:$0xf]  ;;  %v10182_v50 = vld [vmem:[#allocation13 + $0x870] sm:$0xf0] }
 0x287   :  { %5831 = vmatpush.bf16.msrb.mxu2 %v8754_v35  ;;  %v2684_v35 = vadd.f32 %v2683_v0, %v2670_v26  ;;  %v2697_v41 = vpop.f32.mrf.mxu0  ;;  %v9923_v26 = vld [vmem:[#allocation13 + $0x58] sm:$0xf0]  ;;  %v8170_v0 = vor.u32 %v10007_v5, %v8169_v21  ;;  %v10168_v23 = vld [vmem:[#allocation13 + $0x800] sm:$0xf0] }
 0x288   :  { %v7834_v10 = vor.u32 %v9923_v26, %v7833_v42  ;;  %v10248_v26 = vld [vmem:[#allocation13 + $0xa84] sm:$0xf] }
 0x289   :  { %v2698_v44 = vadd.f32 %v2697_v41, %v2684_v35  ;;  %v10000_v35 = vld [vmem:[#allocation13 + $0x2c0] sm:$0xf0]  ;;  %v10189_v41 = vld [vmem:[#allocation13 + $0x8a8] sm:$0xf0] }
 0x28a   :  { %5817 = vmatpush.bf16.msrb.mxu1 %v8530_v31  ;;  %5846 = vmatpush.bf16.msrb.mxu3 %v8950_v38  ;;  %v9255_v31 = vld [vmem:[#allocation13 + $0xb7c] sm:$0xf0]  ;;  %v10269_v38 = vld [vmem:[#allocation13 + $0xb2c] sm:$0xf]  ;;  %v8898_v46 = vor.u32 %v10189_v41, %v8897_v39 }
 0x28b   :  { %5832 = vmatpush.bf16.msrb.mxu2 %v8726_v37  ;;  %v10297_v37 = vld [vmem:[#allocation13 + $0xc0c] sm:$0xf]  ;;  %v2712_v53 = vadd.f32 %v2711_v30, %v2698_v44  ;;  %v8142_v44 = vor.u32 %v10000_v35, %v8141_v32  ;;  %v9227_v30 = vld [vmem:[#allocation13 + $0xb44] sm:$0xf0]  ;;  %v8449_v32 = vld [vmem:[#allocation13 + $0x510] sm:$0xf] }
 0x28c   :  { %v9342_v1 = vor.u32 %v10297_v37, %v9339_v59  ;;  %v9993_v37 = vld [vmem:[#allocation13 + $0x288] sm:$0xf0] }
 0x28d   :  { %vm2784_vm10 = vcmp.gt.f32.partialorder %v2712_v53, 0.0  ;;  %v2800_v55 = vmul.f32 0.2, %v2712_v53  ;;  %v10077_v35 = vld [vmem:[#allocation13 + $0x528] sm:$0xf0] }
 0x28e   :  { %5818 = vmatpush.bf16.msrb.mxu1 %v8502_v49  ;;  %5847 = vmatpush.bf16.msrb.mxu3 %v8922_v15  ;;  %v8869_v49 = vld [vmem:[#allocation13 + $0x858] sm:$0xf]  ;;  %v10161_v41 = vld [vmem:[#allocation13 + $0x7c8] sm:$0xf0] }
 0x28f   :  { %5833 = vmatpush.bf16.msrb.mxu2 %v8698_v62  ;;  %v7890_v62 = vor.u32 %v9937_v54, %v7889_v57  ;;  %v2737_v36 = vpop.f32.mrf.mxu3  ;;  %v9230_v54 = vor.u32 %v10269_v38, %v9227_v30  ;;  %v8870_v15 = vor.u32 %v10182_v50, %v8869_v49  ;;  %v10070_v49 = vld [vmem:[#allocation13 + $0x4f0] sm:$0xf0] }
 0x291   :  { %5848 = vmatmul.bf16.vlgmr.msrb.gmra.mxu3 %v10912_v11 }
 0x292   :  { %5834 = vmatmul.bf16.vlgmr.msrb.gmra.mxu2 %v10907_v17  ;;  %5896 = vmatpush.bf16.msra.mxu3 %v8226_v3 }
 0x293   :  { %5882 = vmatpush.bf16.msra.mxu2 %v8002_v63  ;;  %v2816_v63 = vsel %vm2784_vm10, %v2712_v53, %v2800_v55  ;;  %5819 = vmatpush.bf16.msrb.mxu1 %v8474_v52  ;;  %v9171_v52 = vld [vmem:[#allocation13 + $0xad4] sm:$0xf0] }
 0x294   :  { %v10920_v45 = vpack.c.bf16 %v2816_v63, %v2808_v2  ;;  %v9986_v2 = vld [vmem:[#allocation13 + $0x250] sm:$0xf0]  ;;  %v8841_v63 = vld [vmem:[#allocation13 + $0x820] sm:$0xf]  ;;  %v9174_v21 = vor.u32 %v10255_v19, %v9171_v52 }
 0x295   :  { %v2723_v7 = vpop.f32.mrf.mxu2  ;;  %v9065_v19 = vld [vmem:[#allocation13 + $0x9e0] sm:$0xf] }
 0x296   :  { %5750 = vmatmul.bf16.vlgmr.msra.gmra.mxu0 %v10920_v45  ;;  %5897 = vmatpush.bf16.msra.mxu3 %v8198_v22  ;;  %v2724_v25 = vadd.f32 %v2723_v7, %v1033_v34  ;;  %v9979_v7 = vld [vmem:[#allocation13 + $0x218] sm:$0xf0]  ;;  %v8813_v22 = vld [vmem:[#allocation13 + $0x7e8] sm:$0xf] }
 0x297   :  { %5883 = vmatpush.bf16.msra.mxu2 %v7974_v18  ;;  %5854 = vmatpush.bf16.msra.mxu0 %v9342_v1  ;;  %v9314_v18 = vor.u32 %v10290_v4, %v9311_v8  ;;  %v10175_v1 = vld [vmem:[#allocation13 + $0x838] sm:$0xf0]  ;;  %v2739_v3 = vpop.f32.mrf.mxu3  ;;  %v9202_v4 = vor.u32 %v10262_v56, %v9199_v58  ;;  %v8814_v33 = vor.u32 %v10168_v23, %v8813_v22  ;;  %v9093_v56 = vld [vmem:[#allocation13 + $0xa18] sm:$0xf]  ;;  %v10056_v22 = vld [vmem:[#allocation13 + $0x480] sm:$0xf0] }
 0x298   :  { %v2738_v53 = vadd.f32 %v2737_v36, %v2724_v25  ;;  %v8842_v12 = vor.u32 %v10175_v1, %v8841_v63  ;;  %v8785_v36 = vld [vmem:[#allocation13 + $0x7b0] sm:$0xf]  ;;  %v10063_v63 = vld [vmem:[#allocation13 + $0x4b8] sm:$0xf0] }
 0x299   :  { %v2765_v40 = vpop.f32.mrf.mxu1 }
 0x29a   :  { %5898 = vmatpush.bf16.msra.mxu3 %v8170_v0 }
 0x29b   :  { %5884 = vmatpush.bf16.msra.mxu2 %v7946_v51  ;;  %5855 = vmatpush.bf16.msra.mxu0 %v9314_v18  ;;  %v10276_v51 = vld [vmem:[#allocation13 + $0xb64] sm:$0xf] }
 0x29c   :  { %v9258_v47 = vor.u32 %v10276_v51, %v9255_v31  ;;  %v9563_v31 = vld [vmem:[#allocation13 + $0xde4] sm:$0xf0] }
 0x29d   :  { %v2725_v59 = vpop.f32.mrf.mxu2 }
 0x29e   :  { %5899 = vmatpush.bf16.msra.mxu3 %v8142_v44  ;;  %v2726_v6 = vadd.f32 %v2725_v59, %v1033_v34  ;;  %v9143_v34 = vld [vmem:[#allocation13 + $0xa9c] sm:$0xf0]  ;;  %v10245_v44 = vld [vmem:[#allocation13 + $0xa68] sm:$0xf0]  ;;  %v10346_v59 = vld [vmem:[#allocation13 + $0xd94] sm:$0xf] }
 0x29f   :  { %5885 = vmatpush.bf16.msra.mxu2 %v7918_v48  ;;  %5856 = vmatpush.bf16.msra.mxu0 %v9286_v28  ;;  %v8113_v48 = vld [vmem:[#allocation13 + $0x270] sm:$0xf]  ;;  %v2751_v57 = vpop.f32.mrf.mxu0  ;;  %v9972_v28 = vld [vmem:[#allocation13 + $0x1e0] sm:$0xf0]  ;;  %v9146_v25 = vor.u32 %v10248_v26, %v9143_v34 }
 0x2a0   :  { %v8114_v13 = vor.u32 %v9993_v37, %v8113_v48  ;;  %v2752_v55 = vadd.f32 %v2751_v57, %v2738_v53  ;;  %v2740_v9 = vadd.f32 %v2739_v3, %v2726_v6  ;;  %v9566_v48 = vor.u32 %v10353_v29, %v9563_v31  ;;  %v8421_v57 = vld [vmem:[#allocation13 + $0x4d8] sm:$0xf]  ;;  %v9535_v53 = vld [vmem:[#allocation13 + $0xdac] sm:$0xf0]  ;;  %v10238_v6 = vld [vmem:[#allocation13 + $0xa30] sm:$0xf0] }
 0x2a1   :  { %v2767_v27 = vpop.f32.mrf.mxu1  ;;  %v8786_v37 = vor.u32 %v10161_v41, %v8785_v36  ;;  %v9094_v1 = vor.u32 %v10238_v6, %v9093_v56  ;;  %v9507_v3 = vld [vmem:[#allocation13 + $0xd74] sm:$0xf0]  ;;  %v10140_v26 = vld [vmem:[#allocation13 + $0x720] sm:$0xf0]  ;;  %v8003_v34 = vld [vmem:[#allocation13 + $0x1ac] sm:$0xf0] }
 0x2a2   :  { %5900 = vmatpush.bf16.msra.mxu3 %v8114_v13  ;;  %v2766_v8 = vadd.f32 %v2765_v40, %v2752_v55  ;;  %v10154_v13 = vld [vmem:[#allocation13 + $0x790] sm:$0xf0]  ;;  %v8422_v55 = vor.u32 %v10070_v49, %v8421_v57  ;;  %v9009_v36 = vld [vmem:[#allocation13 + $0x970] sm:$0xf]  ;;  %v9955_v41 = vld [vmem:[#allocation13 + $0x15c] sm:$0xf] }
 0x2a3   :  { %5886 = vmatpush.bf16.msra.mxu2 %v7890_v62  ;;  %5857 = vmatpush.bf16.msra.mxu0 %v9258_v47  ;;  %v8085_v62 = vld [vmem:[#allocation13 + $0x238] sm:$0xf]  ;;  %v9121_v47 = vld [vmem:[#allocation13 + $0xa50] sm:$0xf]  ;;  %v10210_v57 = vld [vmem:[#allocation13 + $0x950] sm:$0xf0] }
 0x2a4   :  { %v8086_v14 = vor.u32 %v9986_v2, %v8085_v62  ;;  %v2793_v0 = vmul.f32 0.2, %v2766_v8  ;;  %vm2777_vm11 = vcmp.gt.f32.partialorder %v2766_v8, 0.0  ;;  %v9122_v50 = vor.u32 %v10245_v44, %v9121_v47  ;;  %v10339_v62 = vld [vmem:[#allocation13 + $0xd5c] sm:$0xf] }
 0x2a5   :  { %v8393_v2 = vld [vmem:[#allocation13 + $0x4a0] sm:$0xf]  ;;  %v9510_v52 = vor.u32 %v10339_v62, %v9507_v3  ;;  %v10318_v44 = vld [vmem:[#allocation13 + $0xcb4] sm:$0xf]  ;;  %v9948_v49 = vld [vmem:[#allocation13 + $0x124] sm:$0xf] }
 0x2a6   :  { %5806 = vmatmul.bf16.vlgmr.msrb.gmra.mxu0 %v10903_v20  ;;  %5901 = vmatpush.bf16.msra.mxu3 %v8086_v14  ;;  %v2809_v38 = vsel %vm2777_vm11, %v2766_v8, %v2793_v0  ;;  %v10147_v14 = vld [vmem:[#allocation13 + $0x758] sm:$0xf0]  ;;  %v9395_v56 = vld [vmem:[#allocation13 + $0xc94] sm:$0xf0]  ;;  %v8953_v62 = vld [vmem:[#allocation13 + $0x900] sm:$0xf] }
 0x2a7   :  { %5887 = vmatpush.bf16.msra.mxu2 %v7862_v16  ;;  %5858 = vmatpush.bf16.msra.mxu0 %v9230_v54  ;;  %v8057_v16 = vld [vmem:[#allocation13 + $0x200] sm:$0xf]  ;;  %v2753_v18 = vpop.f32.mrf.mxu0  ;;  %v8757_v54 = vld [vmem:[#allocation13 + $0x778] sm:$0xf]  ;;  %v10231_v8 = vld [vmem:[#allocation13 + $0x9f8] sm:$0xf0] }
 0x2a8   :  { %v2754_v42 = vadd.f32 %v2753_v18, %v2740_v9  ;;  %v8058_v5 = vor.u32 %v9979_v7, %v8057_v16  ;;  %v8758_v58 = vor.u32 %v10154_v13, %v8757_v54  ;;  %v8394_v9 = vor.u32 %v10063_v63, %v8393_v2  ;;  %v9479_v7 = vld [vmem:[#allocation13 + $0xd3c] sm:$0xf0]  ;;  %v8365_v18 = vld [vmem:[#allocation13 + $0x468] sm:$0xf]  ;;  %v10311_v13 = vld [vmem:[#allocation13 + $0xc7c] sm:$0xf] }
 0x2a9   :  { %v9066_v23 = vor.u32 %v10231_v8, %v9065_v19  ;;  %v10203_v2 = vld [vmem:[#allocation13 + $0x918] sm:$0xf0]  ;;  %v9941_v63 = vld [vmem:[#allocation13 + $0xec] sm:$0xf]  ;;  %v9398_v3 = vor.u32 %v10311_v13, %v9395_v56  ;;  %v9367_v19 = vld [vmem:[#allocation13 + $0xc5c] sm:$0xf0] }
 0x2aa   :  { %v2768_v51 = vadd.f32 %v2767_v27, %v2754_v42  ;;  %5902 = vmatpush.bf16.msra.mxu3 %v8058_v5  ;;  %v8701_v42 = vld [vmem:[#allocation13 + $0x708] sm:$0xf]  ;;  %v9962_v5 = vld [vmem:[#allocation13 + $0x194] sm:$0xf] }
 0x2ab   :  { %5888 = vmatpush.bf16.msra.mxu2 %v7834_v10  ;;  %5859 = vmatpush.bf16.msra.mxu0 %v9202_v4  ;;  %v8029_v10 = vld [vmem:[#allocation13 + $0x1c8] sm:$0xf]  ;;  %v8729_v4 = vld [vmem:[#allocation13 + $0x740] sm:$0xf]  ;;  %v8702_v0 = vor.u32 %v10140_v26, %v8701_v42  ;;  %v8006_v31 = vor.u32 %v9962_v5, %v8003_v34  ;;  %v10301_v42 = vld [vmem:[#allocation13 + $0xc28] sm:$0xf0] }
 0x2ac   :  { %vm2785_vm12 = vcmp.gt.f32.partialorder %v2768_v51, 0.0  ;;  %v2801_v39 = vmul.f32 0.2, %v2768_v51  ;;  %v8730_v16 = vor.u32 %v10147_v14, %v8729_v4  ;;  %v9037_v27 = vld [vmem:[#allocation13 + $0x9a8] sm:$0xf] }
 0x2ad   :  { %v10304_v14 = vld [vmem:[#allocation13 + $0xc44] sm:$0xf]  ;;  %v8253_v8 = vld [vmem:[#allocation13 + $0x388] sm:$0xf]  ;;  %v9934_v26 = vld [vmem:[#allocation13 + $0xb4] sm:$0xf] }
 0x2ae   :  { %v2817_v40 = vsel %vm2785_vm12, %v2768_v51, %v2801_v39  ;;  %v10325_v51 = vld [vmem:[#allocation13 + $0xcec] sm:$0xf]  ;;  %v10018_v34 = vld [vmem:[#allocation13 + $0x354] sm:$0xf]  ;;  %v8589_v13 = vld [vmem:[#allocation13 + $0x628] sm:$0xf] }
 0x2af   :  { %5889 = vmatpush.bf16.msra.mxu2 %v7806_v43  ;;  %5860 = vmatpush.bf16.msra.mxu0 %v9174_v21  ;;  %v8030_v43 = vor.u32 %v9972_v28, %v8029_v10  ;;  %v10927_v30 = vpack.c.bf16 %v2817_v40, %v2809_v38  ;;  %v10224_v21 = vld [vmem:[#allocation13 + $0x9c0] sm:$0xf0]  ;;  %v8366_v10 = vor.u32 %v10056_v22, %v8365_v18  ;;  %v10217_v39 = vld [vmem:[#allocation13 + $0x988] sm:$0xf0]  ;;  %v9423_v38 = vld [vmem:[#allocation13 + $0xccc] sm:$0xf0] }
 0x2b0   :  { %v9038_v29 = vor.u32 %v10224_v21, %v9037_v27  ;;  %v9010_v40 = vor.u32 %v10217_v39, %v9009_v36  ;;  %v8673_v18 = vld [vmem:[#allocation13 + $0x6d0] sm:$0xf]  ;;  %v10133_v22 = vld [vmem:[#allocation13 + $0x6e8] sm:$0xf0]  ;;  %v9370_v21 = vor.u32 %v10304_v14, %v9367_v19  ;;  %v10294_v36 = vld [vmem:[#allocation13 + $0xbf0] sm:$0xf0] }
 0x2b1   :  { %5903 = vmatpush.bf16.msra.mxu3 %v8030_v43  ;;  %5764 = vmatmul.bf16.vlgmr.msra.gmra.mxu1 %v10927_v30  ;;  %v7891_v27 = vld [vmem:[#allocation13 + $0xcc] sm:$0xf0]  ;;  %v9927_v39 = vld [vmem:[#allocation13 + $0x7c] sm:$0xf] }
 0x2b2   :  { %5890 = vmatmul.bf16.vlgmr.msra.gmra.mxu2 %v10890_v24  ;;  %5868 = vmatpush.bf16.msra.mxu1 %v9566_v48  ;;  %v8309_v48 = vld [vmem:[#allocation13 + $0x3f8] sm:$0xf]  ;;  %v8899_v14 = vld [vmem:[#allocation13 + $0x8ac] sm:$0xf0] }
 0x2b3   :  { %5938 = vmatpush.bf16.msrb.mxu2 %v8898_v46  ;;  %v8450_v46 = vor.u32 %v10077_v35, %v8449_v32  ;;  %5861 = vmatpush.bf16.msra.mxu0 %v9146_v25  ;;  %v8337_v32 = vld [vmem:[#allocation13 + $0x430] sm:$0xf]  ;;  %v10049_v35 = vld [vmem:[#allocation13 + $0x448] sm:$0xf0]  ;;  %v7975_v25 = vld [vmem:[#allocation13 + $0x174] sm:$0xf0] }
 0x2b4   :  { %5904 = vmatmul.bf16.vlgmr.msra.gmra.mxu3 %v10878_v60  ;;  %v8338_v47 = vor.u32 %v10049_v35, %v8337_v32  ;;  %v9317_v32 = vld [vmem:[#allocation13 + $0xbd8] sm:$0xf] }
 0x2b5   :  { %5952 = vmatpush.bf16.msrb.mxu3 %v9122_v50  ;;  %v7947_v50 = vld [vmem:[#allocation13 + $0x13c] sm:$0xf0] }
 0x2b6   :  { %5862 = vmatmul.bf16.vlgmr.msra.gmra.mxu0 %v10920_v45 }
 0x2b7   :  { %5939 = vmatpush.bf16.msrb.mxu2 %v8870_v15  ;;  %5910 = vmatpush.bf16.msrb.mxu0 %v8450_v46  ;;  %v9538_v15 = vor.u32 %v10346_v59, %v9535_v53  ;;  %v7978_v46 = vor.u32 %v9955_v41, %v7975_v25  ;;  %v8981_v59 = vld [vmem:[#allocation13 + $0x938] sm:$0xf]  ;;  %v9426_v53 = vor.u32 %v10318_v44, %v9423_v38  ;;  %v10011_v25 = vld [vmem:[#allocation13 + $0x31c] sm:$0xf] }
 0x2b8   :  { %v8982_v6 = vor.u32 %v10210_v57, %v8981_v59  ;;  %v7863_v41 = vld [vmem:[#allocation13 + $0x94] sm:$0xf0]  ;;  %v9318_v44 = vor.u32 %v10294_v36, %v9317_v32  ;;  %v10287_v59 = vld [vmem:[#allocation13 + $0xbb8] sm:$0xf0]  ;;  %v9920_v57 = vld [vmem:[#allocation13 + $0x44] sm:$0xf] }
 0x2b9   :  { %5869 = vmatpush.bf16.msra.mxu1 %v9538_v15  ;;  %5953 = vmatpush.bf16.msrb.mxu3 %v9094_v1  ;;  %v8281_v15 = vld [vmem:[#allocation13 + $0x3c0] sm:$0xf]  ;;  %v7919_v1 = vld [vmem:[#allocation13 + $0x104] sm:$0xf0]  ;;  %v7866_v38 = vor.u32 %v9927_v39, %v7863_v41  ;;  %v10172_v32 = vld [vmem:[#allocation13 + $0x824] sm:$0xf] }
 0x2ba   :  { %v8505_v41 = vld [vmem:[#allocation13 + $0x580] sm:$0xf] }
 0x2bb   :  { %5940 = vmatpush.bf16.msrb.mxu2 %v8842_v12  ;;  %5911 = vmatpush.bf16.msrb.mxu0 %v8422_v55  ;;  %v10332_v12 = vld [vmem:[#allocation13 + $0xd24] sm:$0xf]  ;;  %v7950_v55 = vor.u32 %v9948_v49, %v7947_v50  ;;  %v7835_v49 = vld [vmem:[#allocation13 + $0x5c] sm:$0xf0] }
 0x2bc   :  { %v9482_v28 = vor.u32 %v10332_v12, %v9479_v7  ;;  %v7922_v12 = vor.u32 %v9941_v63, %v7919_v1  ;;  %v10196_v7 = vld [vmem:[#allocation13 + $0x8e0] sm:$0xf0]  ;;  %v7807_v63 = vld [vmem:[#allocation13 + $0x24] sm:$0xf0]  ;;  %v9997_v1 = vld [vmem:[#allocation13 + $0x2ac] sm:$0xf] }
 0x2bd   :  { %5870 = vmatpush.bf16.msra.mxu1 %v9510_v52  ;;  %5954 = vmatpush.bf16.msrb.mxu3 %v9066_v23  ;;  %v10028_v52 = vld [vmem:[#allocation13 + $0x3a0] sm:$0xf0]  ;;  %v9345_v23 = vld [vmem:[#allocation13 + $0xc10] sm:$0xf] }
 0x2be   :  { %v8254_v5 = vor.u32 %v10028_v52, %v8253_v8  ;;  %v10004_v50 = vld [vmem:[#allocation13 + $0x2e4] sm:$0xf]  ;;  %v10105_v52 = vld [vmem:[#allocation13 + $0x608] sm:$0xf0] }
 0x2bf   :  { %5941 = vmatpush.bf16.msrb.mxu2 %v8814_v33  ;;  %5912 = vmatpush.bf16.msrb.mxu0 %v8394_v9  ;;  %v9451_v33 = vld [vmem:[#allocation13 + $0xd04] sm:$0xf0]  ;;  %v8954_v9 = vor.u32 %v10203_v2, %v8953_v62  ;;  %v9913_v2 = vld [vmem:[#allocation13 + $0xc] sm:$0xf] }
 0x2c0   :  { %v9454_v43 = vor.u32 %v10325_v51, %v9451_v33  ;;  %v9346_v51 = vor.u32 %v10301_v42, %v9345_v23  ;;  %v7894_v33 = vor.u32 %v9934_v26, %v7891_v27  ;;  %v9990_v23 = vld [vmem:[#allocation13 + $0x274] sm:$0xf]  ;;  %v8115_v42 = vld [vmem:[#allocation13 + $0x28c] sm:$0xf0]  ;;  %v10179_v26 = vld [vmem:[#allocation13 + $0x85c] sm:$0xf] }
 0x2c1   :  { %5871 = vmatpush.bf16.msra.mxu1 %v9482_v28  ;;  %5955 = vmatpush.bf16.msrb.mxu3 %v9038_v29  ;;  %v8645_v29 = vld [vmem:[#allocation13 + $0x698] sm:$0xf] }
 0x2c2   :  { %5820 = vmatmul.bf16.vlgmr.msrb.gmra.mxu1 %v10899_v61  ;;  %v8871_v27 = vld [vmem:[#allocation13 + $0x874] sm:$0xf0] }
 0x2c3   :  { %5942 = vmatpush.bf16.msrb.mxu2 %v8786_v37  ;;  %5913 = vmatpush.bf16.msrb.mxu0 %v8366_v10  ;;  %v10042_v37 = vld [vmem:[#allocation13 + $0x410] sm:$0xf0]  ;;  %v8227_v10 = vld [vmem:[#allocation13 + $0x36c] sm:$0xf0] }
 0x2c4   :  { %v8310_v54 = vor.u32 %v10042_v37, %v8309_v48  ;;  %v8230_v35 = vor.u32 %v10018_v34, %v8227_v10  ;;  %v9289_v48 = vld [vmem:[#allocation13 + $0xba0] sm:$0xf]  ;;  %v8533_v34 = vld [vmem:[#allocation13 + $0x5b8] sm:$0xf]  ;;  %v10098_v10 = vld [vmem:[#allocation13 + $0x5d0] sm:$0xf0] }
 0x2c5   :  { %5872 = vmatpush.bf16.msra.mxu1 %v9454_v43  ;;  %5956 = vmatpush.bf16.msrb.mxu3 %v9010_v40  ;;  %v8199_v43 = vld [vmem:[#allocation13 + $0x334] sm:$0xf0]  ;;  %v8617_v40 = vld [vmem:[#allocation13 + $0x660] sm:$0xf]  ;;  %v9290_v56 = vor.u32 %v10287_v59, %v9289_v48  ;;  %v8534_v36 = vor.u32 %v10098_v10, %v8533_v34  ;;  %v10165_v48 = vld [vmem:[#allocation13 + $0x7ec] sm:$0xf] }
 0x2c6   :  { %v8202_v37 = vor.u32 %v10011_v25, %v8199_v43  ;;  %v10091_v25 = vld [vmem:[#allocation13 + $0x598] sm:$0xf0]  ;;  %v9513_v10 = vld [vmem:[#allocation13 + $0xd60] sm:$0xf] }
 0x2c7   :  { %5943 = vmatpush.bf16.msrb.mxu2 %v8758_v58  ;;  %5914 = vmatpush.bf16.msrb.mxu0 %v8338_v47  ;;  %v10035_v58 = vld [vmem:[#allocation13 + $0x3d8] sm:$0xf0]  ;;  %v8506_v59 = vor.u32 %v10091_v25, %v8505_v41  ;;  %v9485_v25 = vld [vmem:[#allocation13 + $0xd28] sm:$0xf] }
 0x2c8   :  { %v8282_v4 = vor.u32 %v10035_v58, %v8281_v15  ;;  %v9261_v15 = vld [vmem:[#allocation13 + $0xb68] sm:$0xf]  ;;  %v10280_v58 = vld [vmem:[#allocation13 + $0xb80] sm:$0xf0] }
 0x2c9   :  { %5873 = vmatpush.bf16.msra.mxu1 %v9426_v53  ;;  %5957 = vmatpush.bf16.msrb.mxu3 %v8982_v6  ;;  %v8171_v53 = vld [vmem:[#allocation13 + $0x2fc] sm:$0xf0]  ;;  %v7838_v6 = vor.u32 %v9920_v57, %v7835_v49  ;;  %v9262_v8 = vor.u32 %v10280_v58, %v9261_v15  ;;  %v8477_v57 = vld [vmem:[#allocation13 + $0x548] sm:$0xf]  ;;  %v10084_v49 = vld [vmem:[#allocation13 + $0x560] sm:$0xf0] }
 0x2ca   :  { %v8174_v62 = vor.u32 %v10004_v50, %v8171_v53  ;;  %v9149_v53 = vld [vmem:[#allocation13 + $0xa88] sm:$0xf]  ;;  %v9569_v15 = vld [vmem:[#allocation13 + $0xdd0] sm:$0xf]  ;;  %v10357_v58 = vld [vmem:[#allocation13 + $0xde8] sm:$0xf0] }
 0x2cb   :  { %5944 = vmatpush.bf16.msrb.mxu2 %v8730_v16  ;;  %5915 = vmatpush.bf16.msrb.mxu0 %v8310_v54  ;;  %v8925_v16 = vld [vmem:[#allocation13 + $0x8c8] sm:$0xf] }
 0x2cc   :  { %v8926_v28 = vor.u32 %v10196_v7, %v8925_v16 }
 0x2cd   :  { %5874 = vmatpush.bf16.msra.mxu1 %v9398_v3  ;;  %5958 = vmatpush.bf16.msrb.mxu3 %v8954_v9  ;;  %v8143_v3 = vld [vmem:[#allocation13 + $0x2c4] sm:$0xf0]  ;;  %v7810_v9 = vor.u32 %v9913_v2, %v7807_v63  ;;  %v8451_v2 = vld [vmem:[#allocation13 + $0x52c] sm:$0xf0]  ;;  %v10158_v63 = vld [vmem:[#allocation13 + $0x7b4] sm:$0xf] }
 0x2ce   :  { %v8146_v16 = vor.u32 %v9997_v1, %v8143_v3  ;;  %v8478_v1 = vor.u32 %v10084_v49, %v8477_v57  ;;  %v8787_v3 = vld [vmem:[#allocation13 + $0x7cc] sm:$0xf0]  ;;  %v8009_v49 = vld [vmem:[#allocation13 + $0x198] sm:$0xf] }
 0x2cf   :  { %5945 = vmatpush.bf16.msrb.mxu2 %v8702_v0  ;;  %5916 = vmatpush.bf16.msrb.mxu0 %v8282_v4  ;;  %v8674_v0 = vor.u32 %v10133_v22, %v8673_v18  ;;  %v10186_v4 = vld [vmem:[#allocation13 + $0x894] sm:$0xf]  ;;  %v9233_v18 = vld [vmem:[#allocation13 + $0xb30] sm:$0xf]  ;;  %v10273_v22 = vld [vmem:[#allocation13 + $0xb48] sm:$0xf0] }
 0x2d0   :  { %v8902_v7 = vor.u32 %v10186_v4, %v8899_v14  ;;  %v10242_v4 = vld [vmem:[#allocation13 + $0xa54] sm:$0xf]  ;;  %v9123_v14 = vld [vmem:[#allocation13 + $0xa6c] sm:$0xf0] }
 0x2d1   :  { %5875 = vmatpush.bf16.msra.mxu1 %v9370_v21  ;;  %5959 = vmatpush.bf16.msrb.mxu3 %v8926_v28  ;;  %v8118_v28 = vor.u32 %v9990_v23, %v8115_v42  ;;  %v8423_v23 = vld [vmem:[#allocation13 + $0x4f4] sm:$0xf0]  ;;  %v10151_v42 = vld [vmem:[#allocation13 + $0x77c] sm:$0xf] }
 0x2d2   :  { %5946 = vmatmul.bf16.vlgmr.msrb.gmra.mxu2 %v10907_v17 }
 0x2d3   :  { %5994 = vmatpush.bf16.msra.mxu2 %v8006_v31  ;;  %v10126_v31 = vld [vmem:[#allocation13 + $0x6b0] sm:$0xf0]  ;;  %5917 = vmatpush.bf16.msrb.mxu0 %v8254_v5  ;;  %v9234_v5 = vor.u32 %v10273_v22, %v9233_v18  ;;  %v9126_v18 = vor.u32 %v10242_v4, %v9123_v14  ;;  %v10067_v22 = vld [vmem:[#allocation13 + $0x4dc] sm:$0xf]  ;;  %v9429_v14 = vld [vmem:[#allocation13 + $0xcb8] sm:$0xf] }
 0x2d4   :  { %v8646_v47 = vor.u32 %v10126_v31, %v8645_v29  ;;  %5960 = vmatmul.bf16.vlgmr.msrb.gmra.mxu3 %v10912_v11  ;;  %5876 = vmatmul.bf16.vlgmr.msra.gmra.mxu1 %v10927_v30  ;;  %v9983_v29 = vld [vmem:[#allocation13 + $0x23c] sm:$0xf]  ;;  %v8087_v31 = vld [vmem:[#allocation13 + $0x254] sm:$0xf0]  ;;  %v8426_v34 = vor.u32 %v10067_v22, %v8423_v23  ;;  %v7953_v22 = vld [vmem:[#allocation13 + $0x128] sm:$0xf] }
 0x2d5   :  { %5924 = vmatpush.bf16.msrb.mxu1 %v8674_v0  ;;  %6008 = vmatpush.bf16.msra.mxu3 %v8230_v35  ;;  %v8874_v0 = vor.u32 %v10179_v26, %v8871_v27  ;;  %v8843_v35 = vld [vmem:[#allocation13 + $0x83c] sm:$0xf0]  ;;  %v8090_v43 = vor.u32 %v9983_v29, %v8087_v31  ;;  %v8759_v26 = vld [vmem:[#allocation13 + $0x794] sm:$0xf0]  ;;  %v10235_v27 = vld [vmem:[#allocation13 + $0xa1c] sm:$0xf] }
 0x2d6   :  { %5918 = vmatmul.bf16.vlgmr.msrb.gmra.mxu0 %v10903_v20  ;;  %v8395_v29 = vld [vmem:[#allocation13 + $0x4bc] sm:$0xf0]  ;;  %v10144_v31 = vld [vmem:[#allocation13 + $0x744] sm:$0xf] }
 0x2d7   :  { %5995 = vmatpush.bf16.msra.mxu2 %v7978_v46  ;;  %5966 = vmatpush.bf16.msra.mxu0 %v9346_v51  ;;  %v10119_v46 = vld [vmem:[#allocation13 + $0x678] sm:$0xf0]  ;;  %v9205_v51 = vld [vmem:[#allocation13 + $0xaf8] sm:$0xf]  ;;  %v9952_v23 = vld [vmem:[#allocation13 + $0x140] sm:$0xf0] }
 0x2d8   :  { %v8618_v54 = vor.u32 %v10119_v46, %v8617_v40  ;;  %v9976_v40 = vld [vmem:[#allocation13 + $0x204] sm:$0xf]  ;;  %v8059_v46 = vld [vmem:[#allocation13 + $0x21c] sm:$0xf0] }
 0x2d9   :  { %5925 = vmatpush.bf16.msrb.mxu1 %v8646_v47  ;;  %6009 = vmatpush.bf16.msra.mxu3 %v8202_v37  ;;  %v8846_v47 = vor.u32 %v10172_v32, %v8843_v35  ;;  %v8815_v37 = vld [vmem:[#allocation13 + $0x804] sm:$0xf0]  ;;  %v8731_v32 = vld [vmem:[#allocation13 + $0x75c] sm:$0xf0]  ;;  %v10228_v35 = vld [vmem:[#allocation13 + $0x9e4] sm:$0xf] }
 0x2db   :  { %5996 = vmatpush.bf16.msra.mxu2 %v7950_v55  ;;  %5967 = vmatpush.bf16.msra.mxu0 %v9318_v44  ;;  %v10112_v55 = vld [vmem:[#allocation13 + $0x640] sm:$0xf0]  ;;  %v9177_v44 = vld [vmem:[#allocation13 + $0xac0] sm:$0xf] }
 0x2dc   :  { %v8590_v19 = vor.u32 %v10112_v55, %v8589_v13  ;;  %v9969_v13 = vld [vmem:[#allocation13 + $0x1cc] sm:$0xf]  ;;  %v8031_v55 = vld [vmem:[#allocation13 + $0x1e4] sm:$0xf0] }
 0x2dd   :  { %5926 = vmatpush.bf16.msrb.mxu1 %v8618_v54  ;;  %6010 = vmatpush.bf16.msra.mxu3 %v8174_v62  ;;  %v10252_v54 = vld [vmem:[#allocation13 + $0xaa0] sm:$0xf0]  ;;  %v10074_v62 = vld [vmem:[#allocation13 + $0x514] sm:$0xf] }
 0x2df   :  { %5997 = vmatpush.bf16.msra.mxu2 %v7922_v12  ;;  %5968 = vmatpush.bf16.msra.mxu0 %v9290_v56  ;;  %v8561_v12 = vld [vmem:[#allocation13 + $0x5f0] sm:$0xf]  ;;  %v8062_v56 = vor.u32 %v9976_v40, %v8059_v46  ;;  %v8367_v40 = vld [vmem:[#allocation13 + $0x484] sm:$0xf0]  ;;  %v10137_v46 = vld [vmem:[#allocation13 + $0x70c] sm:$0xf] }
 0x2e0   :  { %v8562_v21 = vor.u32 %v10105_v52, %v8561_v12  ;;  %v8454_v12 = vor.u32 %v10074_v62, %v8451_v2  ;;  %v9541_v52 = vld [vmem:[#allocation13 + $0xd98] sm:$0xf]  ;;  %v10214_v62 = vld [vmem:[#allocation13 + $0x974] sm:$0xf]  ;;  %v9011_v2 = vld [vmem:[#allocation13 + $0x98c] sm:$0xf0] }
 0x2e1   :  { %5927 = vmatpush.bf16.msrb.mxu1 %v8590_v19  ;;  %6011 = vmatpush.bf16.msra.mxu3 %v8146_v16  ;;  %v9150_v19 = vor.u32 %v10252_v54, %v9149_v53  ;;  %v10350_v16 = vld [vmem:[#allocation13 + $0xdb0] sm:$0xf0]  ;;  %v9457_v54 = vld [vmem:[#allocation13 + $0xcf0] sm:$0xf] }
 0x2e3   :  { %5998 = vmatpush.bf16.msra.mxu2 %v7894_v33  ;;  %5969 = vmatpush.bf16.msra.mxu0 %v9262_v8  ;;  %v10266_v33 = vld [vmem:[#allocation13 + $0xb10] sm:$0xf0]  ;;  %v9570_v8 = vor.u32 %v10357_v58, %v9569_v15  ;;  %v8339_v15 = vld [vmem:[#allocation13 + $0x44c] sm:$0xf0] }
 0x2e4   :  { %v9206_v39 = vor.u32 %v10266_v33, %v9205_v51  ;;  %v10060_v33 = vld [vmem:[#allocation13 + $0x4a4] sm:$0xf] }
 0x2e5   :  { %5928 = vmatpush.bf16.msrb.mxu1 %v8562_v21  ;;  %6012 = vmatpush.bf16.msra.mxu3 %v8118_v28  ;;  %v9095_v21 = vld [vmem:[#allocation13 + $0xa34] sm:$0xf0]  ;;  %v10343_v28 = vld [vmem:[#allocation13 + $0xd78] sm:$0xf0]  ;;  %v8398_v41 = vor.u32 %v10060_v33, %v8395_v29  ;;  %v9945_v29 = vld [vmem:[#allocation13 + $0x108] sm:$0xf0] }
 0x2e6   :  { %v9098_v51 = vor.u32 %v10235_v27, %v9095_v21  ;;  %v10315_v27 = vld [vmem:[#allocation13 + $0xc98] sm:$0xf0] }
 0x2e7   :  { %5999 = vmatpush.bf16.msra.mxu2 %v7866_v38  ;;  %5970 = vmatpush.bf16.msra.mxu0 %v9234_v5  ;;  %v10259_v38 = vld [vmem:[#allocation13 + $0xad8] sm:$0xf0]  ;;  %v9542_v5 = vor.u32 %v10350_v16, %v9541_v52 }
 0x2e8   :  { %v9178_v50 = vor.u32 %v10259_v38, %v9177_v44  ;;  %v10053_v38 = vld [vmem:[#allocation13 + $0x46c] sm:$0xf]  ;;  %v10207_v16 = vld [vmem:[#allocation13 + $0x93c] sm:$0xf] }
 0x2e9   :  { %5929 = vmatpush.bf16.msrb.mxu1 %v8534_v36  ;;  %6013 = vmatpush.bf16.msra.mxu3 %v8090_v43  ;;  %v9067_v36 = vld [vmem:[#allocation13 + $0x9fc] sm:$0xf0]  ;;  %v10336_v43 = vld [vmem:[#allocation13 + $0xd40] sm:$0xf0]  ;;  %v8370_v53 = vor.u32 %v10053_v38, %v8367_v40  ;;  %v10298_v40 = vld [vmem:[#allocation13 + $0xc14] sm:$0xf] }
 0x2ea   :  { %v9070_v44 = vor.u32 %v10228_v35, %v9067_v36  ;;  %v9486_v57 = vor.u32 %v10336_v43, %v9485_v25  ;;  %v10025_v36 = vld [vmem:[#allocation13 + $0x38c] sm:$0xf]  ;;  %v8927_v43 = vld [vmem:[#allocation13 + $0x8e4] sm:$0xf0] }
 0x2eb   :  { %6000 = vmatpush.bf16.msra.mxu2 %v7838_v6  ;;  %5971 = vmatpush.bf16.msra.mxu0 %v9206_v39  ;;  %v8818_v6 = vor.u32 %v10165_v48, %v8815_v37  ;;  %v9514_v39 = vor.u32 %v10343_v28, %v9513_v10  ;;  %v8703_v48 = vld [vmem:[#allocation13 + $0x724] sm:$0xf0]  ;;  %v10221_v37 = vld [vmem:[#allocation13 + $0x9ac] sm:$0xf]  ;;  %v7954_v10 = vor.u32 %v9952_v23, %v7953_v22  ;;  %v10200_v28 = vld [vmem:[#allocation13 + $0x904] sm:$0xf] }
 0x2ec   :  { %v9924_v22 = vld [vmem:[#allocation13 + $0x60] sm:$0xf0]  ;;  %v8177_v23 = vld [vmem:[#allocation13 + $0x2e8] sm:$0xf] }
 0x2ed   :  { %5930 = vmatpush.bf16.msrb.mxu1 %v8506_v59  ;;  %6014 = vmatpush.bf16.msra.mxu3 %v8062_v56  ;;  %v9039_v59 = vld [vmem:[#allocation13 + $0x9c4] sm:$0xf0]  ;;  %v8706_v56 = vor.u32 %v10137_v46, %v8703_v48  ;;  %v9347_v46 = vld [vmem:[#allocation13 + $0xc2c] sm:$0xf0]  ;;  %v7897_v48 = vld [vmem:[#allocation13 + $0xb8] sm:$0xf] }
 0x2ef   :  { %6001 = vmatpush.bf16.msra.mxu2 %v7810_v9  ;;  %5972 = vmatpush.bf16.msra.mxu0 %v9178_v50  ;;  %v8034_v9 = vor.u32 %v9969_v13, %v8031_v55  ;;  %v9966_v50 = vld [vmem:[#allocation13 + $0x1b0] sm:$0xf0]  ;;  %v10329_v13 = vld [vmem:[#allocation13 + $0xd08] sm:$0xf0] }
 0x2f0   :  { %v10046_v55 = vld [vmem:[#allocation13 + $0x434] sm:$0xf]  ;;  %v8010_v58 = vor.u32 %v9966_v50, %v8009_v49 }
 0x2f1   :  { %5931 = vmatpush.bf16.msrb.mxu1 %v8478_v1  ;;  %6015 = vmatpush.bf16.msra.mxu3 %v8034_v9  ;;  %v7981_v1 = vld [vmem:[#allocation13 + $0x160] sm:$0xf]  ;;  %v8342_v4 = vor.u32 %v10046_v55, %v8339_v15  ;;  %v10039_v9 = vld [vmem:[#allocation13 + $0x3fc] sm:$0xf]  ;;  %v10022_v49 = vld [vmem:[#allocation13 + $0x370] sm:$0xf0] }
 0x2f2   :  { %6002 = vmatmul.bf16.vlgmr.msra.gmra.mxu2 %v10890_v24 }
 0x2f3   :  { %6050 = vmatpush.bf16.msrb.mxu2 %v8902_v7  ;;  %v8790_v7 = vor.u32 %v10158_v63, %v8787_v3  ;;  %5973 = vmatpush.bf16.msra.mxu0 %v9150_v19  ;;  %v9458_v63 = vor.u32 %v10329_v13, %v9457_v54  ;;  %v9959_v3 = vld [vmem:[#allocation13 + $0x178] sm:$0xf0]  ;;  %v10322_v19 = vld [vmem:[#allocation13 + $0xcd0] sm:$0xf0]  ;;  %v9350_v13 = vor.u32 %v10298_v40, %v9347_v46  ;;  %v9235_v46 = vld [vmem:[#allocation13 + $0xb4c] sm:$0xf0] }
 0x2f4   :  { %5932 = vmatmul.bf16.vlgmr.msrb.gmra.mxu1 %v10899_v61  ;;  %6016 = vmatmul.bf16.vlgmr.msra.gmra.mxu3 %v10878_v60  ;;  %v7982_v52 = vor.u32 %v9959_v3, %v7981_v1  ;;  %v8205_v1 = vld [vmem:[#allocation13 + $0x320] sm:$0xf]  ;;  %v10015_v3 = vld [vmem:[#allocation13 + $0x338] sm:$0xf0]  ;;  %v10270_v40 = vld [vmem:[#allocation13 + $0xb34] sm:$0xf] }
 0x2f5   :  { %5980 = vmatpush.bf16.msra.mxu1 %v9570_v8  ;;  %6064 = vmatpush.bf16.msrb.mxu3 %v9126_v18  ;;  %v9014_v8 = vor.u32 %v10214_v62, %v9011_v2  ;;  %v9430_v18 = vor.u32 %v10322_v19, %v9429_v14  ;;  %v9319_v62 = vld [vmem:[#allocation13 + $0xbf4] sm:$0xf0]  ;;  %v7869_v2 = vld [vmem:[#allocation13 + $0x80] sm:$0xf]  ;;  %v10116_v19 = vld [vmem:[#allocation13 + $0x664] sm:$0xf] }
 0x2f6   :  { %5974 = vmatmul.bf16.vlgmr.msra.gmra.mxu0 %v10920_v45 }
 0x2f7   :  { %6051 = vmatpush.bf16.msrb.mxu2 %v8874_v0  ;;  %6022 = vmatpush.bf16.msrb.mxu0 %v8454_v12  ;;  %v8762_v0 = vor.u32 %v10151_v42, %v8759_v26  ;;  %v8311_v12 = vld [vmem:[#allocation13 + $0x414] sm:$0xf0]  ;;  %v9401_v26 = vld [vmem:[#allocation13 + $0xc80] sm:$0xf] }
 0x2f8   :  { %v8314_v42 = vor.u32 %v10039_v9, %v8311_v12  ;;  %v9402_v33 = vor.u32 %v10315_v27, %v9401_v26  ;;  %v10942_v9 = vpop.f32.mrf.mxu2  ;;  %v10946_v26 = vpop.f32.mrf.mxu3 }
 0x2f9   :  { %5981 = vmatpush.bf16.msra.mxu1 %v9542_v5  ;;  %6065 = vmatpush.bf16.msrb.mxu3 %v9098_v51  ;;  %v10032_v5 = vld [vmem:[#allocation13 + $0x3c4] sm:$0xf]  ;;  %v7925_v51 = vld [vmem:[#allocation13 + $0xf0] sm:$0xf] }
 0x2fa   :  { %v7926_v38 = vor.u32 %v9945_v29, %v7925_v51  ;;  %v9263_v51 = vld [vmem:[#allocation13 + $0xb84] sm:$0xf0]  ;;  %v9917_v29 = vld [vmem:[#allocation13 + $0x28] sm:$0xf0] }
 0x2fb   :  { %6052 = vmatpush.bf16.msrb.mxu2 %v8846_v47  ;;  %6023 = vmatpush.bf16.msrb.mxu0 %v8426_v34  ;;  %v8734_v47 = vor.u32 %v10144_v31, %v8731_v32  ;;  %v8283_v34 = vld [vmem:[#allocation13 + $0x3dc] sm:$0xf0]  ;;  %v9373_v31 = vld [vmem:[#allocation13 + $0xc48] sm:$0xf]  ;;  %v10308_v32 = vld [vmem:[#allocation13 + $0xc60] sm:$0xf0] }
 0x2fc   :  { %v8286_v35 = vor.u32 %v10032_v5, %v8283_v34  ;;  %v10109_v5 = vld [vmem:[#allocation13 + $0x62c] sm:$0xf]  ;;  %v8591_v34 = vld [vmem:[#allocation13 + $0x644] sm:$0xf0] }
 0x2fd   :  { %5982 = vmatpush.bf16.msra.mxu1 %v9514_v39  ;;  %6066 = vmatpush.bf16.msrb.mxu3 %v9070_v44  ;;  %v8255_v39 = vld [vmem:[#allocation13 + $0x3a4] sm:$0xf0]  ;;  %v8675_v44 = vld [vmem:[#allocation13 + $0x6ec] sm:$0xf0] }
 0x2fe   :  { %v8258_v50 = vor.u32 %v10025_v36, %v8255_v39  ;;  %v8594_v36 = vor.u32 %v10109_v5, %v8591_v34  ;;  %v8905_v39 = vld [vmem:[#allocation13 + $0x898] sm:$0xf]  ;;  %v8821_v5 = vld [vmem:[#allocation13 + $0x7f0] sm:$0xf] }
 0x2ff   :  { %6053 = vmatpush.bf16.msrb.mxu2 %v8818_v6  ;;  %6024 = vmatpush.bf16.msrb.mxu0 %v8398_v41  ;;  %v9042_v6 = vor.u32 %v10221_v37, %v9039_v59  ;;  %v10193_v41 = vld [vmem:[#allocation13 + $0x8cc] sm:$0xf]  ;;  %v9374_v37 = vor.u32 %v10308_v32, %v9373_v31  ;;  %v9938_v59 = vld [vmem:[#allocation13 + $0xd0] sm:$0xf0]  ;;  %v8149_v31 = vld [vmem:[#allocation13 + $0x2b0] sm:$0xf] }
 0x300   :  { %v8930_v54 = vor.u32 %v10193_v41, %v8927_v43  ;;  %v7898_v55 = vor.u32 %v9938_v59, %v7897_v48  ;;  %v10001_v32 = vld [vmem:[#allocation13 + $0x2c8] sm:$0xf0]  ;;  %v10190_v41 = vld [vmem:[#allocation13 + $0x8b0] sm:$0xf0] }
 0x301   :  { %5983 = vmatpush.bf16.msra.mxu1 %v9486_v57  ;;  %6067 = vmatpush.bf16.msrb.mxu3 %v9042_v6  ;;  %v8233_v57 = vld [vmem:[#allocation13 + $0x358] sm:$0xf]  ;;  %v10102_v43 = vld [vmem:[#allocation13 + $0x5f4] sm:$0xf]  ;;  %v8906_v48 = vor.u32 %v10190_v41, %v8905_v39 }
 0x302   :  { %v8647_v6 = vld [vmem:[#allocation13 + $0x6b4] sm:$0xf0]  ;;  %v8234_v15 = vor.u32 %v10022_v49, %v8233_v57  ;;  %v9994_v59 = vld [vmem:[#allocation13 + $0x290] sm:$0xf0]  ;;  %v10951_v57 = vpop.f32.mrf.mxu2 }
 0x303   :  { %6054 = vmatpush.bf16.msrb.mxu2 %v8790_v7  ;;  %6025 = vmatpush.bf16.msrb.mxu0 %v8370_v53  ;;  %v8983_v7 = vld [vmem:[#allocation13 + $0x954] sm:$0xf0] }
 0x304   :  { %v8986_v21 = vor.u32 %v10207_v16, %v8983_v7  ;;  %v10284_v16 = vld [vmem:[#allocation13 + $0xba4] sm:$0xf]  ;;  %v9291_v7 = vld [vmem:[#allocation13 + $0xbbc] sm:$0xf0] }
 0x305   :  { %5984 = vmatpush.bf16.msra.mxu1 %v9458_v63  ;;  %6068 = vmatpush.bf16.msrb.mxu3 %v9014_v8  ;;  %v9931_v63 = vld [vmem:[#allocation13 + $0x98] sm:$0xf0]  ;;  %v8619_v8 = vld [vmem:[#allocation13 + $0x67c] sm:$0xf0] }
 0x306   :  { %v7870_v12 = vor.u32 %v9931_v63, %v7869_v2  ;;  %v8622_v27 = vor.u32 %v10116_v19, %v8619_v8  ;;  %v8093_v63 = vld [vmem:[#allocation13 + $0x240] sm:$0xf]  ;;  %v10176_v19 = vld [vmem:[#allocation13 + $0x840] sm:$0xf0] }
 0x307   :  { %6055 = vmatpush.bf16.msrb.mxu2 %v8762_v0  ;;  %6026 = vmatpush.bf16.msrb.mxu0 %v8342_v4  ;;  %v8955_v0 = vld [vmem:[#allocation13 + $0x91c] sm:$0xf0] }
 0x308   :  { %v8958_v25 = vor.u32 %v10200_v28, %v8955_v0  ;;  %v10277_v0 = vld [vmem:[#allocation13 + $0xb6c] sm:$0xf] }
 0x309   :  { %5985 = vmatpush.bf16.msra.mxu1 %v9430_v18  ;;  %6069 = vmatpush.bf16.msrb.mxu3 %v8986_v21  ;;  %v7841_v18 = vld [vmem:[#allocation13 + $0x48] sm:$0xf]  ;;  %v9294_v21 = vor.u32 %v10284_v16, %v9291_v7 }
 0x30b   :  { %6056 = vmatpush.bf16.msrb.mxu2 %v8734_v47  ;;  %6027 = vmatpush.bf16.msrb.mxu0 %v8314_v42  ;;  %v10130_v47 = vld [vmem:[#allocation13 + $0x6d4] sm:$0xf]  ;;  %v10008_v42 = vld [vmem:[#allocation13 + $0x300] sm:$0xf0] }
 0x30c   :  { %v8678_v53 = vor.u32 %v10130_v47, %v8675_v44  ;;  %v8178_v28 = vor.u32 %v10008_v42, %v8177_v23  ;;  %v8563_v47 = vld [vmem:[#allocation13 + $0x60c] sm:$0xf0]  ;;  %v5709_v23 = vpop.f32.mrf.mxu1 }
 0x30d   :  { %5986 = vmatpush.bf16.msra.mxu1 %v9402_v33  ;;  %6070 = vmatpush.bf16.msrb.mxu3 %v8958_v25  ;;  %v7813_v33 = vld [vmem:[#allocation13 + $0x10] sm:$0xf]  ;;  %v9266_v25 = vor.u32 %v10277_v0, %v9263_v51  ;;  %v8566_v49 = vor.u32 %v10102_v43, %v8563_v47  ;;  %v10169_v0 = vld [vmem:[#allocation13 + $0x808] sm:$0xf0]  ;;  %v10354_v43 = vld [vmem:[#allocation13 + $0xdd4] sm:$0xf] }
 0x30e   :  { %v7814_v44 = vor.u32 %v9917_v29, %v7813_v33  ;;  %v10081_v51 = vld [vmem:[#allocation13 + $0x54c] sm:$0xf]  ;;  %v8479_v33 = vld [vmem:[#allocation13 + $0x564] sm:$0xf0]  ;;  %v9571_v47 = vld [vmem:[#allocation13 + $0xdec] sm:$0xf0] }
 0x30f   :  { %6057 = vmatpush.bf16.msrb.mxu2 %v8706_v56  ;;  %6028 = vmatpush.bf16.msrb.mxu0 %v8286_v35  ;;  %v10123_v56 = vld [vmem:[#allocation13 + $0x69c] sm:$0xf]  ;;  %v10949_v35 = vpop.f32.mrf.mxu0 }
 0x310   :  { %v8650_v4 = vor.u32 %v10123_v56, %v8647_v6  ;;  %v10095_v56 = vld [vmem:[#allocation13 + $0x5bc] sm:$0xf]  ;;  %v8535_v6 = vld [vmem:[#allocation13 + $0x5d4] sm:$0xf0] }
 0x311   :  { %5987 = vmatpush.bf16.msra.mxu1 %v9374_v37  ;;  %6071 = vmatpush.bf16.msrb.mxu3 %v8930_v54  ;;  %v8121_v37 = vld [vmem:[#allocation13 + $0x278] sm:$0xf]  ;;  %v10953_v54 = vld [vmem:[#allocation14] sm:$0xff] }
 0x312   :  { %6058 = vmatmul.bf16.vlgmr.msrb.gmra.mxu2 %v10907_v17 }
 0x313   :  { %6106 = vmatpush.bf16.msra.mxu2 %v8010_v58  ;;  %v10291_v58 = vld [vmem:[#allocation13 + $0xbdc] sm:$0xf]  ;;  %6029 = vmatpush.bf16.msrb.mxu0 %v8258_v50  ;;  %v8877_v50 = vld [vmem:[#allocation13 + $0x860] sm:$0xf] }
 0x314   :  { %v9322_v14 = vor.u32 %v10291_v58, %v9319_v62  ;;  %5988 = vmatmul.bf16.vlgmr.msra.gmra.mxu1 %v10927_v30  ;;  %6072 = vmatmul.bf16.vlgmr.msrb.gmra.mxu3 %v10912_v11  ;;  %v10263_v58 = vld [vmem:[#allocation13 + $0xafc] sm:$0xf]  ;;  %v9207_v62 = vld [vmem:[#allocation13 + $0xb14] sm:$0xf0] }
 0x315   :  { %6036 = vmatpush.bf16.msrb.mxu1 %v8678_v53  ;;  %6120 = vmatpush.bf16.msra.mxu3 %v8234_v15  ;;  %v10183_v53 = vld [vmem:[#allocation13 + $0x878] sm:$0xf0]  ;;  %v8122_v15 = vor.u32 %v9994_v59, %v8121_v37  ;;  %v9210_v8 = vor.u32 %v10263_v58, %v9207_v62  ;;  %v10162_v37 = vld [vmem:[#allocation13 + $0x7d0] sm:$0xf0]  ;;  %v9129_v59 = vld [vmem:[#allocation13 + $0xa58] sm:$0xf] }
 0x316   :  { %6030 = vmatmul.bf16.vlgmr.msrb.gmra.mxu0 %v10903_v20  ;;  %v8878_v2 = vor.u32 %v10183_v53, %v8877_v50  ;;  %v9574_v53 = vor.u32 %v10354_v43, %v9571_v47  ;;  %v10347_v58 = vld [vmem:[#allocation13 + $0xd9c] sm:$0xf]  ;;  %v9543_v62 = vld [vmem:[#allocation13 + $0xdb4] sm:$0xf0]  ;;  %v8373_v47 = vld [vmem:[#allocation13 + $0x470] sm:$0xf] }
 0x317   :  { %6107 = vmatpush.bf16.msra.mxu2 %v7982_v52  ;;  %6078 = vmatpush.bf16.msra.mxu0 %v9350_v13  ;;  %v8206_v52 = vor.u32 %v10015_v3, %v8205_v1  ;;  %v9238_v13 = vor.u32 %v10270_v40, %v9235_v46  ;;  %v9987_v1 = vld [vmem:[#allocation13 + $0x258] sm:$0xf0]  ;;  %v3340_v3 = vperm.slane %v10953_v54, 0  ;;  %v10959_v16 = vpop.f32.mrf.mxu0  ;;  %v8793_v40 = vld [vmem:[#allocation13 + $0x7b8] sm:$0xf] }
 0x318   :  { %v8094_v7 = vor.u32 %v9987_v1, %v8093_v63  ;;  %v10071_v1 = vld [vmem:[#allocation13 + $0x4f8] sm:$0xf0] }
 0x319   :  { %6037 = vmatpush.bf16.msrb.mxu1 %v8650_v4  ;;  %6121 = vmatpush.bf16.msra.mxu3 %v8206_v52  ;;  %v8538_v4 = vor.u32 %v10095_v56, %v8535_v6  ;;  %v8507_v52 = vld [vmem:[#allocation13 + $0x59c] sm:$0xf0]  ;;  %v5668_v34 = vadd.f32 %v10942_v9, %v3340_v3  ;;  %v8822_v9 = vor.u32 %v10169_v0, %v8821_v5 }
 0x31b   :  { %6108 = vmatpush.bf16.msra.mxu2 %v7954_v10  ;;  %6079 = vmatpush.bf16.msra.mxu0 %v9322_v14  ;;  %v7842_v10 = vor.u32 %v9924_v22, %v7841_v18  ;;  %v8849_v14 = vld [vmem:[#allocation13 + $0x828] sm:$0xf]  ;;  %v10256_v18 = vld [vmem:[#allocation13 + $0xac4] sm:$0xf]  ;;  %v9179_v22 = vld [vmem:[#allocation13 + $0xadc] sm:$0xf0]  ;;  %v5682_v46 = vadd.f32 %v10946_v26, %v5668_v34 }
 0x31c   :  { %v8850_v42 = vor.u32 %v10176_v19, %v8849_v14  ;;  %v9182_v29 = vor.u32 %v10256_v18, %v9179_v22  ;;  %v8429_v26 = vld [vmem:[#allocation13 + $0x4e0] sm:$0xf]  ;;  %v5670_v14 = vadd.f32 %v10951_v57, %v3340_v3  ;;  %v10155_v19 = vld [vmem:[#allocation13 + $0x798] sm:$0xf0]  ;;  %v8401_v57 = vld [vmem:[#allocation13 + $0x4a8] sm:$0xf] }
 0x31d   :  { %6038 = vmatpush.bf16.msrb.mxu1 %v8622_v27  ;;  %6122 = vmatpush.bf16.msra.mxu3 %v8178_v28  ;;  %v8065_v27 = vld [vmem:[#allocation13 + $0x208] sm:$0xf]  ;;  %v8430_v22 = vor.u32 %v10071_v1, %v8429_v26  ;;  %v10064_v3 = vld [vmem:[#allocation13 + $0x4c0] sm:$0xf0] }
 0x31e   :  { %v8737_v34 = vld [vmem:[#allocation13 + $0x748] sm:$0xf] }
 0x31f   :  { %6109 = vmatpush.bf16.msra.mxu2 %v7926_v38  ;;  %6080 = vmatpush.bf16.msra.mxu0 %v9294_v21  ;;  %v8150_v38 = vor.u32 %v10001_v32, %v8149_v31  ;;  %v9980_v21 = vld [vmem:[#allocation13 + $0x220] sm:$0xf0]  ;;  %v10249_v31 = vld [vmem:[#allocation13 + $0xa8c] sm:$0xf]  ;;  %v9151_v32 = vld [vmem:[#allocation13 + $0xaa4] sm:$0xf0]  ;;  %v5751_v56 = vpop.f32.mrf.mxu0 }
 0x320   :  { %v8066_v41 = vor.u32 %v9980_v21, %v8065_v27  ;;  %v9154_v50 = vor.u32 %v10249_v31, %v9151_v32  ;;  %v9515_v27 = vld [vmem:[#allocation13 + $0xd7c] sm:$0xf0] }
 0x321   :  { %6039 = vmatpush.bf16.msrb.mxu1 %v8594_v36  ;;  %6123 = vmatpush.bf16.msra.mxu3 %v8150_v38  ;;  %v8037_v36 = vld [vmem:[#allocation13 + $0x1d0] sm:$0xf]  ;;  %v10078_v38 = vld [vmem:[#allocation13 + $0x530] sm:$0xf0] }
 0x323   :  { %6110 = vmatpush.bf16.msra.mxu2 %v7898_v55  ;;  %6081 = vmatpush.bf16.msra.mxu0 %v9266_v25  ;;  %v10955_v55 = vpop.f32.mrf.mxu3  ;;  %v9973_v25 = vld [vmem:[#allocation13 + $0x1e8] sm:$0xf0] }
 0x324   :  { %v8038_v6 = vor.u32 %v9973_v25, %v8037_v36 }
 0x325   :  { %6040 = vmatpush.bf16.msrb.mxu1 %v8566_v49  ;;  %6124 = vmatpush.bf16.msra.mxu3 %v8122_v15  ;;  %v10246_v49 = vld [vmem:[#allocation13 + $0xa70] sm:$0xf0] }
 0x326   :  { %v9130_v63 = vor.u32 %v10246_v49, %v9129_v59  ;;  %v8011_v49 = vld [vmem:[#allocation13 + $0x1b4] sm:$0xf0] }
 0x327   :  { %6111 = vmatpush.bf16.msra.mxu2 %v7870_v12  ;;  %6082 = vmatpush.bf16.msra.mxu0 %v9238_v13  ;;  %v10088_v12 = vld [vmem:[#allocation13 + $0x584] sm:$0xf]  ;;  %v5696_v13 = vadd.f32 %v10949_v35, %v5682_v46  ;;  %v10239_v35 = vld [vmem:[#allocation13 + $0xa38] sm:$0xf0]  ;;  %v10141_v46 = vld [vmem:[#allocation13 + $0x728] sm:$0xf0] }
 0x328   :  { %v8510_v28 = vor.u32 %v10088_v12, %v8507_v52  ;;  %v5711_v12 = vpop.f32.mrf.mxu1  ;;  %v9546_v52 = vor.u32 %v10347_v58, %v9543_v62 }
 0x329   :  { %6041 = vmatpush.bf16.msrb.mxu1 %v8538_v4  ;;  %6125 = vmatpush.bf16.msra.mxu3 %v8094_v7  ;;  %v8765_v4 = vld [vmem:[#allocation13 + $0x780] sm:$0xf]  ;;  %v5710_v7 = vadd.f32 %v5709_v23, %v5696_v13  ;;  %v10148_v23 = vld [vmem:[#allocation13 + $0x760] sm:$0xf0] }
 0x32a   :  { %v8766_v21 = vor.u32 %v10155_v19, %v8765_v4  ;;  %v8738_v25 = vor.u32 %v10148_v23, %v8737_v34  ;;  %v9017_v4 = vld [vmem:[#allocation13 + $0x978] sm:$0xf]  ;;  %v10211_v34 = vld [vmem:[#allocation13 + $0x958] sm:$0xf0]  ;;  %v7955_v23 = vld [vmem:[#allocation13 + $0x144] sm:$0xf0] }
 0x32b   :  { %6112 = vmatpush.bf16.msra.mxu2 %v7842_v10  ;;  %v10964_v10 = vpop.f32.mrf.mxu2  ;;  %6083 = vmatpush.bf16.msra.mxu0 %v9210_v8  ;;  %v10966_v39 = vpop.f32.mrf.mxu3  ;;  %v9101_v8 = vld [vmem:[#allocation13 + $0xa20] sm:$0xf] }
 0x32c   :  { %v9102_v5 = vor.u32 %v10239_v35, %v9101_v8  ;;  %v5724_v0 = vadd.f32 %v10964_v10, %v5710_v7  ;;  %v9487_v10 = vld [vmem:[#allocation13 + $0xd44] sm:$0xf0]  ;;  %v9956_v8 = vld [vmem:[#allocation13 + $0x164] sm:$0xf]  ;;  %v7983_v35 = vld [vmem:[#allocation13 + $0x17c] sm:$0xf0] }
 0x32d   :  { %6042 = vmatpush.bf16.msrb.mxu1 %v8510_v28  ;;  %6126 = vmatpush.bf16.msra.mxu3 %v8066_v41  ;;  %v5684_v28 = vadd.f32 %v10955_v55, %v5670_v14  ;;  %v8402_v55 = vor.u32 %v10064_v3, %v8401_v57  ;;  %v10333_v41 = vld [vmem:[#allocation13 + $0xd2c] sm:$0xf]  ;;  %v10218_v14 = vld [vmem:[#allocation13 + $0x990] sm:$0xf0]  ;;  %v7986_v57 = vor.u32 %v9956_v8, %v7983_v35  ;;  %v8989_v3 = vld [vmem:[#allocation13 + $0x940] sm:$0xf] }
 0x32e   :  { %v5738_v36 = vadd.f32 %v10966_v39, %v5724_v0  ;;  %v9490_v59 = vor.u32 %v10333_v41, %v9487_v10  ;;  %v9963_v39 = vld [vmem:[#allocation13 + $0x19c] sm:$0xf]  ;;  %v3341_v41 = vperm.slane %v10953_v54, 1  ;;  %v8990_v10 = vor.u32 %v10211_v34, %v8989_v3  ;;  %v7899_v8 = vld [vmem:[#allocation13 + $0xd4] sm:$0xf0] }
 0x32f   :  { %6113 = vmatpush.bf16.msra.mxu2 %v7814_v44  ;;  %v8457_v44 = vld [vmem:[#allocation13 + $0x518] sm:$0xf]  ;;  %6084 = vmatpush.bf16.msra.mxu0 %v9182_v29  ;;  %v10232_v29 = vld [vmem:[#allocation13 + $0xa00] sm:$0xf0]  ;;  %v5698_v32 = vadd.f32 %v10959_v16, %v5684_v28  ;;  %v8014_v1 = vor.u32 %v9963_v39, %v8011_v49  ;;  %v8261_v39 = vld [vmem:[#allocation13 + $0x390] sm:$0xf] }
 0x330   :  { %v8458_v15 = vor.u32 %v10078_v38, %v8457_v44  ;;  %v8709_v44 = vld [vmem:[#allocation13 + $0x710] sm:$0xf]  ;;  %v5752_v38 = vadd.f32 %v5751_v56, %v5738_v36  ;;  %v5765_v16 = vpop.f32.mrf.mxu1  ;;  %v8345_v56 = vld [vmem:[#allocation13 + $0x438] sm:$0xf]  ;;  %v10312_v36 = vld [vmem:[#allocation13 + $0xc84] sm:$0xf] }
 0x331   :  { %6127 = vmatpush.bf16.msra.mxu3 %v8038_v6  ;;  %v10326_v6 = vld [vmem:[#allocation13 + $0xcf4] sm:$0xf]  ;;  %v8710_v58 = vor.u32 %v10141_v46, %v8709_v44  ;;  %v10204_v44 = vld [vmem:[#allocation13 + $0x920] sm:$0xf0]  ;;  %v7927_v46 = vld [vmem:[#allocation13 + $0x10c] sm:$0xf0] }
 0x332   :  { %6114 = vmatmul.bf16.vlgmr.msra.gmra.mxu2 %v10890_v24  ;;  %v10029_v49 = vld [vmem:[#allocation13 + $0x3a8] sm:$0xf0]  ;;  %v10019_v35 = vld [vmem:[#allocation13 + $0x35c] sm:$0xf]  ;;  %v9325_v34 = vld [vmem:[#allocation13 + $0xbe0] sm:$0xf] }
 0x333   :  { %6162 = vmatpush.bf16.msrb.mxu2 %v8906_v48  ;;  %v8482_v48 = vor.u32 %v10081_v51, %v8479_v33  ;;  %6085 = vmatpush.bf16.msra.mxu0 %v9154_v50  ;;  %v5725_v18 = vpop.f32.mrf.mxu2  ;;  %v5739_v51 = vpop.f32.mrf.mxu3  ;;  %v9073_v33 = vld [vmem:[#allocation13 + $0x9e8] sm:$0xf]  ;;  %v5712_v50 = vadd.f32 %v5711_v12, %v5698_v32 }
 0x334   :  { %6128 = vmatmul.bf16.vlgmr.msra.gmra.mxu3 %v10878_v60  ;;  %v9074_v43 = vor.u32 %v10232_v29, %v9073_v33 }
 0x335   :  { %6043 = vmatpush.bf16.msrb.mxu1 %v8482_v48  ;;  %6176 = vmatpush.bf16.msrb.mxu3 %v9130_v63  ;;  %v9045_v48 = vld [vmem:[#allocation13 + $0x9b0] sm:$0xf]  ;;  %v5726_v63 = vadd.f32 %v5725_v18, %v5712_v50  ;;  %v8317_v18 = vld [vmem:[#allocation13 + $0x400] sm:$0xf] }
 0x336   :  { %6086 = vmatmul.bf16.vlgmr.msra.gmra.mxu0 %v10920_v45  ;;  %v8933_v50 = vld [vmem:[#allocation13 + $0x8d0] sm:$0xf] }
 0x337   :  { %6163 = vmatpush.bf16.msrb.mxu2 %v8878_v2  ;;  %v8794_v2 = vor.u32 %v10162_v37, %v8793_v40  ;;  %6134 = vmatpush.bf16.msrb.mxu0 %v8458_v15  ;;  %v5753_v40 = vpop.f32.mrf.mxu0  ;;  %v10225_v37 = vld [vmem:[#allocation13 + $0x9c8] sm:$0xf0]  ;;  %v9459_v15 = vld [vmem:[#allocation13 + $0xd0c] sm:$0xf0]  ;;  %v5740_v12 = vadd.f32 %v5739_v51, %v5726_v63  ;;  %v10302_v63 = vld [vmem:[#allocation13 + $0xc30] sm:$0xf0] }
 0x338   :  { %6044 = vmatmul.bf16.vlgmr.msrb.gmra.mxu1 %v10899_v61  ;;  %v9046_v62 = vor.u32 %v10225_v37, %v9045_v48  ;;  %v9462_v19 = vor.u32 %v10326_v6, %v9459_v15  ;;  %v5767_v28 = vpop.f32.mrf.mxu1  ;;  %v9949_v51 = vld [vmem:[#allocation13 + $0x12c] sm:$0xf]  ;;  %v9375_v37 = vld [vmem:[#allocation13 + $0xc64] sm:$0xf0]  ;;  %v8681_v15 = vld [vmem:[#allocation13 + $0x6d8] sm:$0xf] }
 0x339   :  { %6092 = vmatpush.bf16.msra.mxu1 %v9574_v53  ;;  %6177 = vmatpush.bf16.msrb.mxu3 %v9102_v5  ;;  %v5766_v53 = vadd.f32 %v5765_v16, %v5752_v38  ;;  %v5754_v5 = vadd.f32 %v5753_v40, %v5740_v12  ;;  %v9942_v38 = vld [vmem:[#allocation13 + $0xf4] sm:$0xf]  ;;  %v10305_v48 = vld [vmem:[#allocation13 + $0xc4c] sm:$0xf]  ;;  %v8235_v12 = vld [vmem:[#allocation13 + $0x374] sm:$0xf0] }
 0x33a   :  { %v10197_v6 = vld [vmem:[#allocation13 + $0x8e8] sm:$0xf0]  ;;  %v8238_v3 = vor.u32 %v10019_v35, %v8235_v12  ;;  %v10187_v35 = vld [vmem:[#allocation13 + $0x89c] sm:$0xf]  ;;  %v8907_v12 = vld [vmem:[#allocation13 + $0x8b4] sm:$0xf0] }
 0x33b   :  { %6164 = vmatpush.bf16.msrb.mxu2 %v8850_v42  ;;  %v10340_v42 = vld [vmem:[#allocation13 + $0xd64] sm:$0xf]  ;;  %6135 = vmatpush.bf16.msrb.mxu0 %v8430_v22  ;;  %v5779_v26 = vpop.f32.mrf.mxu2  ;;  %10379 = vtanh.f32 %v5766_v53  ;;  %v10319_v22 = vld [vmem:[#allocation13 + $0xcbc] sm:$0xf] }
 0x33c   :  { %v9518_v31 = vor.u32 %v10340_v42, %v9515_v27  ;;  %v9431_v42 = vld [vmem:[#allocation13 + $0xcd4] sm:$0xf0]  ;;  %v9018_v27 = vor.u32 %v10218_v14, %v9017_v4  ;;  %v5780_v53 = vadd.f32 %v5779_v26, %v3341_v41 }
 0x33d   :  { %6093 = vmatpush.bf16.msra.mxu1 %v9546_v52  ;;  %6178 = vmatpush.bf16.msrb.mxu3 %v9074_v43  ;;  %v10980_v52 = vpop.f32.mrf.mxu3  ;;  %v9434_v0 = vor.u32 %v10319_v22, %v9431_v42  ;;  %v10036_v43 = vld [vmem:[#allocation13 + $0x3e0] sm:$0xf0] }
 0x33e   :  { %v5794_v4 = vadd.f32 %v10980_v52, %v5780_v53  ;;  %v8597_v53 = vld [vmem:[#allocation13 + $0x630] sm:$0xf] }
 0x33f   :  { %6165 = vmatpush.bf16.msrb.mxu2 %v8822_v9  ;;  %v10057_v9 = vld [vmem:[#allocation13 + $0x488] sm:$0xf0]  ;;  %6136 = vmatpush.bf16.msrb.mxu0 %v8402_v55  ;;  %v5807_v29 = vpop.f32.mrf.mxu0  ;;  %v9403_v55 = vld [vmem:[#allocation13 + $0xc9c] sm:$0xf0] }
 0x340   :  { %v8374_v13 = vor.u32 %v10057_v9, %v8373_v47  ;;  %v7958_v47 = vor.u32 %v9949_v51, %v7955_v23  ;;  %v8961_v9 = vld [vmem:[#allocation13 + $0x908] sm:$0xf]  ;;  %v9406_v40 = vor.u32 %v10312_v36, %v9403_v55  ;;  %v5821_v14 = vpop.f32.mrf.mxu1  ;;  %v5808_v42 = vadd.f32 %v5807_v29, %v5794_v4  ;;  %v7871_v23 = vld [vmem:[#allocation13 + $0x9c] sm:$0xf0]  ;;  %v9998_v4 = vld [vmem:[#allocation13 + $0x2b4] sm:$0xf] }
 0x341   :  { %6094 = vmatpush.bf16.msra.mxu1 %v9518_v31  ;;  %6179 = vmatpush.bf16.msrb.mxu3 %v9046_v62  ;;  %v10380_v33 = vpop.eup %10379  ;;  %v5768_v31 = vadd.f32 %v5767_v28, %v5754_v5  ;;  %v10127_v5 = vld [vmem:[#allocation13 + $0x6b8] sm:$0xf0] }
 0x342   :  { %6456 = vst [vmem:[#allocation16] sm:$0xff] %v10380_v33  ;;  %v10295_v28 = vld [vmem:[#allocation13 + $0xbf8] sm:$0xf0]  ;;  %v5822_v51 = vadd.f32 %v5821_v14, %v5808_v42  ;;  %v10012_v33 = vld [vmem:[#allocation13 + $0x324] sm:$0xf] }
 0x343   :  { %6166 = vmatpush.bf16.msrb.mxu2 %v8794_v2  ;;  %v10050_v2 = vld [vmem:[#allocation13 + $0x450] sm:$0xf0]  ;;  %6137 = vmatpush.bf16.msrb.mxu0 %v8374_v13  ;;  %10381 = vtanh.f32 %v5768_v31  ;;  %v5781_v16 = vpop.f32.mrf.mxu2  ;;  %v8962_v13 = vor.u32 %v10204_v44, %v8961_v9  ;;  %v8207_v31 = vld [vmem:[#allocation13 + $0x33c] sm:$0xf0]  ;;  %v9326_v55 = vor.u32 %v10295_v28, %v9325_v34  ;;  %v9297_v9 = vld [vmem:[#allocation13 + $0xba8] sm:$0xf] }
 0x344   :  { %v8346_v7 = vor.u32 %v10050_v2, %v8345_v56  ;;  %v7930_v56 = vor.u32 %v9942_v38, %v7927_v46  ;;  %v9353_v2 = vld [vmem:[#allocation13 + $0xc18] sm:$0xf]  ;;  %v5782_v36 = vadd.f32 %v5781_v16, %v3341_v41  ;;  %v10288_v44 = vld [vmem:[#allocation13 + $0xbc0] sm:$0xf0]  ;;  %v9921_v38 = vld [vmem:[#allocation13 + $0x4c] sm:$0xf] }
 0x345   :  { %6095 = vmatpush.bf16.msra.mxu1 %v9490_v59  ;;  %6180 = vmatpush.bf16.msrb.mxu3 %v9018_v27  ;;  %v5795_v62 = vpop.f32.mrf.mxu3  ;;  %v8934_v27 = vor.u32 %v10197_v6, %v8933_v50  ;;  %v7843_v41 = vld [vmem:[#allocation13 + $0x64] sm:$0xf0]  ;;  %v9298_v50 = vor.u32 %v10288_v44, %v9297_v9  ;;  %v8151_v14 = vld [vmem:[#allocation13 + $0x2cc] sm:$0xf0]  ;;  %v9991_v34 = vld [vmem:[#allocation13 + $0x27c] sm:$0xf] }
 0x346   :  { %v8179_v16 = vld [vmem:[#allocation13 + $0x304] sm:$0xf0]  ;;  %v7846_v6 = vor.u32 %v9921_v38, %v7843_v41  ;;  %v8123_v28 = vld [vmem:[#allocation13 + $0x294] sm:$0xf0]  ;;  %v9984_v44 = vld [vmem:[#allocation13 + $0x244] sm:$0xf] }
 0x347   :  { %6167 = vmatpush.bf16.msrb.mxu2 %v8766_v21  ;;  %v10043_v21 = vld [vmem:[#allocation13 + $0x418] sm:$0xf0]  ;;  %6138 = vmatpush.bf16.msrb.mxu0 %v8346_v7  ;;  %v8262_v7 = vor.u32 %v10029_v49, %v8261_v39  ;;  %v8095_v38 = vld [vmem:[#allocation13 + $0x25c] sm:$0xf0] }
 0x348   :  { %v8318_v32 = vor.u32 %v10043_v21, %v8317_v18  ;;  %v9354_v18 = vor.u32 %v10302_v63, %v9353_v2  ;;  %v8653_v21 = vld [vmem:[#allocation13 + $0x6a0] sm:$0xf] }
 0x349   :  { %6096 = vmatpush.bf16.msra.mxu1 %v9462_v19  ;;  %6181 = vmatpush.bf16.msrb.mxu3 %v8990_v10  ;;  %v9378_v19 = vor.u32 %v10305_v48, %v9375_v37  ;;  %v10382_v26 = vpop.eup %10381  ;;  %v8654_v29 = vor.u32 %v10127_v5, %v8653_v21  ;;  %v8625_v10 = vld [vmem:[#allocation13 + $0x668] sm:$0xf]  ;;  %v5823_v48 = vpop.f32.mrf.mxu1  ;;  %v10005_v37 = vld [vmem:[#allocation13 + $0x2ec] sm:$0xf]  ;;  %v9241_v21 = vld [vmem:[#allocation13 + $0xb38] sm:$0xf] }
 0x34a   :  { %6463 = vst [vmem:[#allocation16 + $0x38] sm:$0xff] %v10382_v26  ;;  %v10274_v5 = vld [vmem:[#allocation13 + $0xb50] sm:$0xf0] }
 0x34b   :  { %6168 = vmatpush.bf16.msrb.mxu2 %v8738_v25  ;;  %v8289_v25 = vld [vmem:[#allocation13 + $0x3c8] sm:$0xf]  ;;  %6139 = vmatpush.bf16.msrb.mxu0 %v8318_v32  ;;  %v5835_v32 = vpop.f32.mrf.mxu2 }
 0x34c   :  { %v8290_v59 = vor.u32 %v10036_v43, %v8289_v25  ;;  %v10120_v25 = vld [vmem:[#allocation13 + $0x680] sm:$0xf0]  ;;  %v5836_v46 = vadd.f32 %v5835_v32, %v5822_v51  ;;  %v9242_v32 = vor.u32 %v10274_v5, %v9241_v21  ;;  %v8459_v21 = vld [vmem:[#allocation13 + $0x534] sm:$0xf0]  ;;  %v10159_v5 = vld [vmem:[#allocation13 + $0x7bc] sm:$0xf] }
 0x34d   :  { %6097 = vmatpush.bf16.msra.mxu1 %v9434_v0  ;;  %6182 = vmatpush.bf16.msrb.mxu3 %v8962_v13  ;;  %v9928_v0 = vld [vmem:[#allocation13 + $0x84] sm:$0xf]  ;;  %v8626_v39 = vor.u32 %v10120_v25, %v8625_v10  ;;  %v10113_v13 = vld [vmem:[#allocation13 + $0x648] sm:$0xf0]  ;;  %v8126_v10 = vor.u32 %v9991_v34, %v8123_v28  ;;  %v9213_v25 = vld [vmem:[#allocation13 + $0xb00] sm:$0xf] }
 0x34e   :  { %v7874_v43 = vor.u32 %v9928_v0, %v7871_v23  ;;  %v10180_v23 = vld [vmem:[#allocation13 + $0x864] sm:$0xf]  ;;  %v9131_v34 = vld [vmem:[#allocation13 + $0xa74] sm:$0xf0] }
 0x34f   :  { %6169 = vmatpush.bf16.msrb.mxu2 %v8710_v58  ;;  %v10134_v58 = vld [vmem:[#allocation13 + $0x6f0] sm:$0xf0]  ;;  %6140 = vmatpush.bf16.msrb.mxu0 %v8290_v59  ;;  %v5849_v59 = vpop.f32.mrf.mxu3 }
 0x350   :  { %v8682_v22 = vor.u32 %v10134_v58, %v8681_v15  ;;  %v8182_v15 = vor.u32 %v10005_v37, %v8179_v16  ;;  %v9269_v58 = vld [vmem:[#allocation13 + $0xb70] sm:$0xf]  ;;  %v5850_v63 = vadd.f32 %v5849_v59, %v5836_v46  ;;  %v10173_v46 = vld [vmem:[#allocation13 + $0x82c] sm:$0xf]  ;;  %v8513_v37 = vld [vmem:[#allocation13 + $0x588] sm:$0xf] }
 0x351   :  { %6098 = vmatpush.bf16.msra.mxu1 %v9406_v40  ;;  %6183 = vmatpush.bf16.msrb.mxu3 %v8934_v27  ;;  %v5796_v40 = vadd.f32 %v5795_v62, %v5782_v36  ;;  %v10281_v62 = vld [vmem:[#allocation13 + $0xb88] sm:$0xf0]  ;;  %v5877_v0 = vpop.f32.mrf.mxu1  ;;  %v10099_v36 = vld [vmem:[#allocation13 + $0x5d8] sm:$0xf0]  ;;  %v10092_v16 = vld [vmem:[#allocation13 + $0x5a0] sm:$0xf0] }
 0x352   :  { %6170 = vmatmul.bf16.vlgmr.msrb.gmra.mxu2 %v10907_v17  ;;  %v9270_v26 = vor.u32 %v10281_v62, %v9269_v58  ;;  %v10166_v58 = vld [vmem:[#allocation13 + $0x7f4] sm:$0xf]  ;;  %v8823_v62 = vld [vmem:[#allocation13 + $0x80c] sm:$0xf0] }
 0x353   :  { %6218 = vmatpush.bf16.msra.mxu2 %v8014_v1  ;;  %v9935_v1 = vld [vmem:[#allocation13 + $0xbc] sm:$0xf]  ;;  %6141 = vmatpush.bf16.msrb.mxu0 %v8262_v7  ;;  %v8569_v7 = vld [vmem:[#allocation13 + $0x5f8] sm:$0xf]  ;;  %v5837_v42 = vpop.f32.mrf.mxu2 }
 0x354   :  { %v7902_v52 = vor.u32 %v9935_v1, %v7899_v8  ;;  %6184 = vmatmul.bf16.vlgmr.msrb.gmra.mxu3 %v10912_v11  ;;  %v7815_v1 = vld [vmem:[#allocation13 + $0x2c] sm:$0xf0]  ;;  %v8598_v8 = vor.u32 %v10113_v13, %v8597_v53  ;;  %v9977_v53 = vld [vmem:[#allocation13 + $0x20c] sm:$0xf] }
 0x355   :  { %6099 = vmatpush.bf16.msra.mxu1 %v9378_v19  ;;  %6232 = vmatpush.bf16.msra.mxu3 %v8238_v3  ;;  %v8910_v3 = vor.u32 %v10187_v35, %v8907_v12  ;;  %v10253_v35 = vld [vmem:[#allocation13 + $0xaa8] sm:$0xf0]  ;;  %v9970_v12 = vld [vmem:[#allocation13 + $0x1d4] sm:$0xf] }
 0x356   :  { %6142 = vmatmul.bf16.vlgmr.msrb.gmra.mxu0 %v10903_v20 }
 0x357   :  { %6219 = vmatpush.bf16.msra.mxu2 %v7986_v57  ;;  %v5809_v57 = vpop.f32.mrf.mxu0  ;;  %6190 = vmatpush.bf16.msra.mxu0 %v9354_v18  ;;  %v8154_v18 = vor.u32 %v9998_v4, %v8151_v14  ;;  %v9157_v4 = vld [vmem:[#allocation13 + $0xa90] sm:$0xf] }
 0x358   :  { %6100 = vmatmul.bf16.vlgmr.msra.gmra.mxu1 %v10927_v30  ;;  %v5810_v49 = vadd.f32 %v5809_v57, %v5796_v40  ;;  %v9158_v28 = vor.u32 %v10253_v35, %v9157_v4  ;;  %v10222_v4 = vld [vmem:[#allocation13 + $0x9b4] sm:$0xf]  ;;  %v9967_v35 = vld [vmem:[#allocation13 + $0x1b8] sm:$0xf0] }
 0x359   :  { %6148 = vmatpush.bf16.msrb.mxu1 %v8682_v22  ;;  %v10106_v22 = vld [vmem:[#allocation13 + $0x610] sm:$0xf0] }
 0x35a   :  { %v5824_v2 = vadd.f32 %v5823_v48, %v5810_v49  ;;  %v8570_v51 = vor.u32 %v10106_v22, %v8569_v7  ;;  %v8851_v48 = vld [vmem:[#allocation13 + $0x844] sm:$0xf0]  ;;  %v9577_v22 = vld [vmem:[#allocation13 + $0xdd8] sm:$0xf] }
 0x35b   :  { %6220 = vmatpush.bf16.msra.mxu2 %v7958_v47  ;;  %v8210_v47 = vor.u32 %v10012_v33, %v8207_v31  ;;  %6191 = vmatpush.bf16.msra.mxu0 %v9326_v55  ;;  %v8879_v33 = vld [vmem:[#allocation13 + $0x87c] sm:$0xf0]  ;;  %v5851_v55 = vpop.f32.mrf.mxu3  ;;  %v9185_v49 = vld [vmem:[#allocation13 + $0xac8] sm:$0xf] }
 0x35c   :  { %v5838_v57 = vadd.f32 %v5837_v42, %v5824_v2  ;;  %v8514_v2 = vor.u32 %v10092_v16, %v8513_v37  ;;  %v10358_v42 = vld [vmem:[#allocation13 + $0xdf0] sm:$0xf0]  ;;  %v10061_v37 = vld [vmem:[#allocation13 + $0x4ac] sm:$0xf]  ;;  %v8403_v16 = vld [vmem:[#allocation13 + $0x4c4] sm:$0xf0] }
 0x35d   :  { %6149 = vmatpush.bf16.msrb.mxu1 %v8654_v29  ;;  %6233 = vmatpush.bf16.msra.mxu3 %v8210_v47  ;;  %v8541_v29 = vld [vmem:[#allocation13 + $0x5c0] sm:$0xf]  ;;  %v8882_v47 = vor.u32 %v10180_v23, %v8879_v33 }
 0x35e   :  { %v5852_v9 = vadd.f32 %v5851_v55, %v5838_v57  ;;  %v8542_v40 = vor.u32 %v10099_v36, %v8541_v29  ;;  %v9549_v33 = vld [vmem:[#allocation13 + $0xda0] sm:$0xf]  ;;  %v10068_v36 = vld [vmem:[#allocation13 + $0x4e4] sm:$0xf] }
 0x35f   :  { %6221 = vmatpush.bf16.msra.mxu2 %v7930_v56  ;;  %v9914_v56 = vld [vmem:[#allocation13 + $0x14] sm:$0xf]  ;;  %v5863_v19 = vpop.f32.mrf.mxu0  ;;  %6192 = vmatpush.bf16.msra.mxu0 %v9298_v50  ;;  %v10260_v50 = vld [vmem:[#allocation13 + $0xae0] sm:$0xf0]  ;;  %v8431_v55 = vld [vmem:[#allocation13 + $0x4fc] sm:$0xf0] }
 0x360   :  { %v7818_v27 = vor.u32 %v9914_v56, %v7815_v1  ;;  %v5879_v56 = vpop.f32.mrf.mxu1  ;;  %v10085_v1 = vld [vmem:[#allocation13 + $0x568] sm:$0xf0] }
 0x361   :  { %6150 = vmatpush.bf16.msrb.mxu1 %v8626_v39  ;;  %6234 = vmatpush.bf16.msra.mxu3 %v8182_v15  ;;  %v8098_v39 = vor.u32 %v9984_v44, %v8095_v38  ;;  %v8067_v15 = vld [vmem:[#allocation13 + $0x224] sm:$0xf0]  ;;  %v8434_v38 = vor.u32 %v10068_v36, %v8431_v55  ;;  %v10208_v55 = vld [vmem:[#allocation13 + $0x944] sm:$0xf] }
 0x362   :  { %v8070_v7 = vor.u32 %v9977_v53, %v8067_v15  ;;  %v10337_v15 = vld [vmem:[#allocation13 + $0xd48] sm:$0xf0] }
 0x363   :  { %6222 = vmatpush.bf16.msra.mxu2 %v7902_v52  ;;  %v5864_v52 = vadd.f32 %v5863_v19, %v5850_v63  ;;  %6193 = vmatpush.bf16.msra.mxu0 %v9270_v26  ;;  %v8485_v63 = vld [vmem:[#allocation13 + $0x550] sm:$0xf] }
 0x364   :  { %v8039_v26 = vld [vmem:[#allocation13 + $0x1ec] sm:$0xf0]  ;;  %v8486_v57 = vor.u32 %v10085_v1, %v8485_v63  ;;  %v10138_v63 = vld [vmem:[#allocation13 + $0x714] sm:$0xf] }
 0x365   :  { %6151 = vmatpush.bf16.msrb.mxu1 %v8598_v8  ;;  %v5878_v31 = vadd.f32 %v5877_v0, %v5864_v52  ;;  %6235 = vmatpush.bf16.msra.mxu3 %v8154_v18  ;;  %v9186_v8 = vor.u32 %v10260_v50, %v9185_v49  ;;  %v10075_v18 = vld [vmem:[#allocation13 + $0x51c] sm:$0xf]  ;;  %v8795_v52 = vld [vmem:[#allocation13 + $0x7d4] sm:$0xf0]  ;;  %v9578_v0 = vor.u32 %v10358_v42, %v9577_v22  ;;  %v10229_v49 = vld [vmem:[#allocation13 + $0x9ec] sm:$0xf] }
 0x366   :  { %v8462_v23 = vor.u32 %v10075_v18, %v8459_v21  ;;  %v9075_v50 = vld [vmem:[#allocation13 + $0xa04] sm:$0xf0]  ;;  %v8711_v1 = vld [vmem:[#allocation13 + $0x72c] sm:$0xf0]  ;;  %v8347_v18 = vld [vmem:[#allocation13 + $0x454] sm:$0xf0]  ;;  %v5891_v21 = vpop.f32.mrf.mxu2 }
 0x367   :  { %6223 = vmatpush.bf16.msra.mxu2 %v7874_v43  ;;  %v10267_v43 = vld [vmem:[#allocation13 + $0xb18] sm:$0xf0]  ;;  %10383 = vtanh.f32 %v5878_v31  ;;  %6194 = vmatpush.bf16.msra.mxu0 %v9242_v32  ;;  %v5865_v59 = vpop.f32.mrf.mxu0  ;;  %v8798_v32 = vor.u32 %v10159_v5, %v8795_v52  ;;  %v8714_v22 = vor.u32 %v10138_v63, %v8711_v1  ;;  %v9019_v52 = vld [vmem:[#allocation13 + $0x994] sm:$0xf0] }
 0x368   :  { %v9214_v41 = vor.u32 %v10267_v43, %v9213_v25  ;;  %v5866_v13 = vadd.f32 %v5865_v59, %v5852_v9  ;;  %v10351_v31 = vld [vmem:[#allocation13 + $0xdb8] sm:$0xf0]  ;;  %v8767_v25 = vld [vmem:[#allocation13 + $0x79c] sm:$0xf0]  ;;  %v10236_v43 = vld [vmem:[#allocation13 + $0xa24] sm:$0xf] }
 0x369   :  { %6152 = vmatpush.bf16.msrb.mxu1 %v8570_v51  ;;  %6236 = vmatpush.bf16.msra.mxu3 %v8126_v10  ;;  %v8042_v51 = vor.u32 %v9970_v12, %v8039_v26  ;;  %v10152_v10 = vld [vmem:[#allocation13 + $0x784] sm:$0xf]  ;;  %v9550_v44 = vor.u32 %v10351_v31, %v9549_v33  ;;  %v10145_v59 = vld [vmem:[#allocation13 + $0x74c] sm:$0xf]  ;;  %v9465_v26 = vld [vmem:[#allocation13 + $0xcf8] sm:$0xf] }
 0x36a   :  { %v5880_v19 = vadd.f32 %v5879_v56, %v5866_v13  ;;  %v8406_v13 = vor.u32 %v10061_v37, %v8403_v16  ;;  %v10054_v56 = vld [vmem:[#allocation13 + $0x474] sm:$0xf]  ;;  %v10040_v31 = vld [vmem:[#allocation13 + $0x404] sm:$0xf] }
 0x36b   :  { %6224 = vmatpush.bf16.msra.mxu2 %v7846_v6  ;;  %v8854_v6 = vor.u32 %v10173_v46, %v8851_v48  ;;  %6195 = vmatpush.bf16.msra.mxu0 %v9214_v41  ;;  %v10344_v46 = vld [vmem:[#allocation13 + $0xd80] sm:$0xf0]  ;;  %v8770_v48 = vor.u32 %v10152_v10, %v8767_v25  ;;  %v8991_v10 = vld [vmem:[#allocation13 + $0x95c] sm:$0xf0] }
 0x36c   :  { %10385 = vtanh.f32 %v5880_v19 }
 0x36d   :  { %6153 = vmatpush.bf16.msrb.mxu1 %v8542_v40  ;;  %v10384_v14 = vpop.eup %10383  ;;  %6237 = vmatpush.bf16.msra.mxu3 %v8098_v39  ;;  %v9521_v40 = vld [vmem:[#allocation13 + $0xd68] sm:$0xf] }
 0x36e   :  { %6457 = vst [vmem:[#allocation16 + $0x8] sm:$0xff] %v10384_v14  ;;  %v8739_v39 = vld [vmem:[#allocation13 + $0x764] sm:$0xf0]  ;;  %v9522_v53 = vor.u32 %v10344_v46, %v9521_v40  ;;  %v9047_v14 = vld [vmem:[#allocation13 + $0x9cc] sm:$0xf0]  ;;  %v3342_v40 = vperm.slane %v10953_v54, 2  ;;  %v8994_v46 = vor.u32 %v10208_v55, %v8991_v10 }
 0x36f   :  { %6225 = vmatpush.bf16.msra.mxu2 %v7818_v27  ;;  %v8826_v27 = vor.u32 %v10166_v58, %v8823_v62  ;;  %6196 = vmatpush.bf16.msra.mxu0 %v9186_v8  ;;  %v8742_v58 = vor.u32 %v10145_v59, %v8739_v39  ;;  %v9078_v62 = vor.u32 %v10229_v49, %v9075_v50  ;;  %v8017_v8 = vld [vmem:[#allocation13 + $0x1a0] sm:$0xf]  ;;  %v5919_v37 = vpop.f32.mrf.mxu0  ;;  %v10201_v59 = vld [vmem:[#allocation13 + $0x90c] sm:$0xf]  ;;  %v8963_v39 = vld [vmem:[#allocation13 + $0x924] sm:$0xf0] }
 0x370   :  { %v9050_v42 = vor.u32 %v10222_v4, %v9047_v14  ;;  %v8018_v5 = vor.u32 %v9967_v35, %v8017_v8  ;;  %v7933_v49 = vld [vmem:[#allocation13 + $0xf8] sm:$0xf]  ;;  %v5892_v63 = vadd.f32 %v5891_v21, %v3342_v40  ;;  %v8966_v1 = vor.u32 %v10201_v59, %v8963_v39  ;;  %v8935_v4 = vld [vmem:[#allocation13 + $0x8ec] sm:$0xf0]  ;;  %v10131_v14 = vld [vmem:[#allocation13 + $0x6dc] sm:$0xf] }
 0x371   :  { %6154 = vmatpush.bf16.msrb.mxu1 %v8514_v2  ;;  %6238 = vmatpush.bf16.msra.mxu3 %v8070_v7  ;;  %v8375_v2 = vld [vmem:[#allocation13 + $0x48c] sm:$0xf0]  ;;  %v10330_v7 = vld [vmem:[#allocation13 + $0xd10] sm:$0xf0]  ;;  %v5933_v8 = vpop.f32.mrf.mxu1  ;;  %v9932_v55 = vld [vmem:[#allocation13 + $0xa0] sm:$0xf0] }
 0x372   :  { %6226 = vmatmul.bf16.vlgmr.msra.gmra.mxu2 %v10890_v24  ;;  %v10386_v9 = vpop.eup %10385  ;;  %v8378_v12 = vor.u32 %v10054_v56, %v8375_v2  ;;  %v8263_v56 = vld [vmem:[#allocation13 + $0x3ac] sm:$0xf0]  ;;  %v10194_v2 = vld [vmem:[#allocation13 + $0x8d4] sm:$0xf]  ;;  %v8213_v10 = vld [vmem:[#allocation13 + $0x328] sm:$0xf] }
 0x373   :  { %6274 = vmatpush.bf16.msrb.mxu2 %v8910_v3  ;;  %v10243_v3 = vld [vmem:[#allocation13 + $0xa5c] sm:$0xf]  ;;  %6197 = vmatpush.bf16.msra.mxu0 %v9158_v28  ;;  %6464 = vst [vmem:[#allocation16 + $0x40] sm:$0xff] %v10386_v9  ;;  %v9960_v28 = vld [vmem:[#allocation13 + $0x180] sm:$0xf0] }
 0x374   :  { %v9134_v29 = vor.u32 %v10243_v3, %v9131_v34  ;;  %v9466_v3 = vor.u32 %v10330_v7, %v9465_v26  ;;  %v7989_v34 = vld [vmem:[#allocation13 + $0x168] sm:$0xf]  ;;  %v9355_v26 = vld [vmem:[#allocation13 + $0xc34] sm:$0xf0]  ;;  %v7905_v7 = vld [vmem:[#allocation13 + $0xc0] sm:$0xf] }
 0x375   :  { %6155 = vmatpush.bf16.msrb.mxu1 %v8486_v57  ;;  %6239 = vmatpush.bf16.msra.mxu3 %v8042_v51  ;;  %v10215_v57 = vld [vmem:[#allocation13 + $0x97c] sm:$0xf]  ;;  %v9437_v51 = vld [vmem:[#allocation13 + $0xcc0] sm:$0xf]  ;;  %v7990_v36 = vor.u32 %v9960_v28, %v7989_v34  ;;  %v8938_v34 = vor.u32 %v10194_v2, %v8935_v4  ;;  %v9299_v59 = vld [vmem:[#allocation13 + $0xbc4] sm:$0xf0] }
 0x376   :  { %6198 = vmatmul.bf16.vlgmr.msra.gmra.mxu0 %v10920_v45  ;;  %v9022_v33 = vor.u32 %v10215_v57, %v9019_v52  ;;  %v7849_v39 = vld [vmem:[#allocation13 + $0x50] sm:$0xf]  ;;  %v9925_v54 = vld [vmem:[#allocation13 + $0x68] sm:$0xf0]  ;;  %v10278_v4 = vld [vmem:[#allocation13 + $0xb74] sm:$0xf] }
 0x377   :  { %6275 = vmatpush.bf16.msrb.mxu2 %v8882_v47  ;;  %v9103_v47 = vld [vmem:[#allocation13 + $0xa3c] sm:$0xf0]  ;;  %6246 = vmatpush.bf16.msrb.mxu0 %v8462_v23  ;;  %v10323_v23 = vld [vmem:[#allocation13 + $0xcd8] sm:$0xf0]  ;;  %v8599_v2 = vld [vmem:[#allocation13 + $0x64c] sm:$0xf0] }
 0x378   :  { %v9106_v41 = vor.u32 %v10236_v43, %v9103_v47  ;;  %6156 = vmatmul.bf16.vlgmr.msrb.gmra.mxu1 %v10899_v61  ;;  %6240 = vmatmul.bf16.vlgmr.msra.gmra.mxu3 %v10878_v60  ;;  %v9438_v25 = vor.u32 %v10323_v23, %v9437_v51  ;;  %v7961_v43 = vld [vmem:[#allocation13 + $0x130] sm:$0xf]  ;;  %v9953_v47 = vld [vmem:[#allocation13 + $0x148] sm:$0xf0]  ;;  %v8655_v51 = vld [vmem:[#allocation13 + $0x6bc] sm:$0xf0] }
 0x379   :  { %6204 = vmatpush.bf16.msra.mxu1 %v9578_v0  ;;  %6288 = vmatpush.bf16.msrb.mxu3 %v9134_v29  ;;  %v5905_v29 = vpop.f32.mrf.mxu3  ;;  %v7962_v16 = vor.u32 %v9953_v47, %v7961_v43  ;;  %v5921_v47 = vpop.f32.mrf.mxu0 }
 0x37b   :  { %6276 = vmatpush.bf16.msrb.mxu2 %v8854_v6  ;;  %6247 = vmatpush.bf16.msrb.mxu0 %v8434_v38  ;;  %v9493_v6 = vld [vmem:[#allocation13 + $0xd30] sm:$0xf]  ;;  %v10316_v38 = vld [vmem:[#allocation13 + $0xca0] sm:$0xf0] }
 0x37c   :  { %v9494_v19 = vor.u32 %v10337_v15, %v9493_v6  ;;  %v10309_v6 = vld [vmem:[#allocation13 + $0xc68] sm:$0xf0]  ;;  %v5893_v15 = vpop.f32.mrf.mxu2 }
 0x37d   :  { %6205 = vmatpush.bf16.msra.mxu1 %v9550_v44  ;;  %6289 = vmatpush.bf16.msrb.mxu3 %v9106_v41  ;;  %v9409_v44 = vld [vmem:[#allocation13 + $0xc88] sm:$0xf] }
 0x37e   :  { %v8291_v41 = vld [vmem:[#allocation13 + $0x3e4] sm:$0xf0]  ;;  %v9410_v50 = vor.u32 %v10316_v38, %v9409_v44  ;;  %v5894_v44 = vadd.f32 %v5893_v15, %v3342_v40  ;;  %v8185_v40 = vld [vmem:[#allocation13 + $0x2f0] sm:$0xf] }
 0x37f   :  { %6277 = vmatpush.bf16.msrb.mxu2 %v8826_v27  ;;  %6248 = vmatpush.bf16.msrb.mxu0 %v8406_v13  ;;  %v10047_v27 = vld [vmem:[#allocation13 + $0x43c] sm:$0xf]  ;;  %v9381_v13 = vld [vmem:[#allocation13 + $0xc50] sm:$0xf] }
 0x380   :  { %v8350_v0 = vor.u32 %v10047_v27, %v8347_v18  ;;  %v9939_v27 = vld [vmem:[#allocation13 + $0xd8] sm:$0xf0]  ;;  %v8241_v18 = vld [vmem:[#allocation13 + $0x360] sm:$0xf] }
 0x381   :  { %6206 = vmatpush.bf16.msra.mxu1 %v9522_v53  ;;  %6290 = vmatpush.bf16.msrb.mxu3 %v9078_v62  ;;  %v9946_v53 = vld [vmem:[#allocation13 + $0x110] sm:$0xf0]  ;;  %v5907_v57 = vpop.f32.mrf.mxu3  ;;  %v7906_v23 = vor.u32 %v9939_v27, %v7905_v7  ;;  %v8913_v27 = vld [vmem:[#allocation13 + $0x8a0] sm:$0xf] }
 0x382   :  { %v10026_v62 = vld [vmem:[#allocation13 + $0x394] sm:$0xf]  ;;  %v7934_v35 = vor.u32 %v9946_v53, %v7933_v49  ;;  %v5908_v49 = vadd.f32 %v5907_v57, %v5894_v44  ;;  %v10009_v53 = vld [vmem:[#allocation13 + $0x308] sm:$0xf0]  ;;  %v10103_v57 = vld [vmem:[#allocation13 + $0x5fc] sm:$0xf] }
 0x383   :  { %6278 = vmatpush.bf16.msrb.mxu2 %v8798_v32  ;;  %6249 = vmatpush.bf16.msrb.mxu0 %v8378_v12  ;;  %v8319_v32 = vld [vmem:[#allocation13 + $0x41c] sm:$0xf0]  ;;  %v10299_v12 = vld [vmem:[#allocation13 + $0xc1c] sm:$0xf]  ;;  %v8266_v21 = vor.u32 %v10026_v62, %v8263_v56  ;;  %v10110_v56 = vld [vmem:[#allocation13 + $0x634] sm:$0xf] }
 0x384   :  { %v8322_v9 = vor.u32 %v10040_v31, %v8319_v32  ;;  %v9358_v28 = vor.u32 %v10299_v12, %v9355_v26  ;;  %v10292_v31 = vld [vmem:[#allocation13 + $0xbe4] sm:$0xf]  ;;  %v9327_v32 = vld [vmem:[#allocation13 + $0xbfc] sm:$0xf0]  ;;  %v5947_v43 = vpop.f32.mrf.mxu2  ;;  %v9918_v12 = vld [vmem:[#allocation13 + $0x30] sm:$0xf0] }
 0x385   :  { %6207 = vmatpush.bf16.msra.mxu1 %v9494_v19  ;;  %6291 = vmatpush.bf16.msrb.mxu3 %v9050_v42  ;;  %v8683_v19 = vld [vmem:[#allocation13 + $0x6f4] sm:$0xf0]  ;;  %v9382_v42 = vor.u32 %v10309_v6, %v9381_v13  ;;  %v9330_v38 = vor.u32 %v10292_v31, %v9327_v32  ;;  %v5935_v6 = vpop.f32.mrf.mxu1  ;;  %v10002_v7 = vld [vmem:[#allocation13 + $0x2d0] sm:$0xf0]  ;;  %v8129_v31 = vld [vmem:[#allocation13 + $0x280] sm:$0xf] }
 0x386   :  { %v8686_v52 = vor.u32 %v10131_v14, %v8683_v19  ;;  %v9271_v14 = vld [vmem:[#allocation13 + $0xb8c] sm:$0xf0]  ;;  %v7821_v19 = vld [vmem:[#allocation13 + $0x18] sm:$0xf]  ;;  %v9995_v32 = vld [vmem:[#allocation13 + $0x298] sm:$0xf0] }
 0x387   :  { %6279 = vmatpush.bf16.msrb.mxu2 %v8770_v48  ;;  %6250 = vmatpush.bf16.msrb.mxu0 %v8350_v0  ;;  %v10033_v48 = vld [vmem:[#allocation13 + $0x3cc] sm:$0xf]  ;;  %v10124_v0 = vld [vmem:[#allocation13 + $0x6a4] sm:$0xf]  ;;  %v8157_v26 = vld [vmem:[#allocation13 + $0x2b8] sm:$0xf] }
 0x389   :  { %6208 = vmatpush.bf16.msra.mxu1 %v9466_v3  ;;  %6292 = vmatpush.bf16.msrb.mxu3 %v9022_v33  ;;  %v5961_v13 = vpop.f32.mrf.mxu3 }
 0x38b   :  { %6280 = vmatpush.bf16.msrb.mxu2 %v8742_v58  ;;  %6251 = vmatpush.bf16.msrb.mxu0 %v8322_v9  ;;  %v8294_v58 = vor.u32 %v10033_v48, %v8291_v41  ;;  %v8658_v9 = vor.u32 %v10124_v0, %v8655_v51  ;;  %v8627_v48 = vld [vmem:[#allocation13 + $0x684] sm:$0xf0]  ;;  %v9243_v0 = vld [vmem:[#allocation13 + $0xb54] sm:$0xf0] }
 0x38d   :  { %6209 = vmatpush.bf16.msra.mxu1 %v9438_v25  ;;  %6293 = vmatpush.bf16.msrb.mxu3 %v8994_v46  ;;  %v10016_v25 = vld [vmem:[#allocation13 + $0x340] sm:$0xf0]  ;;  %v10117_v46 = vld [vmem:[#allocation13 + $0x66c] sm:$0xf] }
 0x38e   :  { %v8630_v15 = vor.u32 %v10117_v46, %v8627_v48  ;;  %v10264_v46 = vld [vmem:[#allocation13 + $0xb04] sm:$0xf]  ;;  %v9215_v48 = vld [vmem:[#allocation13 + $0xb1c] sm:$0xf0] }
 0x38f   :  { %6281 = vmatpush.bf16.msrb.mxu2 %v8714_v22  ;;  %v5906_v22 = vadd.f32 %v5905_v29, %v5892_v63  ;;  %6252 = vmatpush.bf16.msrb.mxu0 %v8294_v58  ;;  %v7877_v29 = vld [vmem:[#allocation13 + $0x88] sm:$0xf]  ;;  %v5922_v58 = vadd.f32 %v5921_v47, %v5908_v49  ;;  %v7850_v63 = vor.u32 %v9925_v54, %v7849_v39  ;;  %v10096_v47 = vld [vmem:[#allocation13 + $0x5c4] sm:$0xf]  ;;  %v8857_v49 = vld [vmem:[#allocation13 + $0x830] sm:$0xf] }
 0x390   :  { %v7878_v41 = vor.u32 %v9932_v55, %v7877_v29  ;;  %v8885_v55 = vld [vmem:[#allocation13 + $0x868] sm:$0xf]  ;;  %v9218_v54 = vor.u32 %v10264_v46, %v9215_v48  ;;  %v10240_v46 = vld [vmem:[#allocation13 + $0xa40] sm:$0xf0] }
 0x391   :  { %6210 = vmatpush.bf16.msra.mxu1 %v9410_v50  ;;  %v5920_v3 = vadd.f32 %v5919_v37, %v5906_v22  ;;  %6294 = vmatpush.bf16.msrb.mxu3 %v8966_v1  ;;  %v8214_v37 = vor.u32 %v10016_v25, %v8213_v10  ;;  %v8186_v1 = vor.u32 %v10009_v53, %v8185_v40  ;;  %v5975_v22 = vpop.f32.mrf.mxu0  ;;  %v5989_v29 = vpop.f32.mrf.mxu1  ;;  %v10184_v10 = vld [vmem:[#allocation13 + $0x880] sm:$0xf0]  ;;  %v10089_v40 = vld [vmem:[#allocation13 + $0x58c] sm:$0xf]  ;;  %v8515_v53 = vld [vmem:[#allocation13 + $0x5a4] sm:$0xf0] }
 0x392   :  { %6282 = vmatmul.bf16.vlgmr.msrb.gmra.mxu2 %v10907_v17  ;;  %v5963_v44 = vpop.f32.mrf.mxu3 }
 0x393   :  { %6330 = vmatpush.bf16.msra.mxu2 %v8018_v5  ;;  %v10023_v5 = vld [vmem:[#allocation13 + $0x378] sm:$0xf0]  ;;  %6253 = vmatpush.bf16.msrb.mxu0 %v8266_v21  ;;  %v8571_v21 = vld [vmem:[#allocation13 + $0x614] sm:$0xf0] }
 0x394   :  { %v8242_v33 = vor.u32 %v10023_v5, %v8241_v18  ;;  %v10191_v18 = vld [vmem:[#allocation13 + $0x8b8] sm:$0xf0]  ;;  %v9274_v5 = vor.u32 %v10278_v4, %v9271_v14  ;;  %v10170_v4 = vld [vmem:[#allocation13 + $0x810] sm:$0xf0] }
 0x395   :  { %6211 = vmatpush.bf16.msra.mxu1 %v9382_v42  ;;  %6295 = vmatpush.bf16.msrb.mxu3 %v8938_v34  ;;  %v8602_v42 = vor.u32 %v10110_v56, %v8599_v2  ;;  %v8158_v34 = vor.u32 %v10002_v7, %v8157_v26 }
 0x396   :  { %6254 = vmatmul.bf16.vlgmr.msrb.gmra.mxu0 %v10903_v20 }
 0x397   :  { %6331 = vmatpush.bf16.msra.mxu2 %v7990_v36  ;;  %v5934_v36 = vadd.f32 %v5933_v8, %v5920_v3  ;;  %6302 = vmatpush.bf16.msra.mxu0 %v9358_v28  ;;  %v7822_v3 = vor.u32 %v9918_v12, %v7821_v19  ;;  %v10271_v28 = vld [vmem:[#allocation13 + $0xb3c] sm:$0xf]  ;;  %v8518_v19 = vor.u32 %v10089_v40, %v8515_v53  ;;  %v8745_v40 = vld [vmem:[#allocation13 + $0x750] sm:$0xf]  ;;  %v10149_v53 = vld [vmem:[#allocation13 + $0x768] sm:$0xf0] }
 0x398   :  { %6212 = vmatmul.bf16.vlgmr.msra.gmra.mxu1 %v10927_v30  ;;  %6296 = vmatmul.bf16.vlgmr.msrb.gmra.mxu3 %v10912_v11 }
 0x399   :  { %6260 = vmatpush.bf16.msrb.mxu1 %v8686_v52  ;;  %6344 = vmatpush.bf16.msra.mxu3 %v8242_v33  ;;  %v5948_v50 = vadd.f32 %v5947_v43, %v5934_v36  ;;  %v5949_v52 = vpop.f32.mrf.mxu2  ;;  %v8914_v33 = vor.u32 %v10191_v18, %v8913_v27  ;;  %v8574_v36 = vor.u32 %v10103_v57, %v8571_v21  ;;  %v5991_v14 = vpop.f32.mrf.mxu1  ;;  %v9974_v27 = vld [vmem:[#allocation13 + $0x1f0] sm:$0xf0]  ;;  %v9579_v57 = vld [vmem:[#allocation13 + $0xdf4] sm:$0xf0] }
 0x39a   :  { %v9246_v43 = vor.u32 %v10271_v28, %v9243_v0  ;;  %v10163_v0 = vld [vmem:[#allocation13 + $0x7d8] sm:$0xf0] }
 0x39b   :  { %6332 = vmatpush.bf16.msra.mxu2 %v7962_v16  ;;  %v10285_v16 = vld [vmem:[#allocation13 + $0xbac] sm:$0xf]  ;;  %6303 = vmatpush.bf16.msra.mxu0 %v9330_v38  ;;  %v5962_v8 = vadd.f32 %v5961_v13, %v5948_v50  ;;  %v8130_v38 = vor.u32 %v9995_v32, %v8129_v31  ;;  %v5977_v13 = vpop.f32.mrf.mxu0 }
 0x39c   :  { %v9302_v62 = vor.u32 %v10285_v16, %v9299_v59  ;;  %v8101_v16 = vld [vmem:[#allocation13 + $0x248] sm:$0xf]  ;;  %v9988_v59 = vld [vmem:[#allocation13 + $0x260] sm:$0xf0]  ;;  %v10177_v50 = vld [vmem:[#allocation13 + $0x848] sm:$0xf0] }
 0x39d   :  { %6261 = vmatpush.bf16.msrb.mxu1 %v8658_v9  ;;  %6345 = vmatpush.bf16.msra.mxu3 %v8214_v37  ;;  %v5976_v51 = vadd.f32 %v5975_v22, %v5962_v8  ;;  %v8543_v9 = vld [vmem:[#allocation13 + $0x5dc] sm:$0xf0]  ;;  %v8886_v37 = vor.u32 %v10184_v10, %v8885_v55  ;;  %v8858_v2 = vor.u32 %v10177_v50, %v8857_v49  ;;  %v8487_v8 = vld [vmem:[#allocation13 + $0x56c] sm:$0xf0] }
 0x39e   :  { %v8546_v39 = vor.u32 %v10096_v47, %v8543_v9  ;;  %v9159_v22 = vld [vmem:[#allocation13 + $0xaac] sm:$0xf0]  ;;  %v9551_v55 = vld [vmem:[#allocation13 + $0xdbc] sm:$0xf0]  ;;  %v10072_v47 = vld [vmem:[#allocation13 + $0x500] sm:$0xf0] }
 0x39f   :  { %6333 = vmatpush.bf16.msra.mxu2 %v7934_v35  ;;  %v5936_v35 = vadd.f32 %v5935_v6, %v5922_v58  ;;  %6304 = vmatpush.bf16.msra.mxu0 %v9302_v62  ;;  %v5990_v25 = vadd.f32 %v5989_v29, %v5976_v51  ;;  %v8102_v6 = vor.u32 %v9988_v59, %v8101_v16  ;;  %v9187_v58 = vld [vmem:[#allocation13 + $0xae4] sm:$0xf0]  ;;  %v8073_v62 = vld [vmem:[#allocation13 + $0x210] sm:$0xf]  ;;  %v9137_v51 = vld [vmem:[#allocation13 + $0xa60] sm:$0xf] }
 0x3a0   :  { %v8773_v9 = vld [vmem:[#allocation13 + $0x788] sm:$0xf]  ;;  %v10341_v16 = vld [vmem:[#allocation13 + $0xd6c] sm:$0xf]  ;;  %v8409_v50 = vld [vmem:[#allocation13 + $0x4b0] sm:$0xf] }
 0x3a1   :  { %6262 = vmatpush.bf16.msrb.mxu1 %v8630_v15  ;;  %6346 = vmatpush.bf16.msra.mxu3 %v8186_v1  ;;  %10387 = vtanh.f32 %v5990_v25  ;;  %v10257_v15 = vld [vmem:[#allocation13 + $0xacc] sm:$0xf]  ;;  %v8829_v1 = vld [vmem:[#allocation13 + $0x7f8] sm:$0xf]  ;;  %v9523_v59 = vld [vmem:[#allocation13 + $0xd84] sm:$0xf0] }
 0x3a2   :  { %v9190_v7 = vor.u32 %v10257_v15, %v9187_v58  ;;  %v8830_v21 = vor.u32 %v10170_v4, %v8829_v1  ;;  %v9526_v15 = vor.u32 %v10341_v16, %v9523_v59  ;;  %v8381_v1 = vld [vmem:[#allocation13 + $0x478] sm:$0xf]  ;;  %v10058_v4 = vld [vmem:[#allocation13 + $0x490] sm:$0xf0]  ;;  %v9383_v16 = vld [vmem:[#allocation13 + $0xc6c] sm:$0xf0] }
 0x3a3   :  { %6334 = vmatpush.bf16.msra.mxu2 %v7906_v23  ;;  %v5950_v23 = vadd.f32 %v5949_v52, %v5936_v35  ;;  %6305 = vmatpush.bf16.msra.mxu0 %v9274_v5  ;;  %v10250_v35 = vld [vmem:[#allocation13 + $0xa94] sm:$0xf]  ;;  %v10355_v5 = vld [vmem:[#allocation13 + $0xddc] sm:$0xf]  ;;  %v8465_v52 = vld [vmem:[#allocation13 + $0x520] sm:$0xf] }
 0x3a4   :  { %v9582_v31 = vor.u32 %v10355_v5, %v9579_v57  ;;  %v9025_v5 = vld [vmem:[#allocation13 + $0x980] sm:$0xf]  ;;  %v10219_v57 = vld [vmem:[#allocation13 + $0x998] sm:$0xf0]  ;;  %v8269_v59 = vld [vmem:[#allocation13 + $0x398] sm:$0xf] }
 0x3a5   :  { %6263 = vmatpush.bf16.msrb.mxu1 %v8602_v42  ;;  %6347 = vmatpush.bf16.msra.mxu3 %v8158_v34  ;;  %v8045_v42 = vld [vmem:[#allocation13 + $0x1d8] sm:$0xf]  ;;  %v8801_v34 = vld [vmem:[#allocation13 + $0x7c0] sm:$0xf] }
 0x3a6   :  { %v8046_v32 = vor.u32 %v9974_v27, %v8045_v42  ;;  %v8802_v10 = vor.u32 %v10163_v0, %v8801_v34  ;;  %v8353_v42 = vld [vmem:[#allocation13 + $0x440] sm:$0xf]  ;;  %v10051_v27 = vld [vmem:[#allocation13 + $0x458] sm:$0xf0]  ;;  %v8325_v0 = vld [vmem:[#allocation13 + $0x408] sm:$0xf] }
 0x3a7   :  { %6335 = vmatpush.bf16.msra.mxu2 %v7878_v41  ;;  %v5964_v41 = vadd.f32 %v5963_v44, %v5950_v23  ;;  %6306 = vmatpush.bf16.msra.mxu0 %v9246_v43  ;;  %v10388_v12 = vpop.eup %10387  ;;  %v10247_v23 = vld [vmem:[#allocation13 + $0xa78] sm:$0xf0]  ;;  %v8437_v43 = vld [vmem:[#allocation13 + $0x4e8] sm:$0xf]  ;;  %v10156_v44 = vld [vmem:[#allocation13 + $0x7a0] sm:$0xf0] }
 0x3a8   :  { %6458 = vst [vmem:[#allocation16 + $0x10] sm:$0xff] %v10388_v12  ;;  %v9138_v25 = vor.u32 %v10247_v23, %v9137_v51  ;;  %v10327_v12 = vld [vmem:[#allocation13 + $0xcfc] sm:$0xf]  ;;  %v9439_v34 = vld [vmem:[#allocation13 + $0xcdc] sm:$0xf0]  ;;  %v6017_v23 = vpop.f32.mrf.mxu3 }
 0x3a9   :  { %6264 = vmatpush.bf16.msrb.mxu1 %v8574_v36  ;;  %6348 = vmatpush.bf16.msra.mxu3 %v8130_v38  ;;  %v5978_v56 = vadd.f32 %v5977_v13, %v5964_v41  ;;  %v10348_v36 = vld [vmem:[#allocation13 + $0xda4] sm:$0xf]  ;;  %v9109_v38 = vld [vmem:[#allocation13 + $0xa28] sm:$0xf]  ;;  %v9081_v13 = vld [vmem:[#allocation13 + $0x9f0] sm:$0xf] }
 0x3aa   :  { %v9554_v41 = vor.u32 %v10348_v36, %v9551_v55  ;;  %v9110_v49 = vor.u32 %v10240_v46, %v9109_v38  ;;  %v10044_v51 = vld [vmem:[#allocation13 + $0x420] sm:$0xf0]  ;;  %v10313_v36 = vld [vmem:[#allocation13 + $0xc8c] sm:$0xf]  ;;  %v9411_v55 = vld [vmem:[#allocation13 + $0xca4] sm:$0xf0] }
 0x3ab   :  { %6336 = vmatpush.bf16.msra.mxu2 %v7850_v63  ;;  %v9981_v63 = vld [vmem:[#allocation13 + $0x228] sm:$0xf0]  ;;  %v5992_v26 = vadd.f32 %v5991_v14, %v5978_v56  ;;  %6307 = vmatpush.bf16.msra.mxu0 %v9218_v54  ;;  %v9495_v56 = vld [vmem:[#allocation13 + $0xd4c] sm:$0xf0]  ;;  %v8717_v14 = vld [vmem:[#allocation13 + $0x718] sm:$0xf] }
 0x3ac   :  { %v8074_v18 = vor.u32 %v9981_v63, %v8073_v62  ;;  %v10065_v54 = vld [vmem:[#allocation13 + $0x4c8] sm:$0xf0]  ;;  %v10334_v62 = vld [vmem:[#allocation13 + $0xd34] sm:$0xf]  ;;  %v8969_v38 = vld [vmem:[#allocation13 + $0x910] sm:$0xf] }
 0x3ad   :  { %6265 = vmatpush.bf16.msrb.mxu1 %v8546_v39  ;;  %6349 = vmatpush.bf16.msra.mxu3 %v8102_v6  ;;  %10389 = vtanh.f32 %v5992_v26  ;;  %v8774_v39 = vor.u32 %v10156_v44, %v8773_v9  ;;  %v10233_v6 = vld [vmem:[#allocation13 + $0xa08] sm:$0xf0]  ;;  %v8410_v58 = vor.u32 %v10065_v54, %v8409_v50  ;;  %v9467_v26 = vld [vmem:[#allocation13 + $0xd14] sm:$0xf0]  ;;  %v6031_v44 = vpop.f32.mrf.mxu0 }
 0x3ae   :  { %v9082_v63 = vor.u32 %v10233_v6, %v9081_v13  ;;  %v10037_v9 = vld [vmem:[#allocation13 + $0x3e8] sm:$0xf0]  ;;  %v8941_v54 = vld [vmem:[#allocation13 + $0x8d8] sm:$0xf]  ;;  %v10198_v6 = vld [vmem:[#allocation13 + $0x8f0] sm:$0xf0] }
 0x3af   :  { %6337 = vmatpush.bf16.msra.mxu2 %v7822_v3  ;;  %v10079_v3 = vld [vmem:[#allocation13 + $0x538] sm:$0xf0]  ;;  %6308 = vmatpush.bf16.msra.mxu0 %v9190_v7  ;;  %v10205_v46 = vld [vmem:[#allocation13 + $0x928] sm:$0xf0] }
 0x3b0   :  { %v8466_v29 = vor.u32 %v10079_v3, %v8465_v52  ;;  %v8354_v52 = vor.u32 %v10051_v27, %v8353_v42  ;;  %v10320_v3 = vld [vmem:[#allocation13 + $0xcc4] sm:$0xf]  ;;  %v8970_v50 = vor.u32 %v10205_v46, %v8969_v38  ;;  %v10275_v38 = vld [vmem:[#allocation13 + $0xb58] sm:$0xf0] }
 0x3b1   :  { %6266 = vmatpush.bf16.msrb.mxu1 %v8518_v19  ;;  %6350 = vmatpush.bf16.msra.mxu3 %v8074_v18  ;;  %v10142_v19 = vld [vmem:[#allocation13 + $0x730] sm:$0xf0]  ;;  %v6003_v18 = vpop.f32.mrf.mxu2 }
 0x3b2   :  { %6338 = vmatmul.bf16.vlgmr.msra.gmra.mxu2 %v10890_v24  ;;  %v10082_v24 = vld [vmem:[#allocation13 + $0x554] sm:$0xf]  ;;  %v8718_v7 = vor.u32 %v10142_v19, %v8717_v14  ;;  %v8942_v14 = vor.u32 %v10198_v6, %v8941_v54  ;;  %v10268_v54 = vld [vmem:[#allocation13 + $0xb20] sm:$0xf0]  ;;  %v8521_v6 = vld [vmem:[#allocation13 + $0x590] sm:$0xf] }
 0x3b3   :  { %6386 = vmatpush.bf16.msrb.mxu2 %v8914_v33  ;;  %v8490_v28 = vor.u32 %v10082_v24, %v8487_v8  ;;  %v9162_v33 = vor.u32 %v10250_v35, %v9159_v22  ;;  %v10390_v48 = vpop.eup %10389  ;;  %v9053_v24 = vld [vmem:[#allocation13 + $0x9b8] sm:$0xf]  ;;  %v10226_v8 = vld [vmem:[#allocation13 + $0x9d0] sm:$0xf0]  ;;  %v9498_v35 = vor.u32 %v10334_v62, %v9495_v56 }
 0x3b4   :  { %6465 = vst [vmem:[#allocation16 + $0x48] sm:$0xff] %v10390_v48  ;;  %v9054_v22 = vor.u32 %v10226_v8, %v9053_v24  ;;  %v9414_v48 = vor.u32 %v10313_v36, %v9411_v55  ;;  %v8661_v24 = vld [vmem:[#allocation13 + $0x6a8] sm:$0xf]  ;;  %v10128_v8 = vld [vmem:[#allocation13 + $0x6c0] sm:$0xf0] }
 0x3b5   :  { %6267 = vmatpush.bf16.msrb.mxu1 %v8490_v28  ;;  %6309 = vmatpush.bf16.msra.mxu0 %v9162_v33  ;;  %v9026_v28 = vor.u32 %v10219_v57, %v9025_v5  ;;  %v8997_v33 = vld [vmem:[#allocation13 + $0x948] sm:$0xf]  ;;  %v6045_v13 = vpop.f32.mrf.mxu1  ;;  %v10121_v5 = vld [vmem:[#allocation13 + $0x688] sm:$0xf0]  ;;  %v9305_v57 = vld [vmem:[#allocation13 + $0xbb0] sm:$0xf] }
 0x3b6   :  { %6351 = vmatpush.bf16.msra.mxu3 %v8046_v32  ;;  %v9442_v32 = vor.u32 %v10320_v3, %v9439_v34 }
 0x3b7   :  { %6387 = vmatpush.bf16.msrb.mxu2 %v8886_v37  ;;  %v8438_v37 = vor.u32 %v10072_v47, %v8437_v43  ;;  %v8297_v47 = vld [vmem:[#allocation13 + $0x3d0] sm:$0xf] }
 0x3b8   :  { %6268 = vmatmul.bf16.vlgmr.msrb.gmra.mxu1 %v10899_v61  ;;  %6310 = vmatmul.bf16.vlgmr.msra.gmra.mxu0 %v10920_v45 }
 0x3b9   :  { %6316 = vmatpush.bf16.msra.mxu1 %v9582_v31  ;;  %6358 = vmatpush.bf16.msrb.mxu0 %v8466_v29  ;;  %v10212_v31 = vld [vmem:[#allocation13 + $0x960] sm:$0xf0]  ;;  %v8326_v29 = vor.u32 %v10044_v51, %v8325_v0 }
 0x3ba   :  { %6400 = vmatpush.bf16.msrb.mxu3 %v9138_v25  ;;  %v8998_v43 = vor.u32 %v10212_v31, %v8997_v33  ;;  %v8605_v33 = vld [vmem:[#allocation13 + $0x638] sm:$0xf]  ;;  %v10114_v31 = vld [vmem:[#allocation13 + $0x650] sm:$0xf0] }
 0x3bb   :  { %6388 = vmatpush.bf16.msrb.mxu2 %v8858_v2  ;;  %6352 = vmatmul.bf16.vlgmr.msra.gmra.mxu3 %v10878_v60  ;;  %v8746_v2 = vor.u32 %v10149_v53, %v8745_v40  ;;  %v8382_v60 = vor.u32 %v10058_v4, %v8381_v1  ;;  %v8689_v40 = vld [vmem:[#allocation13 + $0x6e0] sm:$0xf]  ;;  %v10135_v53 = vld [vmem:[#allocation13 + $0x6f8] sm:$0xf0] }
 0x3bc   :  { %v8690_v1 = vor.u32 %v10135_v53, %v8689_v40 }
 0x3bd   :  { %6317 = vmatpush.bf16.msra.mxu1 %v9554_v41  ;;  %6359 = vmatpush.bf16.msrb.mxu0 %v8438_v37  ;;  %v10306_v41 = vld [vmem:[#allocation13 + $0xc54] sm:$0xf]  ;;  %v6005_v37 = vpop.f32.mrf.mxu2 }
 0x3be   :  { %6401 = vmatpush.bf16.msrb.mxu3 %v9110_v49  ;;  %v9386_v56 = vor.u32 %v10306_v41, %v9383_v16 }
 0x3bf   :  { %6389 = vmatpush.bf16.msrb.mxu2 %v8830_v21  ;;  %v9470_v21 = vor.u32 %v10327_v12, %v9467_v26 }
 0x3c1   :  { %6318 = vmatpush.bf16.msra.mxu1 %v9526_v15  ;;  %6360 = vmatpush.bf16.msrb.mxu0 %v8410_v58  ;;  %v9361_v15 = vld [vmem:[#allocation13 + $0xc20] sm:$0xf]  ;;  %v10303_v58 = vld [vmem:[#allocation13 + $0xc38] sm:$0xf0] }
 0x3c2   :  { %6402 = vmatpush.bf16.msrb.mxu3 %v9082_v63  ;;  %v9362_v19 = vor.u32 %v10303_v58, %v9361_v15  ;;  %v10093_v15 = vld [vmem:[#allocation13 + $0x5a8] sm:$0xf0] }
 0x3c3   :  { %6390 = vmatpush.bf16.msrb.mxu2 %v8802_v10  ;;  %v11010_v10 = vld [vmem:[#allocation14] sm:$0xff] }
 0x3c4   :  { %v3343_v25 = vperm.slane %v11010_v10, 3 }
 0x3c5   :  { %6319 = vmatpush.bf16.msra.mxu1 %v9498_v35  ;;  %6361 = vmatpush.bf16.msrb.mxu0 %v8382_v60  ;;  %v9333_v35 = vld [vmem:[#allocation13 + $0xbe8] sm:$0xf]  ;;  %v10296_v60 = vld [vmem:[#allocation13 + $0xc00] sm:$0xf0]  ;;  %v6059_v26 = vpop.f32.mrf.mxu2 }
 0x3c6   :  { %6403 = vmatpush.bf16.msrb.mxu3 %v9054_v22  ;;  %v6004_v49 = vadd.f32 %v6003_v18, %v3343_v25  ;;  %v8662_v22 = vor.u32 %v10128_v8, %v8661_v24  ;;  %v6006_v42 = vadd.f32 %v6005_v37, %v3343_v25  ;;  %v9334_v27 = vor.u32 %v10296_v60, %v9333_v35  ;;  %v8633_v18 = vld [vmem:[#allocation13 + $0x670] sm:$0xf]  ;;  %v10086_v8 = vld [vmem:[#allocation13 + $0x570] sm:$0xf0]  ;;  %v9165_v35 = vld [vmem:[#allocation13 + $0xa98] sm:$0xf] }
 0x3c7   :  { %6391 = vmatpush.bf16.msrb.mxu2 %v8774_v39  ;;  %v10030_v39 = vld [vmem:[#allocation13 + $0x3b0] sm:$0xf0]  ;;  %v8634_v0 = vor.u32 %v10121_v5, %v8633_v18  ;;  %v10352_v18 = vld [vmem:[#allocation13 + $0xdc0] sm:$0xf0] }
 0x3c8   :  { %v6018_v62 = vadd.f32 %v6017_v23, %v6004_v49  ;;  %v8270_v63 = vor.u32 %v10030_v39, %v8269_v59  ;;  %v8549_v59 = vld [vmem:[#allocation13 + $0x5c8] sm:$0xf]  ;;  %v10100_v39 = vld [vmem:[#allocation13 + $0x5e0] sm:$0xf0]  ;;  %v10254_v60 = vld [vmem:[#allocation13 + $0xab0] sm:$0xf0] }
 0x3c9   :  { %6320 = vmatpush.bf16.msra.mxu1 %v9470_v21  ;;  %6362 = vmatpush.bf16.msrb.mxu0 %v8354_v52  ;;  %v10289_v21 = vld [vmem:[#allocation13 + $0xbc8] sm:$0xf0]  ;;  %v8550_v53 = vor.u32 %v10100_v39, %v8549_v59 }
 0x3ca   :  { %6404 = vmatpush.bf16.msrb.mxu3 %v9026_v28  ;;  %v6032_v4 = vadd.f32 %v6031_v44, %v6018_v62  ;;  %v6047_v28 = vpop.f32.mrf.mxu1  ;;  %v9306_v23 = vor.u32 %v10289_v21, %v9305_v57  ;;  %v9193_v62 = vld [vmem:[#allocation13 + $0xad0] sm:$0xf] }
 0x3cb   :  { %6392 = vmatpush.bf16.msrb.mxu2 %v8746_v2  ;;  %v6019_v2 = vpop.f32.mrf.mxu3  ;;  %v9529_v21 = vld [vmem:[#allocation13 + $0xd70] sm:$0xf] }
 0x3cc   :  { %v6046_v12 = vadd.f32 %v6045_v13, %v6032_v4  ;;  %v6020_v52 = vadd.f32 %v6019_v2, %v6006_v42  ;;  %v8493_v4 = vld [vmem:[#allocation13 + $0x558] sm:$0xf] }
 0x3cd   :  { %6321 = vmatpush.bf16.msra.mxu1 %v9442_v32  ;;  %6363 = vmatpush.bf16.msrb.mxu0 %v8326_v29  ;;  %v9277_v32 = vld [vmem:[#allocation13 + $0xb78] sm:$0xf]  ;;  %v10282_v29 = vld [vmem:[#allocation13 + $0xb90] sm:$0xf0]  ;;  %v6061_v44 = vpop.f32.mrf.mxu2 }
 0x3ce   :  { %6405 = vmatpush.bf16.msrb.mxu3 %v8998_v43  ;;  %v6060_v3 = vadd.f32 %v6059_v26, %v6046_v12  ;;  %v8606_v43 = vor.u32 %v10114_v31, %v8605_v33  ;;  %v9585_v12 = vld [vmem:[#allocation13 + $0xde0] sm:$0xf]  ;;  %v10359_v26 = vld [vmem:[#allocation13 + $0xdf8] sm:$0xf0] }
 0x3cf   :  { %6393 = vmatpush.bf16.msrb.mxu2 %v8718_v7  ;;  %v6033_v7 = vpop.f32.mrf.mxu0  ;;  %v9586_v42 = vor.u32 %v10359_v26, %v9585_v12  ;;  %v3345_v26 = vperm.slane %v11010_v10, 5 }
 0x3d0   :  { %v6034_v51 = vadd.f32 %v6033_v7, %v6020_v52  ;;  %v8494_v7 = vor.u32 %v10086_v8, %v8493_v4  ;;  %v10345_v52 = vld [vmem:[#allocation13 + $0xd88] sm:$0xf0] }
 0x3d1   :  { %6322 = vmatpush.bf16.msra.mxu1 %v9414_v48 }
 0x3d2   :  { %6394 = vmatmul.bf16.vlgmr.msrb.gmra.mxu2 %v10907_v17  ;;  %v8298_v17 = vor.u32 %v10037_v9, %v8297_v47  ;;  %6406 = vmatpush.bf16.msrb.mxu3 %v8970_v50  ;;  %v6048_v55 = vadd.f32 %v6047_v28, %v6034_v51  ;;  %v8577_v47 = vld [vmem:[#allocation13 + $0x600] sm:$0xf]  ;;  %v10107_v9 = vld [vmem:[#allocation13 + $0x618] sm:$0xf0]  ;;  %v9221_v50 = vld [vmem:[#allocation13 + $0xb08] sm:$0xf] }
 0x3d3   :  { %v6073_v34 = vpop.f32.mrf.mxu3  ;;  %v8578_v37 = vor.u32 %v10107_v9, %v8577_v47  ;;  %v9222_v13 = vor.u32 %v10268_v54, %v9221_v50  ;;  %v10338_v28 = vld [vmem:[#allocation13 + $0xd50] sm:$0xf0]  ;;  %v9473_v51 = vld [vmem:[#allocation13 + $0xd00] sm:$0xf]  ;;  %v9389_v9 = vld [vmem:[#allocation13 + $0xc58] sm:$0xf] }
 0x3d4   :  { %6364 = vmatpush.bf16.msrb.mxu0 %v8298_v17  ;;  %v6074_v36 = vadd.f32 %v6073_v34, %v6060_v3  ;;  %v6062_v48 = vadd.f32 %v6061_v44, %v6048_v55  ;;  %v9530_v3 = vor.u32 %v10345_v52, %v9529_v21  ;;  %v9501_v34 = vld [vmem:[#allocation13 + $0xd38] sm:$0xf]  ;;  %v10310_v44 = vld [vmem:[#allocation13 + $0xc70] sm:$0xf0] }
 0x3d5   :  { %6323 = vmatpush.bf16.msra.mxu1 %v9386_v56  ;;  %v6101_v41 = vpop.f32.mrf.mxu1  ;;  %v10261_v56 = vld [vmem:[#allocation13 + $0xae8] sm:$0xf0]  ;;  %v6115_v33 = vpop.f32.mrf.mxu2 }
 0x3d6   :  { %6407 = vmatpush.bf16.msrb.mxu3 %v8942_v14  ;;  %v9194_v24 = vor.u32 %v10261_v56, %v9193_v62 }
 0x3d7   :  { %v6087_v25 = vpop.f32.mrf.mxu0 }
 0x3d8   :  { %6365 = vmatpush.bf16.msrb.mxu0 %v8270_v63  ;;  %6324 = vmatmul.bf16.vlgmr.msra.gmra.mxu1 %v10927_v30  ;;  %v6088_v46 = vadd.f32 %v6087_v25, %v6074_v36  ;;  %v9417_v25 = vld [vmem:[#allocation13 + $0xc90] sm:$0xf] }
 0x3d9   :  { %6372 = vmatpush.bf16.msrb.mxu1 %v8690_v1  ;;  %6408 = vmatmul.bf16.vlgmr.msrb.gmra.mxu3 %v10912_v11  ;;  %v9249_v11 = vld [vmem:[#allocation13 + $0xb40] sm:$0xf]  ;;  %v8522_v1 = vor.u32 %v10093_v15, %v8521_v6 }
 0x3da   :  { %v6102_v17 = vadd.f32 %v6101_v41, %v6088_v46  ;;  %v9250_v16 = vor.u32 %v10275_v38, %v9249_v11 }
 0x3db   :  { %6366 = vmatmul.bf16.vlgmr.msrb.gmra.mxu0 %v10903_v20  ;;  %v9278_v20 = vor.u32 %v10282_v29, %v9277_v32  ;;  %v6075_v49 = vpop.f32.mrf.mxu3  ;;  %v9445_v32 = vld [vmem:[#allocation13 + $0xcc8] sm:$0xf]  ;;  %v10324_v29 = vld [vmem:[#allocation13 + $0xce0] sm:$0xf0] }
 0x3dc   :  { %6414 = vmatpush.bf16.msra.mxu0 %v9362_v19  ;;  %v6076_v40 = vadd.f32 %v6075_v49, %v6062_v48  ;;  %10391 = vtanh.f32 %v6102_v17  ;;  %v9446_v55 = vor.u32 %v10324_v29, %v9445_v32  ;;  %v9390_v48 = vor.u32 %v10310_v44, %v9389_v9 }
 0x3dd   :  { %6373 = vmatpush.bf16.msrb.mxu1 %v8662_v22  ;;  %v6103_v63 = vpop.f32.mrf.mxu1  ;;  %v9166_v22 = vor.u32 %v10254_v60, %v9165_v35  ;;  %v6117_v47 = vpop.f32.mrf.mxu2 }
 0x3df   :  { %v6089_v58 = vpop.f32.mrf.mxu0 }
 0x3e0   :  { %6415 = vmatpush.bf16.msra.mxu0 %v9334_v27  ;;  %v6090_v2 = vadd.f32 %v6089_v58, %v6076_v40  ;;  %v9557_v27 = vld [vmem:[#allocation13 + $0xda8] sm:$0xf] }
 0x3e1   :  { %6374 = vmatpush.bf16.msrb.mxu1 %v8634_v0  ;;  %v9558_v57 = vor.u32 %v10352_v18, %v9557_v27  ;;  %v9502_v0 = vor.u32 %v10338_v28, %v9501_v34 }
 0x3e2   :  { %v10392_v14 = vpop.eup %10391  ;;  %v6104_v19 = vadd.f32 %v6103_v63, %v6090_v2 }
 0x3e3   :  { %6459 = vst [vmem:[#allocation16 + $0x18] sm:$0xff] %v10392_v14  ;;  %v6129_v36 = vpop.f32.mrf.mxu3 }
 0x3e4   :  { %6416 = vmatpush.bf16.msra.mxu0 %v9306_v23  ;;  %10393 = vtanh.f32 %v6104_v19  ;;  %v10331_v23 = vld [vmem:[#allocation13 + $0xd18] sm:$0xf0] }
 0x3e5   :  { %6375 = vmatpush.bf16.msrb.mxu1 %v8606_v43  ;;  %v9474_v31 = vor.u32 %v10331_v23, %v9473_v51 }
 0x3e7   :  { %v6143_v43 = vpop.f32.mrf.mxu0 }
 0x3e8   :  { %6417 = vmatpush.bf16.msra.mxu0 %v9278_v20 }
 0x3e9   :  { %6376 = vmatpush.bf16.msrb.mxu1 %v8578_v37 }
 0x3ea   :  { %v10394_v5 = vpop.eup %10393 }
 0x3eb   :  { %6466 = vst [vmem:[#allocation16 + $0x50] sm:$0xff] %v10394_v5  ;;  %v6131_v41 = vpop.f32.mrf.mxu3 }
 0x3ec   :  { %6418 = vmatpush.bf16.msra.mxu0 %v9250_v16  ;;  %v6171_v16 = vpop.f32.mrf.mxu2 }
 0x3ed   :  { %6377 = vmatpush.bf16.msrb.mxu1 %v8550_v53 }
 0x3ef   :  { %v6145_v59 = vpop.f32.mrf.mxu0 }
 0x3f0   :  { %6419 = vmatpush.bf16.msra.mxu0 %v9222_v13 }
 0x3f1   :  { %6378 = vmatpush.bf16.msrb.mxu1 %v8522_v1 }
 0x3f3   :  { %v6185_v54 = vpop.f32.mrf.mxu3 }
 0x3f4   :  { %6420 = vmatpush.bf16.msra.mxu0 %v9194_v24  ;;  %v6173_v58 = vpop.f32.mrf.mxu2 }
 0x3f5   :  { %6379 = vmatpush.bf16.msrb.mxu1 %v8494_v7  ;;  %v6157_v38 = vpop.f32.mrf.mxu1 }
 0x3f7   :  { %v6199_v15 = vpop.f32.mrf.mxu0 }
 0x3f8   :  { %6421 = vmatpush.bf16.msra.mxu0 %v9166_v22  ;;  %6380 = vmatmul.bf16.vlgmr.msrb.gmra.mxu1 %v10899_v61  ;;  %v10317_v61 = vld [vmem:[#allocation13 + $0xca8] sm:$0xf0] }
 0x3f9   :  { %6428 = vmatpush.bf16.msra.mxu1 %v9586_v42  ;;  %v9418_v20 = vor.u32 %v10317_v61, %v9417_v25 }
 0x3fb   :  { %6422 = vmatmul.bf16.vlgmr.msra.gmra.mxu0 %v10920_v45  ;;  %v3344_v45 = vperm.slane %v11010_v10, 4  ;;  %v6187_v1 = vpop.f32.mrf.mxu3 }
 0x3fc   :  { %v6227_v60 = vpop.f32.mrf.mxu2 }
 0x3fd   :  { %6429 = vmatpush.bf16.msra.mxu1 %v9558_v57  ;;  %v6116_v11 = vadd.f32 %v6115_v33, %v3344_v45  ;;  %v6118_v39 = vadd.f32 %v6117_v47, %v3344_v45  ;;  %v6159_v40 = vpop.f32.mrf.mxu1  ;;  %v6228_v42 = vadd.f32 %v6227_v60, %v3345_v26 }
 0x3ff   :  { %v6130_v46 = vadd.f32 %v6129_v36, %v6116_v11  ;;  %v6132_v49 = vadd.f32 %v6131_v41, %v6118_v39  ;;  %v6201_v14 = vpop.f32.mrf.mxu0 }
 0x401   :  { %6430 = vmatpush.bf16.msra.mxu1 %v9530_v3  ;;  %v6144_v37 = vadd.f32 %v6143_v43, %v6130_v46  ;;  %v6146_v53 = vadd.f32 %v6145_v59, %v6132_v49 }
 0x403   :  { %v6158_v17 = vadd.f32 %v6157_v38, %v6144_v37  ;;  %v6160_v6 = vadd.f32 %v6159_v40, %v6146_v53  ;;  %v6241_v12 = vpop.f32.mrf.mxu3  ;;  %v3346_v37 = vperm.slane %v11010_v10, 6 }
 0x404   :  { %v6229_v22 = vpop.f32.mrf.mxu2  ;;  %v6242_v18 = vadd.f32 %v6241_v12, %v6228_v42 }
 0x405   :  { %6431 = vmatpush.bf16.msra.mxu1 %v9502_v0  ;;  %v6172_v50 = vadd.f32 %v6171_v16, %v6158_v17  ;;  %v6174_v56 = vadd.f32 %v6173_v58, %v6160_v6  ;;  %v6230_v34 = vadd.f32 %v6229_v22, %v3345_v26 }
 0x407   :  { %v6186_v13 = vadd.f32 %v6185_v54, %v6172_v50  ;;  %v6188_v4 = vadd.f32 %v6187_v1, %v6174_v56 }
 0x409   :  { %6432 = vmatpush.bf16.msra.mxu1 %v9474_v31  ;;  %v6200_v62 = vadd.f32 %v6199_v15, %v6186_v13  ;;  %v6202_v19 = vadd.f32 %v6201_v14, %v6188_v4 }
 0x40b   :  { %v6243_v5 = vpop.f32.mrf.mxu3 }
 0x40c   :  { %v6244_v28 = vadd.f32 %v6243_v5, %v6230_v34 }
 0x40d   :  { %6433 = vmatpush.bf16.msra.mxu1 %v9446_v55 }
 0x411   :  { %6434 = vmatpush.bf16.msra.mxu1 %v9418_v20 }
 0x413   :  { %v6255_v7 = vpop.f32.mrf.mxu0 }
 0x414   :  { %v6256_v57 = vadd.f32 %v6255_v7, %v6242_v18 }
 0x415   :  { %6435 = vmatpush.bf16.msra.mxu1 %v9390_v48  ;;  %v6213_v2 = vpop.f32.mrf.mxu1  ;;  %v6283_v52 = vpop.f32.mrf.mxu2 }
 0x416   :  { %v6214_v63 = vadd.f32 %v6213_v2, %v6200_v62 }
 0x418   :  { %6436 = vmatmul.bf16.vlgmr.msra.gmra.mxu1 %v10927_v30  ;;  %10395 = vtanh.f32 %v6214_v63 }
 0x41b   :  { %v6257_v3 = vpop.f32.mrf.mxu0  ;;  %v6297_v51 = vpop.f32.mrf.mxu3 }
 0x41c   :  { %v6258_v33 = vadd.f32 %v6257_v3, %v6244_v28 }
 0x41d   :  { %v6215_v24 = vpop.f32.mrf.mxu1  ;;  %v6285_v36 = vpop.f32.mrf.mxu2 }
 0x41e   :  { %v10396_v30 = vpop.eup %10395  ;;  %v6216_v8 = vadd.f32 %v6215_v24, %v6202_v19 }
 0x41f   :  { %6460 = vst [vmem:[#allocation16 + $0x20] sm:$0xff] %v10396_v30 }
 0x420   :  { %10397 = vtanh.f32 %v6216_v8 }
 0x423   :  { %v6299_v43 = vpop.f32.mrf.mxu3 }
 0x426   :  { %v10398_v35 = vpop.eup %10397 }
 0x427   :  { %6467 = vst [vmem:[#allocation16 + $0x58] sm:$0xff] %v10398_v35 }
 0x435   :  { %v6269_v27 = vpop.f32.mrf.mxu1  ;;  %v6311_v29 = vpop.f32.mrf.mxu0 }
 0x436   :  { %v6270_v21 = vadd.f32 %v6269_v27, %v6256_v57  ;;  %v6339_v48 = vpop.f32.mrf.mxu2 }
 0x437   :  { %v6340_v59 = vadd.f32 %v6339_v48, %v3346_v37 }
 0x438   :  { %v6284_v0 = vadd.f32 %v6283_v52, %v6270_v21 }
 0x43a   :  { %v6298_v31 = vadd.f32 %v6297_v51, %v6284_v0 }
 0x43c   :  { %v6312_v55 = vadd.f32 %v6311_v29, %v6298_v31 }
 0x43d   :  { %v6271_v23 = vpop.f32.mrf.mxu1  ;;  %v6313_v47 = vpop.f32.mrf.mxu0 }
 0x43e   :  { %v6272_v32 = vadd.f32 %v6271_v23, %v6258_v33  ;;  %v6353_v41 = vpop.f32.mrf.mxu3  ;;  %v6341_v16 = vpop.f32.mrf.mxu2 }
 0x43f   :  { %v6354_v49 = vadd.f32 %v6353_v41, %v6340_v59  ;;  %v6342_v6 = vadd.f32 %v6341_v16, %v3346_v37 }
 0x440   :  { %v6286_v25 = vadd.f32 %v6285_v36, %v6272_v32 }
 0x442   :  { %v6300_v20 = vadd.f32 %v6299_v43, %v6286_v25 }
 0x444   :  { %v6314_v9 = vadd.f32 %v6313_v47, %v6300_v20 }
 0x446   :  { %v6355_v50 = vpop.f32.mrf.mxu3 }
 0x447   :  { %v6356_v15 = vadd.f32 %v6355_v50, %v6342_v6 }
 0x455   :  { %v6325_v61 = vpop.f32.mrf.mxu1  ;;  %v6395_v53 = vpop.f32.mrf.mxu2 }
 0x456   :  { %v6326_v45 = vadd.f32 %v6325_v61, %v6312_v55 }
 0x458   :  { %10399 = vtanh.f32 %v6326_v45  ;;  %v6367_v17 = vpop.f32.mrf.mxu0 }
 0x459   :  { %v6368_v54 = vadd.f32 %v6367_v17, %v6354_v49 }
 0x45c   :  { %v6409_v62 = vpop.f32.mrf.mxu3 }
 0x45d   :  { %v6327_v44 = vpop.f32.mrf.mxu1  ;;  %v6397_v10 = vpop.f32.mrf.mxu2 }
 0x45e   :  { %v10400_v11 = vpop.eup %10399  ;;  %v6328_v38 = vadd.f32 %v6327_v44, %v6314_v9 }
 0x45f   :  { %6461 = vst [vmem:[#allocation16 + $0x28] sm:$0xff] %v10400_v11 }
 0x460   :  { %10401 = vtanh.f32 %v6328_v38  ;;  %v6369_v13 = vpop.f32.mrf.mxu0 }
 0x461   :  { %v6370_v2 = vadd.f32 %v6369_v13, %v6356_v15 }
 0x464   :  { %v6411_v8 = vpop.f32.mrf.mxu3 }
 0x466   :  { %v10402_v46 = vpop.eup %10401 }
 0x467   :  { %6468 = vst [vmem:[#allocation16 + $0x60] sm:$0xff] %v10402_v46 }
 0x475   :  { %v6381_v39 = vpop.f32.mrf.mxu1 }
 0x476   :  { %v6382_v40 = vadd.f32 %v6381_v39, %v6368_v54 }
 0x478   :  { %v6396_v58 = vadd.f32 %v6395_v53, %v6382_v40  ;;  %v6423_v4 = vpop.f32.mrf.mxu0 }
 0x47a   :  { %v6410_v63 = vadd.f32 %v6409_v62, %v6396_v58 }
 0x47c   :  { %v6424_v14 = vadd.f32 %v6423_v4, %v6410_v63 }
 0x47d   :  { %v6383_v56 = vpop.f32.mrf.mxu1 }
 0x47e   :  { %v6384_v1 = vadd.f32 %v6383_v56, %v6370_v2 }
 0x480   :  { %v6398_v19 = vadd.f32 %v6397_v10, %v6384_v1  ;;  %v6425_v60 = vpop.f32.mrf.mxu0 }
 0x482   :  { %v6412_v35 = vadd.f32 %v6411_v8, %v6398_v19 }
 0x484   :  { %v6426_v12 = vadd.f32 %v6425_v60, %v6412_v35 }
 0x495   :  { %v6437_v24 = vpop.f32.mrf.mxu1 }
 0x496   :  { %v6438_v30 = vadd.f32 %v6437_v24, %v6424_v14 }
 0x498   :  { %10403 = vtanh.f32 %v6438_v30 }
 0x49d   :  { %v6439_v26 = vpop.f32.mrf.mxu1 }
 0x49e   :  { %v10404_v7 = vpop.eup %10403  ;;  %v6440_v22 = vadd.f32 %v6439_v26, %v6426_v12 }
 0x49f   :  { %6462 = vst [vmem:[#allocation16 + $0x30] sm:$0xff] %v10404_v7 }
 0x4a0   :  { %10405 = vtanh.f32 %v6440_v22 }
 0x4a6   :  { %v10406_v42 = vpop.eup %10405 }
 0x4a7   :  { %6469 = vst [vmem:[#allocation16 + $0x68] sm:$0xff] %v10406_v42 }
 0x4a8   :  { %6482 = dma.vmem_to_hbm [thread:$0]  %s6475_s28, 1792, %s6477_s30, [#allocation4], %s10654_s10, %s10654_s10, %s10655_s11  }
 0x4a9   :  { %10635 = dma.done.wait [#allocation4], 1792  }
 0x4aa   :  { %10636 = vsyncadd [#allocation4], 4294965504 }
 0x4ab   :  { %6487 = vsyncpa [#allocation3], 1 }
 0x4ac   :  { %6488 = vsyncpa [#allocation6], 1 }
 0x4ad   :  { %6489 = vsyncpa [#allocation9], 1 }
 0x4ae   :  { %6490 = vsyncpa [#allocation12], 1 }
 0x4af   :  { %6491 = vsyncpa [#allocation15], 1 }
 0x4b0   :  { %6492 = vsyncpa [#allocation4], 1 }

</bundles_post_ra>
